<compile_context>
chip_gen: v7x
topology: tpu7x:2x2x1
jax: 0.10.0
libtpu: 0.0.40
codegen_flags: <defaults>
</compile_context>

<pallas_src>
import math

import jax
import jax.numpy as jnp
from jax import lax
from jax.experimental import pallas as pl
from jax.experimental.pallas import tpu as pltpu


# ----------------------------------------------------------------------------- helpers

def _round_up(x, m):
    return ((x + m - 1) // m) * m


def _batch_tiling(n):
    """(padded batch, per-step batch tile).  Tile is a multiple of 8 (sublane tile);
    grid always has >= 2 steps (v7x megacore); tile capped so VMEM stays small."""
    if n <= 8:
        return 16, 8
    tb = min(256, _round_up((n + 1) // 2, 8))
    npad = _round_up(n, tb)
    if npad // tb < 2:
        npad = 2 * tb
    return npad, tb


# ----------------------------------------------------------------------------- kernel

def _fused_forward_kernel(x_ref, m1_ref, b1l_ref, m2_ref, b2l_ref,
                          g1_ref, fb1_ref, w2_ref, fb2_ref, w3_ref, fb3_ref,
                          h_ref, y_ref):
    """Whole SimpleCNNMNIST forward for one batch tile of `tb` images.

    x_ref  : (1, 4, 7*tb, 28)  input rows ordered (y%4 phase, y//4, image), lanes = x
    m1_ref : (2, 5, 28, 72)    conv1 lane maps [x-quadrant qx, dy]; lanes (px*6 + c)
    m2_ref : (2, 5, 72, 64)    conv2 lane maps [x-quadrant gx, dy]; lanes (qx2*16 + c)
    g1_ref : (4, 64, H1)       fc1 weight blocks per pooled row p2 (torch view order)
    b*_ref : per-lane biases;  w2/w3: fc2/fc3 weights (already transposed)
    h_ref  : (tb, H2)  relu(fc2(...)) — the `x` returned by the module
    y_ref  : (tb, OUT) logits
    """
    tb = h_ref.shape[0]
    f32 = jnp.float32

    # -------- Stage 1: conv1 (1->6, 5x5) + bias + ReLU + 2x2 max-pool.
    # pool1[e] : (6*tb, 72) with rows (ry, image) and lanes (px*6 + c);
    # the pooled output row index is py = 2*ry + e.
    pool1 = []
    for e in range(2):                     # parity of the pooled output row
        qmax = None
        for qy in range(2):                # pooling quadrant (rows)
            for qx in range(2):            # pooling quadrant (cols, folded into m1)
                acc = None
                for dy in range(5):        # conv kernel row
                    c = 2 * e + qy + dy
                    m, s = c % 4, c // 4   # input y%4 phase, shift within the phase
                    lhs = x_ref[0, m, pl.ds(s * tb, 6 * tb), :]        # (6*tb, 28)
                    t = jnp.dot(lhs, m1_ref[qx, dy],
                                preferred_element_type=f32)            # (6*tb, 72)
                    acc = t if acc is None else acc + t
                qmax = acc if qmax is None else jnp.maximum(qmax, acc)
        pool1.append(jnp.maximum(qmax + b1l_ref[...], 0.0))

    # -------- Stage 2: conv2 (6->16, 5x5) + bias + ReLU + 2x2 max-pool.
    # pool2 : (4*tb, 64) with rows (p2, image) and lanes (q2*16 + c).
    qmax = None
    for gy in range(2):
        for gx in range(2):
            acc = None
            for dy in range(5):
                c = gy + dy
                e, s = c % 2, c // 2
                lhs = pool1[e][s * tb:(s + 4) * tb, :]                 # (4*tb, 72)
                t = jnp.dot(lhs, m2_ref[gx, dy], preferred_element_type=f32)
                acc = t if acc is None else acc + t
            qmax = acc if qmax is None else jnp.maximum(qmax, acc)
    pool2 = jnp.maximum(qmax + b2l_ref[...], 0.0)

    # -------- Stage 3: fc1 (sum over the 4 pooled rows -> no flatten) -> fc2 -> fc3.
    acc = None
    for p2 in range(4):
        t = jnp.dot(pool2[p2 * tb:(p2 + 1) * tb, :], g1_ref[p2],
                    preferred_element_type=f32)                        # (tb, H1)
        acc = t if acc is None else acc + t
    h1 = jnp.maximum(acc + fb1_ref[...], 0.0)
    h2 = jnp.maximum(jnp.dot(h1, w2_ref[...], preferred_element_type=f32)
                     + fb2_ref[...], 0.0)
    yv = jnp.dot(h2, w3_ref[...], preferred_element_type=f32) + fb3_ref[...]

    h_ref[...] = h2.astype(h_ref.dtype)
    y_ref[...] = yv.astype(y_ref.dtype)


# ----------------------------------------------------------------------------- forward

def simple_cnn_mnist_forward(x_nchw, p):
    n = x_nchw.shape[0]
    npad, tb = _batch_tiling(n)
    g = npad // tb

    # Only host-side prep: squeeze Cin=1 and permute rows to (y%4, y//4, image).
    img = x_nchw[:, 0].astype(jnp.float32)                 # (N, 28, 28)
    if npad != n:
        img = jnp.pad(img, ((0, npad - n), (0, 0), (0, 0)))
    xg = img.reshape(g, tb, 7, 4, 28)                      # (g, b, r, m, x)
    xg = jnp.transpose(xg, (0, 3, 2, 1, 4)).reshape(g, 4, 7 * tb, 28)

    h1d = p["g1"].shape[2]
    h2d = p["w2"].shape[1]
    od = p["w3"].shape[1]
    resident2 = lambda i: (0, 0)
    resident3 = lambda i: (0, 0, 0)
    resident4 = lambda i: (0, 0, 0, 0)

    h, y = pl.pallas_call(
        _fused_forward_kernel,
        out_shape=(jax.ShapeDtypeStruct((npad, h2d), jnp.float32),
                   jax.ShapeDtypeStruct((npad, od), jnp.float32)),
        grid=(g,),
        in_specs=[
            pl.BlockSpec((1, 4, 7 * tb, 28), lambda i: (i, 0, 0, 0)),   # batch tile
            pl.BlockSpec((2, 5, 28, 72), resident4),                    # conv1 maps
            pl.BlockSpec((1, 72), resident2),                           # conv1 bias
            pl.BlockSpec((2, 5, 72, 64), resident4),                    # conv2 maps
            pl.BlockSpec((1, 64), resident2),                           # conv2 bias
            pl.BlockSpec((4, 64, h1d), resident3),                      # fc1 blocks
            pl.BlockSpec((1, h1d), resident2),
            pl.BlockSpec((h1d, h2d), resident2),                        # fc2
            pl.BlockSpec((1, h2d), resident2),
            pl.BlockSpec((h2d, od), resident2),                         # fc3
            pl.BlockSpec((1, od), resident2),
        ],
        out_specs=(pl.BlockSpec((tb, h2d), lambda i: (i, 0)),
                   pl.BlockSpec((tb, od), lambda i: (i, 0))),
        compiler_params=pltpu.CompilerParams(
            dimension_semantics=("parallel",),
            vmem_limit_bytes=32 * 1024 * 1024),
    )(xg, p["m1"], p["b1l"], p["m2"], p["b2l"], p["g1"], p["fb1"],
      p["w2"], p["fb2"], p["w3"], p["fb3"])

    return h[:n], 0, y[:n]          # matches PyTorch: (x_after_fc2_relu, 0, logits)


# ----------------------------------------------------------------------------- params

def init_torch_params(key, hidden_dims=(64, 32), output_dim=10):
    """PyTorch-default-equivalent init: U(-1/sqrt(fan_in), 1/sqrt(fan_in))."""
    h1, h2 = hidden_dims
    specs = [
        ("conv1_w", (6, 1, 5, 5), 1 * 5 * 5), ("conv1_b", (6,), 1 * 5 * 5),
        ("conv2_w", (16, 6, 5, 5), 6 * 5 * 5), ("conv2_b", (16,), 6 * 5 * 5),
        ("fc1_w", (h1, 16 * 4 * 4), 16 * 4 * 4), ("fc1_b", (h1,), 16 * 4 * 4),
        ("fc2_w", (h2, h1), h1), ("fc2_b", (h2,), h1),
        ("fc3_w", (output_dim, h2), h2), ("fc3_b", (output_dim,), h2),
    ]
    keys = jax.random.split(key, len(specs))
    params = {}
    for k, (name, shape, fan_in) in zip(keys, specs):
        bound = 1.0 / math.sqrt(fan_in)
        params[name] = jax.random.uniform(k, shape, jnp.float32, -bound, bound)
    return params


def prepare_params(tp):
    """Fold all layout transforms into the weights once (not per forward call)."""
    f32 = jnp.float32
    hi = jax.lax.Precision.HIGHEST
    h1d = tp["fc1_w"].shape[0]
    h2d = tp["fc2_w"].shape[0]
    od = tp["fc3_w"].shape[0]
    p = {}

    # conv1 lane-mapping matrices M1[qx, dy] (28 -> 72): output lane (px*6 + co) gets
    # W1[co, 0, dy, dx] from input column x = 2*px + qx + dx.
    w1t = jnp.transpose(tp["conv1_w"][:, 0], (1, 2, 0)).astype(f32)      # (dy, dx, co)
    xin = jnp.arange(28)[:, None, None]
    pxa = jnp.arange(12)[None, :, None]
    dxa = jnp.arange(5)[None, None, :]
    m1 = []
    for qx in range(2):
        sel = (xin == 2 * pxa + qx + dxa).astype(f32)                    # (28, 12, 5)
        m1.append(jnp.einsum("xpd,ydc->yxpc", sel, w1t,
                             precision=hi).reshape(5, 28, 72))
    p["m1"] = jnp.stack(m1, 0)                                           # (2, 5, 28, 72)
    p["b1l"] = jnp.tile(tp["conv1_b"].astype(f32), 12).reshape(1, 72)

    # conv2 lane-mapping matrices M2[gx, dy] (72 -> 64): output lane (q2*16 + co) gets
    # W2[co, ci, dy, dx] from input lane (px*6 + ci) with px = 2*q2 + gx + dx.
    w2t = jnp.transpose(tp["conv2_w"], (2, 3, 1, 0)).astype(f32)         # (dy, dx, ci, co)
    pxa = jnp.arange(12)[:, None, None]
    q2a = jnp.arange(4)[None, :, None]
    dxa = jnp.arange(5)[None, None, :]
    m2 = []
    for gx in range(2):
        sel = (pxa == 2 * q2a + gx + dxa).astype(f32)                    # (12, 4, 5)
        m2.append(jnp.einsum("pqd,ydic->ypiqc", sel, w2t,
                             precision=hi).reshape(5, 72, 64))
    p["m2"] = jnp.stack(m2, 0)                                           # (2, 5, 72, 64)
    p["b2l"] = jnp.tile(tp["conv2_b"].astype(f32), 4).reshape(1, 64)

    # fc1 split into 4 per-pooled-row blocks (rows permuted so the kernel's
    # (q2*16 + co) lane order matches torch's NCHW .view(-1, 256) flatten).
    p["g1"] = jnp.transpose(tp["fc1_w"].reshape(h1d, 16, 4, 4),
                            (2, 3, 1, 0)).reshape(4, 64, h1d).astype(f32)
    p["fb1"] = tp["fc1_b"].reshape(1, h1d).astype(f32)
    p["w2"] = jnp.transpose(tp["fc2_w"]).astype(f32)
    p["fb2"] = tp["fc2_b"].reshape(1, h2d).astype(f32)
    p["w3"] = jnp.transpose(tp["fc3_w"]).astype(f32)
    p["fb3"] = tp["fc3_b"].reshape(1, od).astype(f32)
    return p


# ----------------------------------------------------------------------------- reference

def reference_forward(x_nchw, tp):
    """Plain-XLA reference of the same module (for correctness checking)."""
    hi = lax.Precision.HIGHEST
    dn = ("NCHW", "OIHW", "NCHW")
    t = lax.conv_general_dilated(x_nchw, tp["conv1_w"], (1, 1), "VALID",
                                 dimension_numbers=dn, precision=hi)
    t = jax.nn.relu(t + tp["conv1_b"][None, :, None, None])
    t = lax.reduce_window(t, -jnp.inf, lax.max, (1, 1, 2, 2), (1, 1, 2, 2), "VALID")
    t = lax.conv_general_dilated(t, tp["conv2_w"], (1, 1), "VALID",
                                 dimension_numbers=dn, precision=hi)
    t = jax.nn.relu(t + tp["conv2_b"][None, :, None, None])
    t = lax.reduce_window(t, -jnp.inf, lax.max, (1, 1, 2, 2), (1, 1, 2, 2), "VALID")
    xf = t.reshape(t.shape[0], -1)
    h1 = jax.nn.relu(jnp.dot(xf, tp["fc1_w"].T, precision=hi) + tp["fc1_b"])
    h2 = jax.nn.relu(jnp.dot(h1, tp["fc2_w"].T, precision=hi) + tp["fc2_b"])
    yy = jnp.dot(h2, tp["fc3_w"].T, precision=hi) + tp["fc3_b"]
    return h2, yy


# ----------------------------------------------------------------------------- main

if __name__ == "__main__":
    key = jax.random.PRNGKey(0)
    k_params, k_x = jax.random.split(key)

    hidden_dims = (64, 32)
    torch_params = init_torch_params(k_params, hidden_dims=hidden_dims, output_dim=10)
    params = prepare_params(torch_params)

    # The hard-coded x.view(-1, 16*4*4) implies 1x28x28 (MNIST) inputs; batch = 2.
    x = jax.random.normal(k_x, (2, 1, 28, 28), jnp.float32)

    fwd = jax.jit(simple_cnn_mnist_forward)
    h, zero, y = fwd(x, params)
    jax.block_until_ready((h, y))

    assert h.shape == (2, hidden_dims[1]), h.shape
    assert y.shape == (2, 10), y.shape
    assert int(zero) == 0
    assert bool(jnp.all(jnp.isfinite(h))) and bool(jnp.all(jnp.isfinite(y)))

    h_ref, y_ref = reference_forward(x, torch_params)
    assert bool(jnp.allclose(h, h_ref, atol=5e-2, rtol=5e-2))
    assert bool(jnp.allclose(y, y_ref, atol=5e-2, rtol=5e-2))
    print("KERNEL_OK")
</pallas_src>

<mosaic_0001>
module attributes {stable_mosaic.version = 11 : i64} {
  func.func @_fused_forward_kernel(%arg0: i32, %arg1: memref<1x4x56x28xf32, #tpu.memory_space<vmem>>, %arg2: memref<2x5x28x72xf32, #tpu.memory_space<vmem>>, %arg3: memref<1x72xf32, #tpu.memory_space<vmem>>, %arg4: memref<2x5x72x64xf32, #tpu.memory_space<vmem>>, %arg5: memref<1x64xf32, #tpu.memory_space<vmem>>, %arg6: memref<4x64x64xf32, #tpu.memory_space<vmem>>, %arg7: memref<1x64xf32, #tpu.memory_space<vmem>>, %arg8: memref<64x32xf32, #tpu.memory_space<vmem>>, %arg9: memref<1x32xf32, #tpu.memory_space<vmem>>, %arg10: memref<32x10xf32, #tpu.memory_space<vmem>>, %arg11: memref<1x10xf32, #tpu.memory_space<vmem>>, %arg12: memref<8x32xf32, #tpu.memory_space<vmem>>, %arg13: memref<8x10xf32, #tpu.memory_space<vmem>>) attributes {dimension_semantics = [#tpu.dimension_semantics<parallel>], iteration_bounds = array<i64: 2>, scalar_prefetch = 0 : i64, scratch_operands = 0 : i64, tpu.core_type = #tpu.core_type<tc>, window_params = [{transform_indices = @transform_0, window_bounds = array<i64: 1, 4, 56, 28>}, {pipeline_mode = #tpu.pipeline_mode<synchronous>, transform_indices = @transform_1, window_bounds = array<i64: 2, 5, 28, 72>}, {pipeline_mode = #tpu.pipeline_mode<synchronous>, transform_indices = @transform_2, window_bounds = array<i64: 1, 72>}, {pipeline_mode = #tpu.pipeline_mode<synchronous>, transform_indices = @transform_3, window_bounds = array<i64: 2, 5, 72, 64>}, {pipeline_mode = #tpu.pipeline_mode<synchronous>, transform_indices = @transform_4, window_bounds = array<i64: 1, 64>}, {pipeline_mode = #tpu.pipeline_mode<synchronous>, transform_indices = @transform_5, window_bounds = array<i64: 4, 64, 64>}, {pipeline_mode = #tpu.pipeline_mode<synchronous>, transform_indices = @transform_6, window_bounds = array<i64: 1, 64>}, {pipeline_mode = #tpu.pipeline_mode<synchronous>, transform_indices = @transform_7, window_bounds = array<i64: 64, 32>}, {pipeline_mode = #tpu.pipeline_mode<synchronous>, transform_indices = @transform_8, window_bounds = array<i64: 1, 32>}, {pipeline_mode = #tpu.pipeline_mode<synchronous>, transform_indices = @transform_9, window_bounds = array<i64: 32, 10>}, {pipeline_mode = #tpu.pipeline_mode<synchronous>, transform_indices = @transform_10, window_bounds = array<i64: 1, 10>}, {transform_indices = @transform_11, window_bounds = array<i64: 8, 32>}, {transform_indices = @transform_12, window_bounds = array<i64: 8, 10>}]} {
    %c0 = arith.constant 0 : index
    %c0_0 = arith.constant 0 : index
    %c0_1 = arith.constant 0 : index
    %c0_2 = arith.constant 0 : index
    %0 = vector.load %arg1[%c0, %c0_0, %c0_1, %c0_2] : memref<1x4x56x28xf32, #tpu.memory_space<vmem>>, vector<1x1x48x28xf32>
    %1 = vector.shape_cast %0 : vector<1x1x48x28xf32> to vector<48x28xf32>
    %c0_3 = arith.constant 0 : index
    %c0_4 = arith.constant 0 : index
    %c0_5 = arith.constant 0 : index
    %c0_6 = arith.constant 0 : index
    %2 = vector.load %arg2[%c0_3, %c0_4, %c0_5, %c0_6] : memref<2x5x28x72xf32, #tpu.memory_space<vmem>>, vector<1x1x28x72xf32>
    %3 = vector.shape_cast %2 : vector<1x1x28x72xf32> to vector<28x72xf32>
    %cst = arith.constant dense<0.000000e+00> : vector<48x72xf32>
    %4 = tpu.matmul %1, %3, %cst {dimension_numbers = #tpu.dot_dimension_numbers<[1], [0], [0], [1], [0, 0, 1, 1], [], []>} : vector<48x28xf32>, vector<28x72xf32>, vector<48x72xf32> -> vector<48x72xf32>
    %c0_7 = arith.constant 0 : index
    %c1 = arith.constant 1 : index
    %c0_8 = arith.constant 0 : index
    %c0_9 = arith.constant 0 : index
    %5 = vector.load %arg1[%c0_7, %c1, %c0_8, %c0_9] : memref<1x4x56x28xf32, #tpu.memory_space<vmem>>, vector<1x1x48x28xf32>
    %6 = vector.shape_cast %5 : vector<1x1x48x28xf32> to vector<48x28xf32>
    %c0_10 = arith.constant 0 : index
    %c1_11 = arith.constant 1 : index
    %c0_12 = arith.constant 0 : index
    %c0_13 = arith.constant 0 : index
    %7 = vector.load %arg2[%c0_10, %c1_11, %c0_12, %c0_13] : memref<2x5x28x72xf32, #tpu.memory_space<vmem>>, vector<1x1x28x72xf32>
    %8 = vector.shape_cast %7 : vector<1x1x28x72xf32> to vector<28x72xf32>
    %cst_14 = arith.constant dense<0.000000e+00> : vector<48x72xf32>
    %9 = tpu.matmul %6, %8, %cst_14 {dimension_numbers = #tpu.dot_dimension_numbers<[1], [0], [0], [1], [0, 0, 1, 1], [], []>} : vector<48x28xf32>, vector<28x72xf32>, vector<48x72xf32> -> vector<48x72xf32>
    %10 = arith.addf %4, %9 : vector<48x72xf32>
    %c0_15 = arith.constant 0 : index
    %c2 = arith.constant 2 : index
    %c0_16 = arith.constant 0 : index
    %c0_17 = arith.constant 0 : index
    %11 = vector.load %arg1[%c0_15, %c2, %c0_16, %c0_17] : memref<1x4x56x28xf32, #tpu.memory_space<vmem>>, vector<1x1x48x28xf32>
    %12 = vector.shape_cast %11 : vector<1x1x48x28xf32> to vector<48x28xf32>
    %c0_18 = arith.constant 0 : index
    %c2_19 = arith.constant 2 : index
    %c0_20 = arith.constant 0 : index
    %c0_21 = arith.constant 0 : index
    %13 = vector.load %arg2[%c0_18, %c2_19, %c0_20, %c0_21] : memref<2x5x28x72xf32, #tpu.memory_space<vmem>>, vector<1x1x28x72xf32>
    %14 = vector.shape_cast %13 : vector<1x1x28x72xf32> to vector<28x72xf32>
    %cst_22 = arith.constant dense<0.000000e+00> : vector<48x72xf32>
    %15 = tpu.matmul %12, %14, %cst_22 {dimension_numbers = #tpu.dot_dimension_numbers<[1], [0], [0], [1], [0, 0, 1, 1], [], []>} : vector<48x28xf32>, vector<28x72xf32>, vector<48x72xf32> -> vector<48x72xf32>
    %16 = arith.addf %10, %15 : vector<48x72xf32>
    %c0_23 = arith.constant 0 : index
    %c3 = arith.constant 3 : index
    %c0_24 = arith.constant 0 : index
    %c0_25 = arith.constant 0 : index
    %17 = vector.load %arg1[%c0_23, %c3, %c0_24, %c0_25] : memref<1x4x56x28xf32, #tpu.memory_space<vmem>>, vector<1x1x48x28xf32>
    %18 = vector.shape_cast %17 : vector<1x1x48x28xf32> to vector<48x28xf32>
    %c0_26 = arith.constant 0 : index
    %c3_27 = arith.constant 3 : index
    %c0_28 = arith.constant 0 : index
    %c0_29 = arith.constant 0 : index
    %19 = vector.load %arg2[%c0_26, %c3_27, %c0_28, %c0_29] : memref<2x5x28x72xf32, #tpu.memory_space<vmem>>, vector<1x1x28x72xf32>
    %20 = vector.shape_cast %19 : vector<1x1x28x72xf32> to vector<28x72xf32>
    %cst_30 = arith.constant dense<0.000000e+00> : vector<48x72xf32>
    %21 = tpu.matmul %18, %20, %cst_30 {dimension_numbers = #tpu.dot_dimension_numbers<[1], [0], [0], [1], [0, 0, 1, 1], [], []>} : vector<48x28xf32>, vector<28x72xf32>, vector<48x72xf32> -> vector<48x72xf32>
    %22 = arith.addf %16, %21 : vector<48x72xf32>
    %c0_31 = arith.constant 0 : index
    %c0_32 = arith.constant 0 : index
    %c8 = arith.constant 8 : index
    %c0_33 = arith.constant 0 : index
    %23 = vector.load %arg1[%c0_31, %c0_32, %c8, %c0_33] : memref<1x4x56x28xf32, #tpu.memory_space<vmem>>, vector<1x1x48x28xf32>
    %24 = vector.shape_cast %23 : vector<1x1x48x28xf32> to vector<48x28xf32>
    %c0_34 = arith.constant 0 : index
    %c4 = arith.constant 4 : index
    %c0_35 = arith.constant 0 : index
    %c0_36 = arith.constant 0 : index
    %25 = vector.load %arg2[%c0_34, %c4, %c0_35, %c0_36] : memref<2x5x28x72xf32, #tpu.memory_space<vmem>>, vector<1x1x28x72xf32>
    %26 = vector.shape_cast %25 : vector<1x1x28x72xf32> to vector<28x72xf32>
    %cst_37 = arith.constant dense<0.000000e+00> : vector<48x72xf32>
    %27 = tpu.matmul %24, %26, %cst_37 {dimension_numbers = #tpu.dot_dimension_numbers<[1], [0], [0], [1], [0, 0, 1, 1], [], []>} : vector<48x28xf32>, vector<28x72xf32>, vector<48x72xf32> -> vector<48x72xf32>
    %28 = arith.addf %22, %27 : vector<48x72xf32>
    %c0_38 = arith.constant 0 : index
    %c0_39 = arith.constant 0 : index
    %c0_40 = arith.constant 0 : index
    %c0_41 = arith.constant 0 : index
    %29 = vector.load %arg1[%c0_38, %c0_39, %c0_40, %c0_41] : memref<1x4x56x28xf32, #tpu.memory_space<vmem>>, vector<1x1x48x28xf32>
    %30 = vector.shape_cast %29 : vector<1x1x48x28xf32> to vector<48x28xf32>
    %c1_42 = arith.constant 1 : index
    %c0_43 = arith.constant 0 : index
    %c0_44 = arith.constant 0 : index
    %c0_45 = arith.constant 0 : index
    %31 = vector.load %arg2[%c1_42, %c0_43, %c0_44, %c0_45] : memref<2x5x28x72xf32, #tpu.memory_space<vmem>>, vector<1x1x28x72xf32>
    %32 = vector.shape_cast %31 : vector<1x1x28x72xf32> to vector<28x72xf32>
    %cst_46 = arith.constant dense<0.000000e+00> : vector<48x72xf32>
    %33 = tpu.matmul %30, %32, %cst_46 {dimension_numbers = #tpu.dot_dimension_numbers<[1], [0], [0], [1], [0, 0, 1, 1], [], []>} : vector<48x28xf32>, vector<28x72xf32>, vector<48x72xf32> -> vector<48x72xf32>
    %c0_47 = arith.constant 0 : index
    %c1_48 = arith.constant 1 : index
    %c0_49 = arith.constant 0 : index
    %c0_50 = arith.constant 0 : index
    %34 = vector.load %arg1[%c0_47, %c1_48, %c0_49, %c0_50] : memref<1x4x56x28xf32, #tpu.memory_space<vmem>>, vector<1x1x48x28xf32>
    %35 = vector.shape_cast %34 : vector<1x1x48x28xf32> to vector<48x28xf32>
    %c1_51 = arith.constant 1 : index
    %c1_52 = arith.constant 1 : index
    %c0_53 = arith.constant 0 : index
    %c0_54 = arith.constant 0 : index
    %36 = vector.load %arg2[%c1_51, %c1_52, %c0_53, %c0_54] : memref<2x5x28x72xf32, #tpu.memory_space<vmem>>, vector<1x1x28x72xf32>
    %37 = vector.shape_cast %36 : vector<1x1x28x72xf32> to vector<28x72xf32>
    %cst_55 = arith.constant dense<0.000000e+00> : vector<48x72xf32>
    %38 = tpu.matmul %35, %37, %cst_55 {dimension_numbers = #tpu.dot_dimension_numbers<[1], [0], [0], [1], [0, 0, 1, 1], [], []>} : vector<48x28xf32>, vector<28x72xf32>, vector<48x72xf32> -> vector<48x72xf32>
    %39 = arith.addf %33, %38 : vector<48x72xf32>
    %c0_56 = arith.constant 0 : index
    %c2_57 = arith.constant 2 : index
    %c0_58 = arith.constant 0 : index
    %c0_59 = arith.constant 0 : index
    %40 = vector.load %arg1[%c0_56, %c2_57, %c0_58, %c0_59] : memref<1x4x56x28xf32, #tpu.memory_space<vmem>>, vector<1x1x48x28xf32>
    %41 = vector.shape_cast %40 : vector<1x1x48x28xf32> to vector<48x28xf32>
    %c1_60 = arith.constant 1 : index
    %c2_61 = arith.constant 2 : index
    %c0_62 = arith.constant 0 : index
    %c0_63 = arith.constant 0 : index
    %42 = vector.load %arg2[%c1_60, %c2_61, %c0_62, %c0_63] : memref<2x5x28x72xf32, #tpu.memory_space<vmem>>, vector<1x1x28x72xf32>
    %43 = vector.shape_cast %42 : vector<1x1x28x72xf32> to vector<28x72xf32>
    %cst_64 = arith.constant dense<0.000000e+00> : vector<48x72xf32>
    %44 = tpu.matmul %41, %43, %cst_64 {dimension_numbers = #tpu.dot_dimension_numbers<[1], [0], [0], [1], [0, 0, 1, 1], [], []>} : vector<48x28xf32>, vector<28x72xf32>, vector<48x72xf32> -> vector<48x72xf32>
    %45 = arith.addf %39, %44 : vector<48x72xf32>
    %c0_65 = arith.constant 0 : index
    %c3_66 = arith.constant 3 : index
    %c0_67 = arith.constant 0 : index
    %c0_68 = arith.constant 0 : index
    %46 = vector.load %arg1[%c0_65, %c3_66, %c0_67, %c0_68] : memref<1x4x56x28xf32, #tpu.memory_space<vmem>>, vector<1x1x48x28xf32>
    %47 = vector.shape_cast %46 : vector<1x1x48x28xf32> to vector<48x28xf32>
    %c1_69 = arith.constant 1 : index
    %c3_70 = arith.constant 3 : index
    %c0_71 = arith.constant 0 : index
    %c0_72 = arith.constant 0 : index
    %48 = vector.load %arg2[%c1_69, %c3_70, %c0_71, %c0_72] : memref<2x5x28x72xf32, #tpu.memory_space<vmem>>, vector<1x1x28x72xf32>
    %49 = vector.shape_cast %48 : vector<1x1x28x72xf32> to vector<28x72xf32>
    %cst_73 = arith.constant dense<0.000000e+00> : vector<48x72xf32>
    %50 = tpu.matmul %47, %49, %cst_73 {dimension_numbers = #tpu.dot_dimension_numbers<[1], [0], [0], [1], [0, 0, 1, 1], [], []>} : vector<48x28xf32>, vector<28x72xf32>, vector<48x72xf32> -> vector<48x72xf32>
    %51 = arith.addf %45, %50 : vector<48x72xf32>
    %c0_74 = arith.constant 0 : index
    %c0_75 = arith.constant 0 : index
    %c8_76 = arith.constant 8 : index
    %c0_77 = arith.constant 0 : index
    %52 = vector.load %arg1[%c0_74, %c0_75, %c8_76, %c0_77] : memref<1x4x56x28xf32, #tpu.memory_space<vmem>>, vector<1x1x48x28xf32>
    %53 = vector.shape_cast %52 : vector<1x1x48x28xf32> to vector<48x28xf32>
    %c1_78 = arith.constant 1 : index
    %c4_79 = arith.constant 4 : index
    %c0_80 = arith.constant 0 : index
    %c0_81 = arith.constant 0 : index
    %54 = vector.load %arg2[%c1_78, %c4_79, %c0_80, %c0_81] : memref<2x5x28x72xf32, #tpu.memory_space<vmem>>, vector<1x1x28x72xf32>
    %55 = vector.shape_cast %54 : vector<1x1x28x72xf32> to vector<28x72xf32>
    %cst_82 = arith.constant dense<0.000000e+00> : vector<48x72xf32>
    %56 = tpu.matmul %53, %55, %cst_82 {dimension_numbers = #tpu.dot_dimension_numbers<[1], [0], [0], [1], [0, 0, 1, 1], [], []>} : vector<48x28xf32>, vector<28x72xf32>, vector<48x72xf32> -> vector<48x72xf32>
    %57 = arith.addf %51, %56 : vector<48x72xf32>
    %58 = arith.maximumf %28, %57 : vector<48x72xf32>
    %c0_83 = arith.constant 0 : index
    %c1_84 = arith.constant 1 : index
    %c0_85 = arith.constant 0 : index
    %c0_86 = arith.constant 0 : index
    %59 = vector.load %arg1[%c0_83, %c1_84, %c0_85, %c0_86] : memref<1x4x56x28xf32, #tpu.memory_space<vmem>>, vector<1x1x48x28xf32>
    %60 = vector.shape_cast %59 : vector<1x1x48x28xf32> to vector<48x28xf32>
    %c0_87 = arith.constant 0 : index
    %c0_88 = arith.constant 0 : index
    %c0_89 = arith.constant 0 : index
    %c0_90 = arith.constant 0 : index
    %61 = vector.load %arg2[%c0_87, %c0_88, %c0_89, %c0_90] : memref<2x5x28x72xf32, #tpu.memory_space<vmem>>, vector<1x1x28x72xf32>
    %62 = vector.shape_cast %61 : vector<1x1x28x72xf32> to vector<28x72xf32>
    %cst_91 = arith.constant dense<0.000000e+00> : vector<48x72xf32>
    %63 = tpu.matmul %60, %62, %cst_91 {dimension_numbers = #tpu.dot_dimension_numbers<[1], [0], [0], [1], [0, 0, 1, 1], [], []>} : vector<48x28xf32>, vector<28x72xf32>, vector<48x72xf32> -> vector<48x72xf32>
    %c0_92 = arith.constant 0 : index
    %c2_93 = arith.constant 2 : index
    %c0_94 = arith.constant 0 : index
    %c0_95 = arith.constant 0 : index
    %64 = vector.load %arg1[%c0_92, %c2_93, %c0_94, %c0_95] : memref<1x4x56x28xf32, #tpu.memory_space<vmem>>, vector<1x1x48x28xf32>
    %65 = vector.shape_cast %64 : vector<1x1x48x28xf32> to vector<48x28xf32>
    %c0_96 = arith.constant 0 : index
    %c1_97 = arith.constant 1 : index
    %c0_98 = arith.constant 0 : index
    %c0_99 = arith.constant 0 : index
    %66 = vector.load %arg2[%c0_96, %c1_97, %c0_98, %c0_99] : memref<2x5x28x72xf32, #tpu.memory_space<vmem>>, vector<1x1x28x72xf32>
    %67 = vector.shape_cast %66 : vector<1x1x28x72xf32> to vector<28x72xf32>
    %cst_100 = arith.constant dense<0.000000e+00> : vector<48x72xf32>
    %68 = tpu.matmul %65, %67, %cst_100 {dimension_numbers = #tpu.dot_dimension_numbers<[1], [0], [0], [1], [0, 0, 1, 1], [], []>} : vector<48x28xf32>, vector<28x72xf32>, vector<48x72xf32> -> vector<48x72xf32>
    %69 = arith.addf %63, %68 : vector<48x72xf32>
    %c0_101 = arith.constant 0 : index
    %c3_102 = arith.constant 3 : index
    %c0_103 = arith.constant 0 : index
    %c0_104 = arith.constant 0 : index
    %70 = vector.load %arg1[%c0_101, %c3_102, %c0_103, %c0_104] : memref<1x4x56x28xf32, #tpu.memory_space<vmem>>, vector<1x1x48x28xf32>
    %71 = vector.shape_cast %70 : vector<1x1x48x28xf32> to vector<48x28xf32>
    %c0_105 = arith.constant 0 : index
    %c2_106 = arith.constant 2 : index
    %c0_107 = arith.constant 0 : index
    %c0_108 = arith.constant 0 : index
    %72 = vector.load %arg2[%c0_105, %c2_106, %c0_107, %c0_108] : memref<2x5x28x72xf32, #tpu.memory_space<vmem>>, vector<1x1x28x72xf32>
    %73 = vector.shape_cast %72 : vector<1x1x28x72xf32> to vector<28x72xf32>
    %cst_109 = arith.constant dense<0.000000e+00> : vector<48x72xf32>
    %74 = tpu.matmul %71, %73, %cst_109 {dimension_numbers = #tpu.dot_dimension_numbers<[1], [0], [0], [1], [0, 0, 1, 1], [], []>} : vector<48x28xf32>, vector<28x72xf32>, vector<48x72xf32> -> vector<48x72xf32>
    %75 = arith.addf %69, %74 : vector<48x72xf32>
    %c0_110 = arith.constant 0 : index
    %c0_111 = arith.constant 0 : index
    %c8_112 = arith.constant 8 : index
    %c0_113 = arith.constant 0 : index
    %76 = vector.load %arg1[%c0_110, %c0_111, %c8_112, %c0_113] : memref<1x4x56x28xf32, #tpu.memory_space<vmem>>, vector<1x1x48x28xf32>
    %77 = vector.shape_cast %76 : vector<1x1x48x28xf32> to vector<48x28xf32>
    %c0_114 = arith.constant 0 : index
    %c3_115 = arith.constant 3 : index
    %c0_116 = arith.constant 0 : index
    %c0_117 = arith.constant 0 : index
    %78 = vector.load %arg2[%c0_114, %c3_115, %c0_116, %c0_117] : memref<2x5x28x72xf32, #tpu.memory_space<vmem>>, vector<1x1x28x72xf32>
    %79 = vector.shape_cast %78 : vector<1x1x28x72xf32> to vector<28x72xf32>
    %cst_118 = arith.constant dense<0.000000e+00> : vector<48x72xf32>
    %80 = tpu.matmul %77, %79, %cst_118 {dimension_numbers = #tpu.dot_dimension_numbers<[1], [0], [0], [1], [0, 0, 1, 1], [], []>} : vector<48x28xf32>, vector<28x72xf32>, vector<48x72xf32> -> vector<48x72xf32>
    %81 = arith.addf %75, %80 : vector<48x72xf32>
    %c0_119 = arith.constant 0 : index
    %c1_120 = arith.constant 1 : index
    %c8_121 = arith.constant 8 : index
    %c0_122 = arith.constant 0 : index
    %82 = vector.load %arg1[%c0_119, %c1_120, %c8_121, %c0_122] : memref<1x4x56x28xf32, #tpu.memory_space<vmem>>, vector<1x1x48x28xf32>
    %83 = vector.shape_cast %82 : vector<1x1x48x28xf32> to vector<48x28xf32>
    %c0_123 = arith.constant 0 : index
    %c4_124 = arith.constant 4 : index
    %c0_125 = arith.constant 0 : index
    %c0_126 = arith.constant 0 : index
    %84 = vector.load %arg2[%c0_123, %c4_124, %c0_125, %c0_126] : memref<2x5x28x72xf32, #tpu.memory_space<vmem>>, vector<1x1x28x72xf32>
    %85 = vector.shape_cast %84 : vector<1x1x28x72xf32> to vector<28x72xf32>
    %cst_127 = arith.constant dense<0.000000e+00> : vector<48x72xf32>
    %86 = tpu.matmul %83, %85, %cst_127 {dimension_numbers = #tpu.dot_dimension_numbers<[1], [0], [0], [1], [0, 0, 1, 1], [], []>} : vector<48x28xf32>, vector<28x72xf32>, vector<48x72xf32> -> vector<48x72xf32>
    %87 = arith.addf %81, %86 : vector<48x72xf32>
    %88 = arith.maximumf %58, %87 : vector<48x72xf32>
    %c0_128 = arith.constant 0 : index
    %c1_129 = arith.constant 1 : index
    %c0_130 = arith.constant 0 : index
    %c0_131 = arith.constant 0 : index
    %89 = vector.load %arg1[%c0_128, %c1_129, %c0_130, %c0_131] : memref<1x4x56x28xf32, #tpu.memory_space<vmem>>, vector<1x1x48x28xf32>
    %90 = vector.shape_cast %89 : vector<1x1x48x28xf32> to vector<48x28xf32>
    %c1_132 = arith.constant 1 : index
    %c0_133 = arith.constant 0 : index
    %c0_134 = arith.constant 0 : index
    %c0_135 = arith.constant 0 : index
    %91 = vector.load %arg2[%c1_132, %c0_133, %c0_134, %c0_135] : memref<2x5x28x72xf32, #tpu.memory_space<vmem>>, vector<1x1x28x72xf32>
    %92 = vector.shape_cast %91 : vector<1x1x28x72xf32> to vector<28x72xf32>
    %cst_136 = arith.constant dense<0.000000e+00> : vector<48x72xf32>
    %93 = tpu.matmul %90, %92, %cst_136 {dimension_numbers = #tpu.dot_dimension_numbers<[1], [0], [0], [1], [0, 0, 1, 1], [], []>} : vector<48x28xf32>, vector<28x72xf32>, vector<48x72xf32> -> vector<48x72xf32>
    %c0_137 = arith.constant 0 : index
    %c2_138 = arith.constant 2 : index
    %c0_139 = arith.constant 0 : index
    %c0_140 = arith.constant 0 : index
    %94 = vector.load %arg1[%c0_137, %c2_138, %c0_139, %c0_140] : memref<1x4x56x28xf32, #tpu.memory_space<vmem>>, vector<1x1x48x28xf32>
    %95 = vector.shape_cast %94 : vector<1x1x48x28xf32> to vector<48x28xf32>
    %c1_141 = arith.constant 1 : index
    %c1_142 = arith.constant 1 : index
    %c0_143 = arith.constant 0 : index
    %c0_144 = arith.constant 0 : index
    %96 = vector.load %arg2[%c1_141, %c1_142, %c0_143, %c0_144] : memref<2x5x28x72xf32, #tpu.memory_space<vmem>>, vector<1x1x28x72xf32>
    %97 = vector.shape_cast %96 : vector<1x1x28x72xf32> to vector<28x72xf32>
    %cst_145 = arith.constant dense<0.000000e+00> : vector<48x72xf32>
    %98 = tpu.matmul %95, %97, %cst_145 {dimension_numbers = #tpu.dot_dimension_numbers<[1], [0], [0], [1], [0, 0, 1, 1], [], []>} : vector<48x28xf32>, vector<28x72xf32>, vector<48x72xf32> -> vector<48x72xf32>
    %99 = arith.addf %93, %98 : vector<48x72xf32>
    %c0_146 = arith.constant 0 : index
    %c3_147 = arith.constant 3 : index
    %c0_148 = arith.constant 0 : index
    %c0_149 = arith.constant 0 : index
    %100 = vector.load %arg1[%c0_146, %c3_147, %c0_148, %c0_149] : memref<1x4x56x28xf32, #tpu.memory_space<vmem>>, vector<1x1x48x28xf32>
    %101 = vector.shape_cast %100 : vector<1x1x48x28xf32> to vector<48x28xf32>
    %c1_150 = arith.constant 1 : index
    %c2_151 = arith.constant 2 : index
    %c0_152 = arith.constant 0 : index
    %c0_153 = arith.constant 0 : index
    %102 = vector.load %arg2[%c1_150, %c2_151, %c0_152, %c0_153] : memref<2x5x28x72xf32, #tpu.memory_space<vmem>>, vector<1x1x28x72xf32>
    %103 = vector.shape_cast %102 : vector<1x1x28x72xf32> to vector<28x72xf32>
    %cst_154 = arith.constant dense<0.000000e+00> : vector<48x72xf32>
    %104 = tpu.matmul %101, %103, %cst_154 {dimension_numbers = #tpu.dot_dimension_numbers<[1], [0], [0], [1], [0, 0, 1, 1], [], []>} : vector<48x28xf32>, vector<28x72xf32>, vector<48x72xf32> -> vector<48x72xf32>
    %105 = arith.addf %99, %104 : vector<48x72xf32>
    %c0_155 = arith.constant 0 : index
    %c0_156 = arith.constant 0 : index
    %c8_157 = arith.constant 8 : index
    %c0_158 = arith.constant 0 : index
    %106 = vector.load %arg1[%c0_155, %c0_156, %c8_157, %c0_158] : memref<1x4x56x28xf32, #tpu.memory_space<vmem>>, vector<1x1x48x28xf32>
    %107 = vector.shape_cast %106 : vector<1x1x48x28xf32> to vector<48x28xf32>
    %c1_159 = arith.constant 1 : index
    %c3_160 = arith.constant 3 : index
    %c0_161 = arith.constant 0 : index
    %c0_162 = arith.constant 0 : index
    %108 = vector.load %arg2[%c1_159, %c3_160, %c0_161, %c0_162] : memref<2x5x28x72xf32, #tpu.memory_space<vmem>>, vector<1x1x28x72xf32>
    %109 = vector.shape_cast %108 : vector<1x1x28x72xf32> to vector<28x72xf32>
    %cst_163 = arith.constant dense<0.000000e+00> : vector<48x72xf32>
    %110 = tpu.matmul %107, %109, %cst_163 {dimension_numbers = #tpu.dot_dimension_numbers<[1], [0], [0], [1], [0, 0, 1, 1], [], []>} : vector<48x28xf32>, vector<28x72xf32>, vector<48x72xf32> -> vector<48x72xf32>
    %111 = arith.addf %105, %110 : vector<48x72xf32>
    %c0_164 = arith.constant 0 : index
    %c1_165 = arith.constant 1 : index
    %c8_166 = arith.constant 8 : index
    %c0_167 = arith.constant 0 : index
    %112 = vector.load %arg1[%c0_164, %c1_165, %c8_166, %c0_167] : memref<1x4x56x28xf32, #tpu.memory_space<vmem>>, vector<1x1x48x28xf32>
    %113 = vector.shape_cast %112 : vector<1x1x48x28xf32> to vector<48x28xf32>
    %c1_168 = arith.constant 1 : index
    %c4_169 = arith.constant 4 : index
    %c0_170 = arith.constant 0 : index
    %c0_171 = arith.constant 0 : index
    %114 = vector.load %arg2[%c1_168, %c4_169, %c0_170, %c0_171] : memref<2x5x28x72xf32, #tpu.memory_space<vmem>>, vector<1x1x28x72xf32>
    %115 = vector.shape_cast %114 : vector<1x1x28x72xf32> to vector<28x72xf32>
    %cst_172 = arith.constant dense<0.000000e+00> : vector<48x72xf32>
    %116 = tpu.matmul %113, %115, %cst_172 {dimension_numbers = #tpu.dot_dimension_numbers<[1], [0], [0], [1], [0, 0, 1, 1], [], []>} : vector<48x28xf32>, vector<28x72xf32>, vector<48x72xf32> -> vector<48x72xf32>
    %117 = arith.addf %111, %116 : vector<48x72xf32>
    %118 = arith.maximumf %88, %117 : vector<48x72xf32>
    %c0_173 = arith.constant 0 : index
    %c0_174 = arith.constant 0 : index
    %119 = vector.load %arg3[%c0_173, %c0_174] : memref<1x72xf32, #tpu.memory_space<vmem>>, vector<1x72xf32>
    %120 = vector.broadcast %119 : vector<1x72xf32> to vector<48x72xf32>
    %121 = arith.addf %118, %120 : vector<48x72xf32>
    %cst_175 = arith.constant 0.000000e+00 : f32
    %122 = vector.broadcast %cst_175 : f32 to vector<48x72xf32>
    %123 = arith.maximumf %121, %122 : vector<48x72xf32>
    %c0_176 = arith.constant 0 : index
    %c2_177 = arith.constant 2 : index
    %c0_178 = arith.constant 0 : index
    %c0_179 = arith.constant 0 : index
    %124 = vector.load %arg1[%c0_176, %c2_177, %c0_178, %c0_179] : memref<1x4x56x28xf32, #tpu.memory_space<vmem>>, vector<1x1x48x28xf32>
    %125 = vector.shape_cast %124 : vector<1x1x48x28xf32> to vector<48x28xf32>
    %c0_180 = arith.constant 0 : index
    %c0_181 = arith.constant 0 : index
    %c0_182 = arith.constant 0 : index
    %c0_183 = arith.constant 0 : index
    %126 = vector.load %arg2[%c0_180, %c0_181, %c0_182, %c0_183] : memref<2x5x28x72xf32, #tpu.memory_space<vmem>>, vector<1x1x28x72xf32>
    %127 = vector.shape_cast %126 : vector<1x1x28x72xf32> to vector<28x72xf32>
    %cst_184 = arith.constant dense<0.000000e+00> : vector<48x72xf32>
    %128 = tpu.matmul %125, %127, %cst_184 {dimension_numbers = #tpu.dot_dimension_numbers<[1], [0], [0], [1], [0, 0, 1, 1], [], []>} : vector<48x28xf32>, vector<28x72xf32>, vector<48x72xf32> -> vector<48x72xf32>
    %c0_185 = arith.constant 0 : index
    %c3_186 = arith.constant 3 : index
    %c0_187 = arith.constant 0 : index
    %c0_188 = arith.constant 0 : index
    %129 = vector.load %arg1[%c0_185, %c3_186, %c0_187, %c0_188] : memref<1x4x56x28xf32, #tpu.memory_space<vmem>>, vector<1x1x48x28xf32>
    %130 = vector.shape_cast %129 : vector<1x1x48x28xf32> to vector<48x28xf32>
    %c0_189 = arith.constant 0 : index
    %c1_190 = arith.constant 1 : index
    %c0_191 = arith.constant 0 : index
    %c0_192 = arith.constant 0 : index
    %131 = vector.load %arg2[%c0_189, %c1_190, %c0_191, %c0_192] : memref<2x5x28x72xf32, #tpu.memory_space<vmem>>, vector<1x1x28x72xf32>
    %132 = vector.shape_cast %131 : vector<1x1x28x72xf32> to vector<28x72xf32>
    %cst_193 = arith.constant dense<0.000000e+00> : vector<48x72xf32>
    %133 = tpu.matmul %130, %132, %cst_193 {dimension_numbers = #tpu.dot_dimension_numbers<[1], [0], [0], [1], [0, 0, 1, 1], [], []>} : vector<48x28xf32>, vector<28x72xf32>, vector<48x72xf32> -> vector<48x72xf32>
    %134 = arith.addf %128, %133 : vector<48x72xf32>
    %c0_194 = arith.constant 0 : index
    %c0_195 = arith.constant 0 : index
    %c8_196 = arith.constant 8 : index
    %c0_197 = arith.constant 0 : index
    %135 = vector.load %arg1[%c0_194, %c0_195, %c8_196, %c0_197] : memref<1x4x56x28xf32, #tpu.memory_space<vmem>>, vector<1x1x48x28xf32>
    %136 = vector.shape_cast %135 : vector<1x1x48x28xf32> to vector<48x28xf32>
    %c0_198 = arith.constant 0 : index
    %c2_199 = arith.constant 2 : index
    %c0_200 = arith.constant 0 : index
    %c0_201 = arith.constant 0 : index
    %137 = vector.load %arg2[%c0_198, %c2_199, %c0_200, %c0_201] : memref<2x5x28x72xf32, #tpu.memory_space<vmem>>, vector<1x1x28x72xf32>
    %138 = vector.shape_cast %137 : vector<1x1x28x72xf32> to vector<28x72xf32>
    %cst_202 = arith.constant dense<0.000000e+00> : vector<48x72xf32>
    %139 = tpu.matmul %136, %138, %cst_202 {dimension_numbers = #tpu.dot_dimension_numbers<[1], [0], [0], [1], [0, 0, 1, 1], [], []>} : vector<48x28xf32>, vector<28x72xf32>, vector<48x72xf32> -> vector<48x72xf32>
    %140 = arith.addf %134, %139 : vector<48x72xf32>
    %c0_203 = arith.constant 0 : index
    %c1_204 = arith.constant 1 : index
    %c8_205 = arith.constant 8 : index
    %c0_206 = arith.constant 0 : index
    %141 = vector.load %arg1[%c0_203, %c1_204, %c8_205, %c0_206] : memref<1x4x56x28xf32, #tpu.memory_space<vmem>>, vector<1x1x48x28xf32>
    %142 = vector.shape_cast %141 : vector<1x1x48x28xf32> to vector<48x28xf32>
    %c0_207 = arith.constant 0 : index
    %c3_208 = arith.constant 3 : index
    %c0_209 = arith.constant 0 : index
    %c0_210 = arith.constant 0 : index
    %143 = vector.load %arg2[%c0_207, %c3_208, %c0_209, %c0_210] : memref<2x5x28x72xf32, #tpu.memory_space<vmem>>, vector<1x1x28x72xf32>
    %144 = vector.shape_cast %143 : vector<1x1x28x72xf32> to vector<28x72xf32>
    %cst_211 = arith.constant dense<0.000000e+00> : vector<48x72xf32>
    %145 = tpu.matmul %142, %144, %cst_211 {dimension_numbers = #tpu.dot_dimension_numbers<[1], [0], [0], [1], [0, 0, 1, 1], [], []>} : vector<48x28xf32>, vector<28x72xf32>, vector<48x72xf32> -> vector<48x72xf32>
    %146 = arith.addf %140, %145 : vector<48x72xf32>
    %c0_212 = arith.constant 0 : index
    %c2_213 = arith.constant 2 : index
    %c8_214 = arith.constant 8 : index
    %c0_215 = arith.constant 0 : index
    %147 = vector.load %arg1[%c0_212, %c2_213, %c8_214, %c0_215] : memref<1x4x56x28xf32, #tpu.memory_space<vmem>>, vector<1x1x48x28xf32>
    %148 = vector.shape_cast %147 : vector<1x1x48x28xf32> to vector<48x28xf32>
    %c0_216 = arith.constant 0 : index
    %c4_217 = arith.constant 4 : index
    %c0_218 = arith.constant 0 : index
    %c0_219 = arith.constant 0 : index
    %149 = vector.load %arg2[%c0_216, %c4_217, %c0_218, %c0_219] : memref<2x5x28x72xf32, #tpu.memory_space<vmem>>, vector<1x1x28x72xf32>
    %150 = vector.shape_cast %149 : vector<1x1x28x72xf32> to vector<28x72xf32>
    %cst_220 = arith.constant dense<0.000000e+00> : vector<48x72xf32>
    %151 = tpu.matmul %148, %150, %cst_220 {dimension_numbers = #tpu.dot_dimension_numbers<[1], [0], [0], [1], [0, 0, 1, 1], [], []>} : vector<48x28xf32>, vector<28x72xf32>, vector<48x72xf32> -> vector<48x72xf32>
    %152 = arith.addf %146, %151 : vector<48x72xf32>
    %c0_221 = arith.constant 0 : index
    %c2_222 = arith.constant 2 : index
    %c0_223 = arith.constant 0 : index
    %c0_224 = arith.constant 0 : index
    %153 = vector.load %arg1[%c0_221, %c2_222, %c0_223, %c0_224] : memref<1x4x56x28xf32, #tpu.memory_space<vmem>>, vector<1x1x48x28xf32>
    %154 = vector.shape_cast %153 : vector<1x1x48x28xf32> to vector<48x28xf32>
    %c1_225 = arith.constant 1 : index
    %c0_226 = arith.constant 0 : index
    %c0_227 = arith.constant 0 : index
    %c0_228 = arith.constant 0 : index
    %155 = vector.load %arg2[%c1_225, %c0_226, %c0_227, %c0_228] : memref<2x5x28x72xf32, #tpu.memory_space<vmem>>, vector<1x1x28x72xf32>
    %156 = vector.shape_cast %155 : vector<1x1x28x72xf32> to vector<28x72xf32>
    %cst_229 = arith.constant dense<0.000000e+00> : vector<48x72xf32>
    %157 = tpu.matmul %154, %156, %cst_229 {dimension_numbers = #tpu.dot_dimension_numbers<[1], [0], [0], [1], [0, 0, 1, 1], [], []>} : vector<48x28xf32>, vector<28x72xf32>, vector<48x72xf32> -> vector<48x72xf32>
    %c0_230 = arith.constant 0 : index
    %c3_231 = arith.constant 3 : index
    %c0_232 = arith.constant 0 : index
    %c0_233 = arith.constant 0 : index
    %158 = vector.load %arg1[%c0_230, %c3_231, %c0_232, %c0_233] : memref<1x4x56x28xf32, #tpu.memory_space<vmem>>, vector<1x1x48x28xf32>
    %159 = vector.shape_cast %158 : vector<1x1x48x28xf32> to vector<48x28xf32>
    %c1_234 = arith.constant 1 : index
    %c1_235 = arith.constant 1 : index
    %c0_236 = arith.constant 0 : index
    %c0_237 = arith.constant 0 : index
    %160 = vector.load %arg2[%c1_234, %c1_235, %c0_236, %c0_237] : memref<2x5x28x72xf32, #tpu.memory_space<vmem>>, vector<1x1x28x72xf32>
    %161 = vector.shape_cast %160 : vector<1x1x28x72xf32> to vector<28x72xf32>
    %cst_238 = arith.constant dense<0.000000e+00> : vector<48x72xf32>
    %162 = tpu.matmul %159, %161, %cst_238 {dimension_numbers = #tpu.dot_dimension_numbers<[1], [0], [0], [1], [0, 0, 1, 1], [], []>} : vector<48x28xf32>, vector<28x72xf32>, vector<48x72xf32> -> vector<48x72xf32>
    %163 = arith.addf %157, %162 : vector<48x72xf32>
    %c0_239 = arith.constant 0 : index
    %c0_240 = arith.constant 0 : index
    %c8_241 = arith.constant 8 : index
    %c0_242 = arith.constant 0 : index
    %164 = vector.load %arg1[%c0_239, %c0_240, %c8_241, %c0_242] : memref<1x4x56x28xf32, #tpu.memory_space<vmem>>, vector<1x1x48x28xf32>
    %165 = vector.shape_cast %164 : vector<1x1x48x28xf32> to vector<48x28xf32>
    %c1_243 = arith.constant 1 : index
    %c2_244 = arith.constant 2 : index
    %c0_245 = arith.constant 0 : index
    %c0_246 = arith.constant 0 : index
    %166 = vector.load %arg2[%c1_243, %c2_244, %c0_245, %c0_246] : memref<2x5x28x72xf32, #tpu.memory_space<vmem>>, vector<1x1x28x72xf32>
    %167 = vector.shape_cast %166 : vector<1x1x28x72xf32> to vector<28x72xf32>
    %cst_247 = arith.constant dense<0.000000e+00> : vector<48x72xf32>
    %168 = tpu.matmul %165, %167, %cst_247 {dimension_numbers = #tpu.dot_dimension_numbers<[1], [0], [0], [1], [0, 0, 1, 1], [], []>} : vector<48x28xf32>, vector<28x72xf32>, vector<48x72xf32> -> vector<48x72xf32>
    %169 = arith.addf %163, %168 : vector<48x72xf32>
    %c0_248 = arith.constant 0 : index
    %c1_249 = arith.constant 1 : index
    %c8_250 = arith.constant 8 : index
    %c0_251 = arith.constant 0 : index
    %170 = vector.load %arg1[%c0_248, %c1_249, %c8_250, %c0_251] : memref<1x4x56x28xf32, #tpu.memory_space<vmem>>, vector<1x1x48x28xf32>
    %171 = vector.shape_cast %170 : vector<1x1x48x28xf32> to vector<48x28xf32>
    %c1_252 = arith.constant 1 : index
    %c3_253 = arith.constant 3 : index
    %c0_254 = arith.constant 0 : index
    %c0_255 = arith.constant 0 : index
    %172 = vector.load %arg2[%c1_252, %c3_253, %c0_254, %c0_255] : memref<2x5x28x72xf32, #tpu.memory_space<vmem>>, vector<1x1x28x72xf32>
    %173 = vector.shape_cast %172 : vector<1x1x28x72xf32> to vector<28x72xf32>
    %cst_256 = arith.constant dense<0.000000e+00> : vector<48x72xf32>
    %174 = tpu.matmul %171, %173, %cst_256 {dimension_numbers = #tpu.dot_dimension_numbers<[1], [0], [0], [1], [0, 0, 1, 1], [], []>} : vector<48x28xf32>, vector<28x72xf32>, vector<48x72xf32> -> vector<48x72xf32>
    %175 = arith.addf %169, %174 : vector<48x72xf32>
    %c0_257 = arith.constant 0 : index
    %c2_258 = arith.constant 2 : index
    %c8_259 = arith.constant 8 : index
    %c0_260 = arith.constant 0 : index
    %176 = vector.load %arg1[%c0_257, %c2_258, %c8_259, %c0_260] : memref<1x4x56x28xf32, #tpu.memory_space<vmem>>, vector<1x1x48x28xf32>
    %177 = vector.shape_cast %176 : vector<1x1x48x28xf32> to vector<48x28xf32>
    %c1_261 = arith.constant 1 : index
    %c4_262 = arith.constant 4 : index
    %c0_263 = arith.constant 0 : index
    %c0_264 = arith.constant 0 : index
    %178 = vector.load %arg2[%c1_261, %c4_262, %c0_263, %c0_264] : memref<2x5x28x72xf32, #tpu.memory_space<vmem>>, vector<1x1x28x72xf32>
    %179 = vector.shape_cast %178 : vector<1x1x28x72xf32> to vector<28x72xf32>
    %cst_265 = arith.constant dense<0.000000e+00> : vector<48x72xf32>
    %180 = tpu.matmul %177, %179, %cst_265 {dimension_numbers = #tpu.dot_dimension_numbers<[1], [0], [0], [1], [0, 0, 1, 1], [], []>} : vector<48x28xf32>, vector<28x72xf32>, vector<48x72xf32> -> vector<48x72xf32>
    %181 = arith.addf %175, %180 : vector<48x72xf32>
    %182 = arith.maximumf %152, %181 : vector<48x72xf32>
    %c0_266 = arith.constant 0 : index
    %c3_267 = arith.constant 3 : index
    %c0_268 = arith.constant 0 : index
    %c0_269 = arith.constant 0 : index
    %183 = vector.load %arg1[%c0_266, %c3_267, %c0_268, %c0_269] : memref<1x4x56x28xf32, #tpu.memory_space<vmem>>, vector<1x1x48x28xf32>
    %184 = vector.shape_cast %183 : vector<1x1x48x28xf32> to vector<48x28xf32>
    %c0_270 = arith.constant 0 : index
    %c0_271 = arith.constant 0 : index
    %c0_272 = arith.constant 0 : index
    %c0_273 = arith.constant 0 : index
    %185 = vector.load %arg2[%c0_270, %c0_271, %c0_272, %c0_273] : memref<2x5x28x72xf32, #tpu.memory_space<vmem>>, vector<1x1x28x72xf32>
    %186 = vector.shape_cast %185 : vector<1x1x28x72xf32> to vector<28x72xf32>
    %cst_274 = arith.constant dense<0.000000e+00> : vector<48x72xf32>
    %187 = tpu.matmul %184, %186, %cst_274 {dimension_numbers = #tpu.dot_dimension_numbers<[1], [0], [0], [1], [0, 0, 1, 1], [], []>} : vector<48x28xf32>, vector<28x72xf32>, vector<48x72xf32> -> vector<48x72xf32>
    %c0_275 = arith.constant 0 : index
    %c0_276 = arith.constant 0 : index
    %c8_277 = arith.constant 8 : index
    %c0_278 = arith.constant 0 : index
    %188 = vector.load %arg1[%c0_275, %c0_276, %c8_277, %c0_278] : memref<1x4x56x28xf32, #tpu.memory_space<vmem>>, vector<1x1x48x28xf32>
    %189 = vector.shape_cast %188 : vector<1x1x48x28xf32> to vector<48x28xf32>
    %c0_279 = arith.constant 0 : index
    %c1_280 = arith.constant 1 : index
    %c0_281 = arith.constant 0 : index
    %c0_282 = arith.constant 0 : index
    %190 = vector.load %arg2[%c0_279, %c1_280, %c0_281, %c0_282] : memref<2x5x28x72xf32, #tpu.memory_space<vmem>>, vector<1x1x28x72xf32>
    %191 = vector.shape_cast %190 : vector<1x1x28x72xf32> to vector<28x72xf32>
    %cst_283 = arith.constant dense<0.000000e+00> : vector<48x72xf32>
    %192 = tpu.matmul %189, %191, %cst_283 {dimension_numbers = #tpu.dot_dimension_numbers<[1], [0], [0], [1], [0, 0, 1, 1], [], []>} : vector<48x28xf32>, vector<28x72xf32>, vector<48x72xf32> -> vector<48x72xf32>
    %193 = arith.addf %187, %192 : vector<48x72xf32>
    %c0_284 = arith.constant 0 : index
    %c1_285 = arith.constant 1 : index
    %c8_286 = arith.constant 8 : index
    %c0_287 = arith.constant 0 : index
    %194 = vector.load %arg1[%c0_284, %c1_285, %c8_286, %c0_287] : memref<1x4x56x28xf32, #tpu.memory_space<vmem>>, vector<1x1x48x28xf32>
    %195 = vector.shape_cast %194 : vector<1x1x48x28xf32> to vector<48x28xf32>
    %c0_288 = arith.constant 0 : index
    %c2_289 = arith.constant 2 : index
    %c0_290 = arith.constant 0 : index
    %c0_291 = arith.constant 0 : index
    %196 = vector.load %arg2[%c0_288, %c2_289, %c0_290, %c0_291] : memref<2x5x28x72xf32, #tpu.memory_space<vmem>>, vector<1x1x28x72xf32>
    %197 = vector.shape_cast %196 : vector<1x1x28x72xf32> to vector<28x72xf32>
    %cst_292 = arith.constant dense<0.000000e+00> : vector<48x72xf32>
    %198 = tpu.matmul %195, %197, %cst_292 {dimension_numbers = #tpu.dot_dimension_numbers<[1], [0], [0], [1], [0, 0, 1, 1], [], []>} : vector<48x28xf32>, vector<28x72xf32>, vector<48x72xf32> -> vector<48x72xf32>
    %199 = arith.addf %193, %198 : vector<48x72xf32>
    %c0_293 = arith.constant 0 : index
    %c2_294 = arith.constant 2 : index
    %c8_295 = arith.constant 8 : index
    %c0_296 = arith.constant 0 : index
    %200 = vector.load %arg1[%c0_293, %c2_294, %c8_295, %c0_296] : memref<1x4x56x28xf32, #tpu.memory_space<vmem>>, vector<1x1x48x28xf32>
    %201 = vector.shape_cast %200 : vector<1x1x48x28xf32> to vector<48x28xf32>
    %c0_297 = arith.constant 0 : index
    %c3_298 = arith.constant 3 : index
    %c0_299 = arith.constant 0 : index
    %c0_300 = arith.constant 0 : index
    %202 = vector.load %arg2[%c0_297, %c3_298, %c0_299, %c0_300] : memref<2x5x28x72xf32, #tpu.memory_space<vmem>>, vector<1x1x28x72xf32>
    %203 = vector.shape_cast %202 : vector<1x1x28x72xf32> to vector<28x72xf32>
    %cst_301 = arith.constant dense<0.000000e+00> : vector<48x72xf32>
    %204 = tpu.matmul %201, %203, %cst_301 {dimension_numbers = #tpu.dot_dimension_numbers<[1], [0], [0], [1], [0, 0, 1, 1], [], []>} : vector<48x28xf32>, vector<28x72xf32>, vector<48x72xf32> -> vector<48x72xf32>
    %205 = arith.addf %199, %204 : vector<48x72xf32>
    %c0_302 = arith.constant 0 : index
    %c3_303 = arith.constant 3 : index
    %c8_304 = arith.constant 8 : index
    %c0_305 = arith.constant 0 : index
    %206 = vector.load %arg1[%c0_302, %c3_303, %c8_304, %c0_305] : memref<1x4x56x28xf32, #tpu.memory_space<vmem>>, vector<1x1x48x28xf32>
    %207 = vector.shape_cast %206 : vector<1x1x48x28xf32> to vector<48x28xf32>
    %c0_306 = arith.constant 0 : index
    %c4_307 = arith.constant 4 : index
    %c0_308 = arith.constant 0 : index
    %c0_309 = arith.constant 0 : index
    %208 = vector.load %arg2[%c0_306, %c4_307, %c0_308, %c0_309] : memref<2x5x28x72xf32, #tpu.memory_space<vmem>>, vector<1x1x28x72xf32>
    %209 = vector.shape_cast %208 : vector<1x1x28x72xf32> to vector<28x72xf32>
    %cst_310 = arith.constant dense<0.000000e+00> : vector<48x72xf32>
    %210 = tpu.matmul %207, %209, %cst_310 {dimension_numbers = #tpu.dot_dimension_numbers<[1], [0], [0], [1], [0, 0, 1, 1], [], []>} : vector<48x28xf32>, vector<28x72xf32>, vector<48x72xf32> -> vector<48x72xf32>
    %211 = arith.addf %205, %210 : vector<48x72xf32>
    %212 = arith.maximumf %182, %211 : vector<48x72xf32>
    %c0_311 = arith.constant 0 : index
    %c3_312 = arith.constant 3 : index
    %c0_313 = arith.constant 0 : index
    %c0_314 = arith.constant 0 : index
    %213 = vector.load %arg1[%c0_311, %c3_312, %c0_313, %c0_314] : memref<1x4x56x28xf32, #tpu.memory_space<vmem>>, vector<1x1x48x28xf32>
    %214 = vector.shape_cast %213 : vector<1x1x48x28xf32> to vector<48x28xf32>
    %c1_315 = arith.constant 1 : index
    %c0_316 = arith.constant 0 : index
    %c0_317 = arith.constant 0 : index
    %c0_318 = arith.constant 0 : index
    %215 = vector.load %arg2[%c1_315, %c0_316, %c0_317, %c0_318] : memref<2x5x28x72xf32, #tpu.memory_space<vmem>>, vector<1x1x28x72xf32>
    %216 = vector.shape_cast %215 : vector<1x1x28x72xf32> to vector<28x72xf32>
    %cst_319 = arith.constant dense<0.000000e+00> : vector<48x72xf32>
    %217 = tpu.matmul %214, %216, %cst_319 {dimension_numbers = #tpu.dot_dimension_numbers<[1], [0], [0], [1], [0, 0, 1, 1], [], []>} : vector<48x28xf32>, vector<28x72xf32>, vector<48x72xf32> -> vector<48x72xf32>
    %c0_320 = arith.constant 0 : index
    %c0_321 = arith.constant 0 : index
    %c8_322 = arith.constant 8 : index
    %c0_323 = arith.constant 0 : index
    %218 = vector.load %arg1[%c0_320, %c0_321, %c8_322, %c0_323] : memref<1x4x56x28xf32, #tpu.memory_space<vmem>>, vector<1x1x48x28xf32>
    %219 = vector.shape_cast %218 : vector<1x1x48x28xf32> to vector<48x28xf32>
    %c1_324 = arith.constant 1 : index
    %c1_325 = arith.constant 1 : index
    %c0_326 = arith.constant 0 : index
    %c0_327 = arith.constant 0 : index
    %220 = vector.load %arg2[%c1_324, %c1_325, %c0_326, %c0_327] : memref<2x5x28x72xf32, #tpu.memory_space<vmem>>, vector<1x1x28x72xf32>
    %221 = vector.shape_cast %220 : vector<1x1x28x72xf32> to vector<28x72xf32>
    %cst_328 = arith.constant dense<0.000000e+00> : vector<48x72xf32>
    %222 = tpu.matmul %219, %221, %cst_328 {dimension_numbers = #tpu.dot_dimension_numbers<[1], [0], [0], [1], [0, 0, 1, 1], [], []>} : vector<48x28xf32>, vector<28x72xf32>, vector<48x72xf32> -> vector<48x72xf32>
    %223 = arith.addf %217, %222 : vector<48x72xf32>
    %c0_329 = arith.constant 0 : index
    %c1_330 = arith.constant 1 : index
    %c8_331 = arith.constant 8 : index
    %c0_332 = arith.constant 0 : index
    %224 = vector.load %arg1[%c0_329, %c1_330, %c8_331, %c0_332] : memref<1x4x56x28xf32, #tpu.memory_space<vmem>>, vector<1x1x48x28xf32>
    %225 = vector.shape_cast %224 : vector<1x1x48x28xf32> to vector<48x28xf32>
    %c1_333 = arith.constant 1 : index
    %c2_334 = arith.constant 2 : index
    %c0_335 = arith.constant 0 : index
    %c0_336 = arith.constant 0 : index
    %226 = vector.load %arg2[%c1_333, %c2_334, %c0_335, %c0_336] : memref<2x5x28x72xf32, #tpu.memory_space<vmem>>, vector<1x1x28x72xf32>
    %227 = vector.shape_cast %226 : vector<1x1x28x72xf32> to vector<28x72xf32>
    %cst_337 = arith.constant dense<0.000000e+00> : vector<48x72xf32>
    %228 = tpu.matmul %225, %227, %cst_337 {dimension_numbers = #tpu.dot_dimension_numbers<[1], [0], [0], [1], [0, 0, 1, 1], [], []>} : vector<48x28xf32>, vector<28x72xf32>, vector<48x72xf32> -> vector<48x72xf32>
    %229 = arith.addf %223, %228 : vector<48x72xf32>
    %c0_338 = arith.constant 0 : index
    %c2_339 = arith.constant 2 : index
    %c8_340 = arith.constant 8 : index
    %c0_341 = arith.constant 0 : index
    %230 = vector.load %arg1[%c0_338, %c2_339, %c8_340, %c0_341] : memref<1x4x56x28xf32, #tpu.memory_space<vmem>>, vector<1x1x48x28xf32>
    %231 = vector.shape_cast %230 : vector<1x1x48x28xf32> to vector<48x28xf32>
    %c1_342 = arith.constant 1 : index
    %c3_343 = arith.constant 3 : index
    %c0_344 = arith.constant 0 : index
    %c0_345 = arith.constant 0 : index
    %232 = vector.load %arg2[%c1_342, %c3_343, %c0_344, %c0_345] : memref<2x5x28x72xf32, #tpu.memory_space<vmem>>, vector<1x1x28x72xf32>
    %233 = vector.shape_cast %232 : vector<1x1x28x72xf32> to vector<28x72xf32>
    %cst_346 = arith.constant dense<0.000000e+00> : vector<48x72xf32>
    %234 = tpu.matmul %231, %233, %cst_346 {dimension_numbers = #tpu.dot_dimension_numbers<[1], [0], [0], [1], [0, 0, 1, 1], [], []>} : vector<48x28xf32>, vector<28x72xf32>, vector<48x72xf32> -> vector<48x72xf32>
    %235 = arith.addf %229, %234 : vector<48x72xf32>
    %c0_347 = arith.constant 0 : index
    %c3_348 = arith.constant 3 : index
    %c8_349 = arith.constant 8 : index
    %c0_350 = arith.constant 0 : index
    %236 = vector.load %arg1[%c0_347, %c3_348, %c8_349, %c0_350] : memref<1x4x56x28xf32, #tpu.memory_space<vmem>>, vector<1x1x48x28xf32>
    %237 = vector.shape_cast %236 : vector<1x1x48x28xf32> to vector<48x28xf32>
    %c1_351 = arith.constant 1 : index
    %c4_352 = arith.constant 4 : index
    %c0_353 = arith.constant 0 : index
    %c0_354 = arith.constant 0 : index
    %238 = vector.load %arg2[%c1_351, %c4_352, %c0_353, %c0_354] : memref<2x5x28x72xf32, #tpu.memory_space<vmem>>, vector<1x1x28x72xf32>
    %239 = vector.shape_cast %238 : vector<1x1x28x72xf32> to vector<28x72xf32>
    %cst_355 = arith.constant dense<0.000000e+00> : vector<48x72xf32>
    %240 = tpu.matmul %237, %239, %cst_355 {dimension_numbers = #tpu.dot_dimension_numbers<[1], [0], [0], [1], [0, 0, 1, 1], [], []>} : vector<48x28xf32>, vector<28x72xf32>, vector<48x72xf32> -> vector<48x72xf32>
    %241 = arith.addf %235, %240 : vector<48x72xf32>
    %242 = arith.maximumf %212, %241 : vector<48x72xf32>
    %c0_356 = arith.constant 0 : index
    %c0_357 = arith.constant 0 : index
    %243 = vector.load %arg3[%c0_356, %c0_357] : memref<1x72xf32, #tpu.memory_space<vmem>>, vector<1x72xf32>
    %244 = vector.broadcast %243 : vector<1x72xf32> to vector<48x72xf32>
    %245 = arith.addf %242, %244 : vector<48x72xf32>
    %cst_358 = arith.constant 0.000000e+00 : f32
    %246 = vector.broadcast %cst_358 : f32 to vector<48x72xf32>
    %247 = arith.maximumf %245, %246 : vector<48x72xf32>
    %248 = vector.extract_strided_slice %123 {offsets = [0, 0], sizes = [32, 72], strides = [1, 1]} : vector<48x72xf32> to vector<32x72xf32>
    %c0_359 = arith.constant 0 : index
    %c0_360 = arith.constant 0 : index
    %c0_361 = arith.constant 0 : index
    %c0_362 = arith.constant 0 : index
    %249 = vector.load %arg4[%c0_359, %c0_360, %c0_361, %c0_362] : memref<2x5x72x64xf32, #tpu.memory_space<vmem>>, vector<1x1x72x64xf32>
    %250 = vector.shape_cast %249 : vector<1x1x72x64xf32> to vector<72x64xf32>
    %cst_363 = arith.constant dense<0.000000e+00> : vector<32x64xf32>
    %251 = tpu.matmul %248, %250, %cst_363 {dimension_numbers = #tpu.dot_dimension_numbers<[1], [0], [0], [1], [0, 0, 1, 1], [], []>} : vector<32x72xf32>, vector<72x64xf32>, vector<32x64xf32> -> vector<32x64xf32>
    %252 = vector.extract_strided_slice %247 {offsets = [0, 0], sizes = [32, 72], strides = [1, 1]} : vector<48x72xf32> to vector<32x72xf32>
    %c0_364 = arith.constant 0 : index
    %c1_365 = arith.constant 1 : index
    %c0_366 = arith.constant 0 : index
    %c0_367 = arith.constant 0 : index
    %253 = vector.load %arg4[%c0_364, %c1_365, %c0_366, %c0_367] : memref<2x5x72x64xf32, #tpu.memory_space<vmem>>, vector<1x1x72x64xf32>
    %254 = vector.shape_cast %253 : vector<1x1x72x64xf32> to vector<72x64xf32>
    %cst_368 = arith.constant dense<0.000000e+00> : vector<32x64xf32>
    %255 = tpu.matmul %252, %254, %cst_368 {dimension_numbers = #tpu.dot_dimension_numbers<[1], [0], [0], [1], [0, 0, 1, 1], [], []>} : vector<32x72xf32>, vector<72x64xf32>, vector<32x64xf32> -> vector<32x64xf32>
    %256 = arith.addf %251, %255 : vector<32x64xf32>
    %257 = vector.extract_strided_slice %123 {offsets = [8, 0], sizes = [32, 72], strides = [1, 1]} : vector<48x72xf32> to vector<32x72xf32>
    %c0_369 = arith.constant 0 : index
    %c2_370 = arith.constant 2 : index
    %c0_371 = arith.constant 0 : index
    %c0_372 = arith.constant 0 : index
    %258 = vector.load %arg4[%c0_369, %c2_370, %c0_371, %c0_372] : memref<2x5x72x64xf32, #tpu.memory_space<vmem>>, vector<1x1x72x64xf32>
    %259 = vector.shape_cast %258 : vector<1x1x72x64xf32> to vector<72x64xf32>
    %cst_373 = arith.constant dense<0.000000e+00> : vector<32x64xf32>
    %260 = tpu.matmul %257, %259, %cst_373 {dimension_numbers = #tpu.dot_dimension_numbers<[1], [0], [0], [1], [0, 0, 1, 1], [], []>} : vector<32x72xf32>, vector<72x64xf32>, vector<32x64xf32> -> vector<32x64xf32>
    %261 = arith.addf %256, %260 : vector<32x64xf32>
    %262 = vector.extract_strided_slice %247 {offsets = [8, 0], sizes = [32, 72], strides = [1, 1]} : vector<48x72xf32> to vector<32x72xf32>
    %c0_374 = arith.constant 0 : index
    %c3_375 = arith.constant 3 : index
    %c0_376 = arith.constant 0 : index
    %c0_377 = arith.constant 0 : index
    %263 = vector.load %arg4[%c0_374, %c3_375, %c0_376, %c0_377] : memref<2x5x72x64xf32, #tpu.memory_space<vmem>>, vector<1x1x72x64xf32>
    %264 = vector.shape_cast %263 : vector<1x1x72x64xf32> to vector<72x64xf32>
    %cst_378 = arith.constant dense<0.000000e+00> : vector<32x64xf32>
    %265 = tpu.matmul %262, %264, %cst_378 {dimension_numbers = #tpu.dot_dimension_numbers<[1], [0], [0], [1], [0, 0, 1, 1], [], []>} : vector<32x72xf32>, vector<72x64xf32>, vector<32x64xf32> -> vector<32x64xf32>
    %266 = arith.addf %261, %265 : vector<32x64xf32>
    %267 = vector.extract_strided_slice %123 {offsets = [16, 0], sizes = [32, 72], strides = [1, 1]} : vector<48x72xf32> to vector<32x72xf32>
    %c0_379 = arith.constant 0 : index
    %c4_380 = arith.constant 4 : index
    %c0_381 = arith.constant 0 : index
    %c0_382 = arith.constant 0 : index
    %268 = vector.load %arg4[%c0_379, %c4_380, %c0_381, %c0_382] : memref<2x5x72x64xf32, #tpu.memory_space<vmem>>, vector<1x1x72x64xf32>
    %269 = vector.shape_cast %268 : vector<1x1x72x64xf32> to vector<72x64xf32>
    %cst_383 = arith.constant dense<0.000000e+00> : vector<32x64xf32>
    %270 = tpu.matmul %267, %269, %cst_383 {dimension_numbers = #tpu.dot_dimension_numbers<[1], [0], [0], [1], [0, 0, 1, 1], [], []>} : vector<32x72xf32>, vector<72x64xf32>, vector<32x64xf32> -> vector<32x64xf32>
    %271 = arith.addf %266, %270 : vector<32x64xf32>
    %272 = vector.extract_strided_slice %123 {offsets = [0, 0], sizes = [32, 72], strides = [1, 1]} : vector<48x72xf32> to vector<32x72xf32>
    %c1_384 = arith.constant 1 : index
    %c0_385 = arith.constant 0 : index
    %c0_386 = arith.constant 0 : index
    %c0_387 = arith.constant 0 : index
    %273 = vector.load %arg4[%c1_384, %c0_385, %c0_386, %c0_387] : memref<2x5x72x64xf32, #tpu.memory_space<vmem>>, vector<1x1x72x64xf32>
    %274 = vector.shape_cast %273 : vector<1x1x72x64xf32> to vector<72x64xf32>
    %cst_388 = arith.constant dense<0.000000e+00> : vector<32x64xf32>
    %275 = tpu.matmul %272, %274, %cst_388 {dimension_numbers = #tpu.dot_dimension_numbers<[1], [0], [0], [1], [0, 0, 1, 1], [], []>} : vector<32x72xf32>, vector<72x64xf32>, vector<32x64xf32> -> vector<32x64xf32>
    %276 = vector.extract_strided_slice %247 {offsets = [0, 0], sizes = [32, 72], strides = [1, 1]} : vector<48x72xf32> to vector<32x72xf32>
    %c1_389 = arith.constant 1 : index
    %c1_390 = arith.constant 1 : index
    %c0_391 = arith.constant 0 : index
    %c0_392 = arith.constant 0 : index
    %277 = vector.load %arg4[%c1_389, %c1_390, %c0_391, %c0_392] : memref<2x5x72x64xf32, #tpu.memory_space<vmem>>, vector<1x1x72x64xf32>
    %278 = vector.shape_cast %277 : vector<1x1x72x64xf32> to vector<72x64xf32>
    %cst_393 = arith.constant dense<0.000000e+00> : vector<32x64xf32>
    %279 = tpu.matmul %276, %278, %cst_393 {dimension_numbers = #tpu.dot_dimension_numbers<[1], [0], [0], [1], [0, 0, 1, 1], [], []>} : vector<32x72xf32>, vector<72x64xf32>, vector<32x64xf32> -> vector<32x64xf32>
    %280 = arith.addf %275, %279 : vector<32x64xf32>
    %281 = vector.extract_strided_slice %123 {offsets = [8, 0], sizes = [32, 72], strides = [1, 1]} : vector<48x72xf32> to vector<32x72xf32>
    %c1_394 = arith.constant 1 : index
    %c2_395 = arith.constant 2 : index
    %c0_396 = arith.constant 0 : index
    %c0_397 = arith.constant 0 : index
    %282 = vector.load %arg4[%c1_394, %c2_395, %c0_396, %c0_397] : memref<2x5x72x64xf32, #tpu.memory_space<vmem>>, vector<1x1x72x64xf32>
    %283 = vector.shape_cast %282 : vector<1x1x72x64xf32> to vector<72x64xf32>
    %cst_398 = arith.constant dense<0.000000e+00> : vector<32x64xf32>
    %284 = tpu.matmul %281, %283, %cst_398 {dimension_numbers = #tpu.dot_dimension_numbers<[1], [0], [0], [1], [0, 0, 1, 1], [], []>} : vector<32x72xf32>, vector<72x64xf32>, vector<32x64xf32> -> vector<32x64xf32>
    %285 = arith.addf %280, %284 : vector<32x64xf32>
    %286 = vector.extract_strided_slice %247 {offsets = [8, 0], sizes = [32, 72], strides = [1, 1]} : vector<48x72xf32> to vector<32x72xf32>
    %c1_399 = arith.constant 1 : index
    %c3_400 = arith.constant 3 : index
    %c0_401 = arith.constant 0 : index
    %c0_402 = arith.constant 0 : index
    %287 = vector.load %arg4[%c1_399, %c3_400, %c0_401, %c0_402] : memref<2x5x72x64xf32, #tpu.memory_space<vmem>>, vector<1x1x72x64xf32>
    %288 = vector.shape_cast %287 : vector<1x1x72x64xf32> to vector<72x64xf32>
    %cst_403 = arith.constant dense<0.000000e+00> : vector<32x64xf32>
    %289 = tpu.matmul %286, %288, %cst_403 {dimension_numbers = #tpu.dot_dimension_numbers<[1], [0], [0], [1], [0, 0, 1, 1], [], []>} : vector<32x72xf32>, vector<72x64xf32>, vector<32x64xf32> -> vector<32x64xf32>
    %290 = arith.addf %285, %289 : vector<32x64xf32>
    %291 = vector.extract_strided_slice %123 {offsets = [16, 0], sizes = [32, 72], strides = [1, 1]} : vector<48x72xf32> to vector<32x72xf32>
    %c1_404 = arith.constant 1 : index
    %c4_405 = arith.constant 4 : index
    %c0_406 = arith.constant 0 : index
    %c0_407 = arith.constant 0 : index
    %292 = vector.load %arg4[%c1_404, %c4_405, %c0_406, %c0_407] : memref<2x5x72x64xf32, #tpu.memory_space<vmem>>, vector<1x1x72x64xf32>
    %293 = vector.shape_cast %292 : vector<1x1x72x64xf32> to vector<72x64xf32>
    %cst_408 = arith.constant dense<0.000000e+00> : vector<32x64xf32>
    %294 = tpu.matmul %291, %293, %cst_408 {dimension_numbers = #tpu.dot_dimension_numbers<[1], [0], [0], [1], [0, 0, 1, 1], [], []>} : vector<32x72xf32>, vector<72x64xf32>, vector<32x64xf32> -> vector<32x64xf32>
    %295 = arith.addf %290, %294 : vector<32x64xf32>
    %296 = arith.maximumf %271, %295 : vector<32x64xf32>
    %297 = vector.extract_strided_slice %247 {offsets = [0, 0], sizes = [32, 72], strides = [1, 1]} : vector<48x72xf32> to vector<32x72xf32>
    %c0_409 = arith.constant 0 : index
    %c0_410 = arith.constant 0 : index
    %c0_411 = arith.constant 0 : index
    %c0_412 = arith.constant 0 : index
    %298 = vector.load %arg4[%c0_409, %c0_410, %c0_411, %c0_412] : memref<2x5x72x64xf32, #tpu.memory_space<vmem>>, vector<1x1x72x64xf32>
    %299 = vector.shape_cast %298 : vector<1x1x72x64xf32> to vector<72x64xf32>
    %cst_413 = arith.constant dense<0.000000e+00> : vector<32x64xf32>
    %300 = tpu.matmul %297, %299, %cst_413 {dimension_numbers = #tpu.dot_dimension_numbers<[1], [0], [0], [1], [0, 0, 1, 1], [], []>} : vector<32x72xf32>, vector<72x64xf32>, vector<32x64xf32> -> vector<32x64xf32>
    %301 = vector.extract_strided_slice %123 {offsets = [8, 0], sizes = [32, 72], strides = [1, 1]} : vector<48x72xf32> to vector<32x72xf32>
    %c0_414 = arith.constant 0 : index
    %c1_415 = arith.constant 1 : index
    %c0_416 = arith.constant 0 : index
    %c0_417 = arith.constant 0 : index
    %302 = vector.load %arg4[%c0_414, %c1_415, %c0_416, %c0_417] : memref<2x5x72x64xf32, #tpu.memory_space<vmem>>, vector<1x1x72x64xf32>
    %303 = vector.shape_cast %302 : vector<1x1x72x64xf32> to vector<72x64xf32>
    %cst_418 = arith.constant dense<0.000000e+00> : vector<32x64xf32>
    %304 = tpu.matmul %301, %303, %cst_418 {dimension_numbers = #tpu.dot_dimension_numbers<[1], [0], [0], [1], [0, 0, 1, 1], [], []>} : vector<32x72xf32>, vector<72x64xf32>, vector<32x64xf32> -> vector<32x64xf32>
    %305 = arith.addf %300, %304 : vector<32x64xf32>
    %306 = vector.extract_strided_slice %247 {offsets = [8, 0], sizes = [32, 72], strides = [1, 1]} : vector<48x72xf32> to vector<32x72xf32>
    %c0_419 = arith.constant 0 : index
    %c2_420 = arith.constant 2 : index
    %c0_421 = arith.constant 0 : index
    %c0_422 = arith.constant 0 : index
    %307 = vector.load %arg4[%c0_419, %c2_420, %c0_421, %c0_422] : memref<2x5x72x64xf32, #tpu.memory_space<vmem>>, vector<1x1x72x64xf32>
    %308 = vector.shape_cast %307 : vector<1x1x72x64xf32> to vector<72x64xf32>
    %cst_423 = arith.constant dense<0.000000e+00> : vector<32x64xf32>
    %309 = tpu.matmul %306, %308, %cst_423 {dimension_numbers = #tpu.dot_dimension_numbers<[1], [0], [0], [1], [0, 0, 1, 1], [], []>} : vector<32x72xf32>, vector<72x64xf32>, vector<32x64xf32> -> vector<32x64xf32>
    %310 = arith.addf %305, %309 : vector<32x64xf32>
    %311 = vector.extract_strided_slice %123 {offsets = [16, 0], sizes = [32, 72], strides = [1, 1]} : vector<48x72xf32> to vector<32x72xf32>
    %c0_424 = arith.constant 0 : index
    %c3_425 = arith.constant 3 : index
    %c0_426 = arith.constant 0 : index
    %c0_427 = arith.constant 0 : index
    %312 = vector.load %arg4[%c0_424, %c3_425, %c0_426, %c0_427] : memref<2x5x72x64xf32, #tpu.memory_space<vmem>>, vector<1x1x72x64xf32>
    %313 = vector.shape_cast %312 : vector<1x1x72x64xf32> to vector<72x64xf32>
    %cst_428 = arith.constant dense<0.000000e+00> : vector<32x64xf32>
    %314 = tpu.matmul %311, %313, %cst_428 {dimension_numbers = #tpu.dot_dimension_numbers<[1], [0], [0], [1], [0, 0, 1, 1], [], []>} : vector<32x72xf32>, vector<72x64xf32>, vector<32x64xf32> -> vector<32x64xf32>
    %315 = arith.addf %310, %314 : vector<32x64xf32>
    %316 = vector.extract_strided_slice %247 {offsets = [16, 0], sizes = [32, 72], strides = [1, 1]} : vector<48x72xf32> to vector<32x72xf32>
    %c0_429 = arith.constant 0 : index
    %c4_430 = arith.constant 4 : index
    %c0_431 = arith.constant 0 : index
    %c0_432 = arith.constant 0 : index
    %317 = vector.load %arg4[%c0_429, %c4_430, %c0_431, %c0_432] : memref<2x5x72x64xf32, #tpu.memory_space<vmem>>, vector<1x1x72x64xf32>
    %318 = vector.shape_cast %317 : vector<1x1x72x64xf32> to vector<72x64xf32>
    %cst_433 = arith.constant dense<0.000000e+00> : vector<32x64xf32>
    %319 = tpu.matmul %316, %318, %cst_433 {dimension_numbers = #tpu.dot_dimension_numbers<[1], [0], [0], [1], [0, 0, 1, 1], [], []>} : vector<32x72xf32>, vector<72x64xf32>, vector<32x64xf32> -> vector<32x64xf32>
    %320 = arith.addf %315, %319 : vector<32x64xf32>
    %321 = arith.maximumf %296, %320 : vector<32x64xf32>
    %322 = vector.extract_strided_slice %247 {offsets = [0, 0], sizes = [32, 72], strides = [1, 1]} : vector<48x72xf32> to vector<32x72xf32>
    %c1_434 = arith.constant 1 : index
    %c0_435 = arith.constant 0 : index
    %c0_436 = arith.constant 0 : index
    %c0_437 = arith.constant 0 : index
    %323 = vector.load %arg4[%c1_434, %c0_435, %c0_436, %c0_437] : memref<2x5x72x64xf32, #tpu.memory_space<vmem>>, vector<1x1x72x64xf32>
    %324 = vector.shape_cast %323 : vector<1x1x72x64xf32> to vector<72x64xf32>
    %cst_438 = arith.constant dense<0.000000e+00> : vector<32x64xf32>
    %325 = tpu.matmul %322, %324, %cst_438 {dimension_numbers = #tpu.dot_dimension_numbers<[1], [0], [0], [1], [0, 0, 1, 1], [], []>} : vector<32x72xf32>, vector<72x64xf32>, vector<32x64xf32> -> vector<32x64xf32>
    %326 = vector.extract_strided_slice %123 {offsets = [8, 0], sizes = [32, 72], strides = [1, 1]} : vector<48x72xf32> to vector<32x72xf32>
    %c1_439 = arith.constant 1 : index
    %c1_440 = arith.constant 1 : index
    %c0_441 = arith.constant 0 : index
    %c0_442 = arith.constant 0 : index
    %327 = vector.load %arg4[%c1_439, %c1_440, %c0_441, %c0_442] : memref<2x5x72x64xf32, #tpu.memory_space<vmem>>, vector<1x1x72x64xf32>
    %328 = vector.shape_cast %327 : vector<1x1x72x64xf32> to vector<72x64xf32>
    %cst_443 = arith.constant dense<0.000000e+00> : vector<32x64xf32>
    %329 = tpu.matmul %326, %328, %cst_443 {dimension_numbers = #tpu.dot_dimension_numbers<[1], [0], [0], [1], [0, 0, 1, 1], [], []>} : vector<32x72xf32>, vector<72x64xf32>, vector<32x64xf32> -> vector<32x64xf32>
    %330 = arith.addf %325, %329 : vector<32x64xf32>
    %331 = vector.extract_strided_slice %247 {offsets = [8, 0], sizes = [32, 72], strides = [1, 1]} : vector<48x72xf32> to vector<32x72xf32>
    %c1_444 = arith.constant 1 : index
    %c2_445 = arith.constant 2 : index
    %c0_446 = arith.constant 0 : index
    %c0_447 = arith.constant 0 : index
    %332 = vector.load %arg4[%c1_444, %c2_445, %c0_446, %c0_447] : memref<2x5x72x64xf32, #tpu.memory_space<vmem>>, vector<1x1x72x64xf32>
    %333 = vector.shape_cast %332 : vector<1x1x72x64xf32> to vector<72x64xf32>
    %cst_448 = arith.constant dense<0.000000e+00> : vector<32x64xf32>
    %334 = tpu.matmul %331, %333, %cst_448 {dimension_numbers = #tpu.dot_dimension_numbers<[1], [0], [0], [1], [0, 0, 1, 1], [], []>} : vector<32x72xf32>, vector<72x64xf32>, vector<32x64xf32> -> vector<32x64xf32>
    %335 = arith.addf %330, %334 : vector<32x64xf32>
    %336 = vector.extract_strided_slice %123 {offsets = [16, 0], sizes = [32, 72], strides = [1, 1]} : vector<48x72xf32> to vector<32x72xf32>
    %c1_449 = arith.constant 1 : index
    %c3_450 = arith.constant 3 : index
    %c0_451 = arith.constant 0 : index
    %c0_452 = arith.constant 0 : index
    %337 = vector.load %arg4[%c1_449, %c3_450, %c0_451, %c0_452] : memref<2x5x72x64xf32, #tpu.memory_space<vmem>>, vector<1x1x72x64xf32>
    %338 = vector.shape_cast %337 : vector<1x1x72x64xf32> to vector<72x64xf32>
    %cst_453 = arith.constant dense<0.000000e+00> : vector<32x64xf32>
    %339 = tpu.matmul %336, %338, %cst_453 {dimension_numbers = #tpu.dot_dimension_numbers<[1], [0], [0], [1], [0, 0, 1, 1], [], []>} : vector<32x72xf32>, vector<72x64xf32>, vector<32x64xf32> -> vector<32x64xf32>
    %340 = arith.addf %335, %339 : vector<32x64xf32>
    %341 = vector.extract_strided_slice %247 {offsets = [16, 0], sizes = [32, 72], strides = [1, 1]} : vector<48x72xf32> to vector<32x72xf32>
    %c1_454 = arith.constant 1 : index
    %c4_455 = arith.constant 4 : index
    %c0_456 = arith.constant 0 : index
    %c0_457 = arith.constant 0 : index
    %342 = vector.load %arg4[%c1_454, %c4_455, %c0_456, %c0_457] : memref<2x5x72x64xf32, #tpu.memory_space<vmem>>, vector<1x1x72x64xf32>
    %343 = vector.shape_cast %342 : vector<1x1x72x64xf32> to vector<72x64xf32>
    %cst_458 = arith.constant dense<0.000000e+00> : vector<32x64xf32>
    %344 = tpu.matmul %341, %343, %cst_458 {dimension_numbers = #tpu.dot_dimension_numbers<[1], [0], [0], [1], [0, 0, 1, 1], [], []>} : vector<32x72xf32>, vector<72x64xf32>, vector<32x64xf32> -> vector<32x64xf32>
    %345 = arith.addf %340, %344 : vector<32x64xf32>
    %346 = arith.maximumf %321, %345 : vector<32x64xf32>
    %c0_459 = arith.constant 0 : index
    %c0_460 = arith.constant 0 : index
    %347 = vector.load %arg5[%c0_459, %c0_460] : memref<1x64xf32, #tpu.memory_space<vmem>>, vector<1x64xf32>
    %348 = vector.broadcast %347 : vector<1x64xf32> to vector<32x64xf32>
    %349 = arith.addf %346, %348 : vector<32x64xf32>
    %cst_461 = arith.constant 0.000000e+00 : f32
    %350 = vector.broadcast %cst_461 : f32 to vector<32x64xf32>
    %351 = arith.maximumf %349, %350 : vector<32x64xf32>
    %352 = vector.extract_strided_slice %351 {offsets = [0, 0], sizes = [8, 64], strides = [1, 1]} : vector<32x64xf32> to vector<8x64xf32>
    %c0_462 = arith.constant 0 : index
    %c0_463 = arith.constant 0 : index
    %c0_464 = arith.constant 0 : index
    %353 = vector.load %arg6[%c0_462, %c0_463, %c0_464] : memref<4x64x64xf32, #tpu.memory_space<vmem>>, vector<1x64x64xf32>
    %354 = vector.shape_cast %353 : vector<1x64x64xf32> to vector<64x64xf32>
    %cst_465 = arith.constant dense<0.000000e+00> : vector<8x64xf32>
    %355 = tpu.matmul %352, %354, %cst_465 {dimension_numbers = #tpu.dot_dimension_numbers<[1], [0], [0], [1], [0, 0, 1, 1], [], []>} : vector<8x64xf32>, vector<64x64xf32>, vector<8x64xf32> -> vector<8x64xf32>
    %356 = vector.extract_strided_slice %351 {offsets = [8, 0], sizes = [8, 64], strides = [1, 1]} : vector<32x64xf32> to vector<8x64xf32>
    %c1_466 = arith.constant 1 : index
    %c0_467 = arith.constant 0 : index
    %c0_468 = arith.constant 0 : index
    %357 = vector.load %arg6[%c1_466, %c0_467, %c0_468] : memref<4x64x64xf32, #tpu.memory_space<vmem>>, vector<1x64x64xf32>
    %358 = vector.shape_cast %357 : vector<1x64x64xf32> to vector<64x64xf32>
    %cst_469 = arith.constant dense<0.000000e+00> : vector<8x64xf32>
    %359 = tpu.matmul %356, %358, %cst_469 {dimension_numbers = #tpu.dot_dimension_numbers<[1], [0], [0], [1], [0, 0, 1, 1], [], []>} : vector<8x64xf32>, vector<64x64xf32>, vector<8x64xf32> -> vector<8x64xf32>
    %360 = arith.addf %355, %359 : vector<8x64xf32>
    %361 = vector.extract_strided_slice %351 {offsets = [16, 0], sizes = [8, 64], strides = [1, 1]} : vector<32x64xf32> to vector<8x64xf32>
    %c2_470 = arith.constant 2 : index
    %c0_471 = arith.constant 0 : index
    %c0_472 = arith.constant 0 : index
    %362 = vector.load %arg6[%c2_470, %c0_471, %c0_472] : memref<4x64x64xf32, #tpu.memory_space<vmem>>, vector<1x64x64xf32>
    %363 = vector.shape_cast %362 : vector<1x64x64xf32> to vector<64x64xf32>
    %cst_473 = arith.constant dense<0.000000e+00> : vector<8x64xf32>
    %364 = tpu.matmul %361, %363, %cst_473 {dimension_numbers = #tpu.dot_dimension_numbers<[1], [0], [0], [1], [0, 0, 1, 1], [], []>} : vector<8x64xf32>, vector<64x64xf32>, vector<8x64xf32> -> vector<8x64xf32>
    %365 = arith.addf %360, %364 : vector<8x64xf32>
    %366 = vector.extract_strided_slice %351 {offsets = [24, 0], sizes = [8, 64], strides = [1, 1]} : vector<32x64xf32> to vector<8x64xf32>
    %c3_474 = arith.constant 3 : index
    %c0_475 = arith.constant 0 : index
    %c0_476 = arith.constant 0 : index
    %367 = vector.load %arg6[%c3_474, %c0_475, %c0_476] : memref<4x64x64xf32, #tpu.memory_space<vmem>>, vector<1x64x64xf32>
    %368 = vector.shape_cast %367 : vector<1x64x64xf32> to vector<64x64xf32>
    %cst_477 = arith.constant dense<0.000000e+00> : vector<8x64xf32>
    %369 = tpu.matmul %366, %368, %cst_477 {dimension_numbers = #tpu.dot_dimension_numbers<[1], [0], [0], [1], [0, 0, 1, 1], [], []>} : vector<8x64xf32>, vector<64x64xf32>, vector<8x64xf32> -> vector<8x64xf32>
    %370 = arith.addf %365, %369 : vector<8x64xf32>
    %c0_478 = arith.constant 0 : index
    %c0_479 = arith.constant 0 : index
    %371 = vector.load %arg7[%c0_478, %c0_479] : memref<1x64xf32, #tpu.memory_space<vmem>>, vector<1x64xf32>
    %372 = vector.broadcast %371 : vector<1x64xf32> to vector<8x64xf32>
    %373 = arith.addf %370, %372 : vector<8x64xf32>
    %cst_480 = arith.constant 0.000000e+00 : f32
    %374 = vector.broadcast %cst_480 : f32 to vector<8x64xf32>
    %375 = arith.maximumf %373, %374 : vector<8x64xf32>
    %c0_481 = arith.constant 0 : index
    %c0_482 = arith.constant 0 : index
    %376 = vector.load %arg8[%c0_481, %c0_482] : memref<64x32xf32, #tpu.memory_space<vmem>>, vector<64x32xf32>
    %cst_483 = arith.constant dense<0.000000e+00> : vector<8x32xf32>
    %377 = tpu.matmul %375, %376, %cst_483 {dimension_numbers = #tpu.dot_dimension_numbers<[1], [0], [0], [1], [0, 0, 1, 1], [], []>} : vector<8x64xf32>, vector<64x32xf32>, vector<8x32xf32> -> vector<8x32xf32>
    %c0_484 = arith.constant 0 : index
    %c0_485 = arith.constant 0 : index
    %378 = vector.load %arg9[%c0_484, %c0_485] : memref<1x32xf32, #tpu.memory_space<vmem>>, vector<1x32xf32>
    %379 = vector.broadcast %378 : vector<1x32xf32> to vector<8x32xf32>
    %380 = arith.addf %377, %379 : vector<8x32xf32>
    %cst_486 = arith.constant 0.000000e+00 : f32
    %381 = vector.broadcast %cst_486 : f32 to vector<8x32xf32>
    %382 = arith.maximumf %380, %381 : vector<8x32xf32>
    %c0_487 = arith.constant 0 : index
    %c0_488 = arith.constant 0 : index
    %383 = vector.load %arg10[%c0_487, %c0_488] : memref<32x10xf32, #tpu.memory_space<vmem>>, vector<32x10xf32>
    %cst_489 = arith.constant dense<0.000000e+00> : vector<8x10xf32>
    %384 = tpu.matmul %382, %383, %cst_489 {dimension_numbers = #tpu.dot_dimension_numbers<[1], [0], [0], [1], [0, 0, 1, 1], [], []>} : vector<8x32xf32>, vector<32x10xf32>, vector<8x10xf32> -> vector<8x10xf32>
    %c0_490 = arith.constant 0 : index
    %c0_491 = arith.constant 0 : index
    %385 = vector.load %arg11[%c0_490, %c0_491] : memref<1x10xf32, #tpu.memory_space<vmem>>, vector<1x10xf32>
    %386 = vector.broadcast %385 : vector<1x10xf32> to vector<8x10xf32>
    %387 = arith.addf %384, %386 : vector<8x10xf32>
    %c0_492 = arith.constant 0 : index
    %c0_493 = arith.constant 0 : index
    %388 = vector.load %arg12[%c0_492, %c0_493] : memref<8x32xf32, #tpu.memory_space<vmem>>, vector<8x32xf32>
    tpu.vector_store %arg12[%c0_492, %c0_493], %382 {strides = array<i32>} : memref<8x32xf32, #tpu.memory_space<vmem>>, vector<8x32xf32>,
    %c0_494 = arith.constant 0 : index
    %c0_495 = arith.constant 0 : index
    %389 = vector.load %arg13[%c0_494, %c0_495] : memref<8x10xf32, #tpu.memory_space<vmem>>, vector<8x10xf32>
    tpu.vector_store %arg13[%c0_494, %c0_495], %387 {strides = array<i32>} : memref<8x10xf32, #tpu.memory_space<vmem>>, vector<8x10xf32>,
    return
  }
  func.func @transform_0(%arg0: i32) -> (i32, i32, i32, i32) {
    %c0_i32 = arith.constant 0 : i32
    %c0_i32_0 = arith.constant 0 : i32
    %c0_i32_1 = arith.constant 0 : i32
    %c0_i32_2 = arith.constant 0 : i32
    return %arg0, %c0_i32, %c0_i32_0, %c0_i32_1 : i32, i32, i32, i32
  }
  func.func @transform_1(%arg0: i32) -> (i32, i32, i32, i32) {
    %c0_i32 = arith.constant 0 : i32
    %c0_i32_0 = arith.constant 0 : i32
    %c0_i32_1 = arith.constant 0 : i32
    %c0_i32_2 = arith.constant 0 : i32
    %c0_i32_3 = arith.constant 0 : i32
    return %c0_i32, %c0_i32_0, %c0_i32_1, %c0_i32_2 : i32, i32, i32, i32
  }
  func.func @transform_2(%arg0: i32) -> (i32, i32) {
    %c0_i32 = arith.constant 0 : i32
    %c0_i32_0 = arith.constant 0 : i32
    %c0_i32_1 = arith.constant 0 : i32
    return %c0_i32, %c0_i32_0 : i32, i32
  }
  func.func @transform_3(%arg0: i32) -> (i32, i32, i32, i32) {
    %c0_i32 = arith.constant 0 : i32
    %c0_i32_0 = arith.constant 0 : i32
    %c0_i32_1 = arith.constant 0 : i32
    %c0_i32_2 = arith.constant 0 : i32
    %c0_i32_3 = arith.constant 0 : i32
    return %c0_i32, %c0_i32_0, %c0_i32_1, %c0_i32_2 : i32, i32, i32, i32
  }
  func.func @transform_4(%arg0: i32) -> (i32, i32) {
    %c0_i32 = arith.constant 0 : i32
    %c0_i32_0 = arith.constant 0 : i32
    %c0_i32_1 = arith.constant 0 : i32
    return %c0_i32, %c0_i32_0 : i32, i32
  }
  func.func @transform_5(%arg0: i32) -> (i32, i32, i32) {
    %c0_i32 = arith.constant 0 : i32
    %c0_i32_0 = arith.constant 0 : i32
    %c0_i32_1 = arith.constant 0 : i32
    %c0_i32_2 = arith.constant 0 : i32
    return %c0_i32, %c0_i32_0, %c0_i32_1 : i32, i32, i32
  }
  func.func @transform_6(%arg0: i32) -> (i32, i32) {
    %c0_i32 = arith.constant 0 : i32
    %c0_i32_0 = arith.constant 0 : i32
    %c0_i32_1 = arith.constant 0 : i32
    return %c0_i32, %c0_i32_0 : i32, i32
  }
  func.func @transform_7(%arg0: i32) -> (i32, i32) {
    %c0_i32 = arith.constant 0 : i32
    %c0_i32_0 = arith.constant 0 : i32
    %c0_i32_1 = arith.constant 0 : i32
    return %c0_i32, %c0_i32_0 : i32, i32
  }
  func.func @transform_8(%arg0: i32) -> (i32, i32) {
    %c0_i32 = arith.constant 0 : i32
    %c0_i32_0 = arith.constant 0 : i32
    %c0_i32_1 = arith.constant 0 : i32
    return %c0_i32, %c0_i32_0 : i32, i32
  }
  func.func @transform_9(%arg0: i32) -> (i32, i32) {
    %c0_i32 = arith.constant 0 : i32
    %c0_i32_0 = arith.constant 0 : i32
    %c0_i32_1 = arith.constant 0 : i32
    return %c0_i32, %c0_i32_0 : i32, i32
  }
  func.func @transform_10(%arg0: i32) -> (i32, i32) {
    %c0_i32 = arith.constant 0 : i32
    %c0_i32_0 = arith.constant 0 : i32
    %c0_i32_1 = arith.constant 0 : i32
    return %c0_i32, %c0_i32_0 : i32, i32
  }
  func.func @transform_11(%arg0: i32) -> (i32, i32) {
    %c0_i32 = arith.constant 0 : i32
    %c0_i32_0 = arith.constant 0 : i32
    return %arg0, %c0_i32 : i32, i32
  }
  func.func @transform_12(%arg0: i32) -> (i32, i32) {
    %c0_i32 = arith.constant 0 : i32
    %c0_i32_0 = arith.constant 0 : i32
    return %arg0, %c0_i32 : i32, i32
  }
}

</mosaic_0001>

<bundles_post_ra>
// kernel: simple_cnn_mnist_forward.1
= control target key start
LH: loop header
LB: loop body
LE: loop exit
PB: predicated region body
PF: predicated region fallthrough
CT: control target
= control target key end

     0   :  { %s10887_s21 = smov 0   ;;  %s12998_s0 = inlined_call_operand.vmem [shape: f32[2,4,56,28], index: 0, kind: input, shape index: {}]   ;;  %s12999_s1 = inlined_call_operand.vmem [shape: f32[2,5,28,72], index: 1, kind: input, shape index: {}]   ;;  %s13000_s2 = inlined_call_operand.vmem [shape: f32[1,72], index: 2, kind: input, shape index: {}]   ;;  %s13001_s3 = inlined_call_operand.vmem [shape: f32[2,5,72,64], index: 3, kind: input, shape index: {}]   ;;  %s13002_s4 = inlined_call_operand.vmem [shape: f32[1,64], index: 4, kind: input, shape index: {}]   ;;  %s13003_s5 = inlined_call_operand.vmem [shape: f32[4,64,64], index: 5, kind: input, shape index: {}]   ;;  %s13004_s6 = inlined_call_operand.vmem [shape: f32[1,64], index: 6, kind: input, shape index: {}]   ;;  %s13005_s7 = inlined_call_operand.vmem [shape: f32[64,32], index: 7, kind: input, shape index: {}]   ;;  %s13006_s8 = inlined_call_operand.vmem [shape: f32[1,32], index: 8, kind: input, shape index: {}]   ;;  %s13007_s9 = inlined_call_operand.vmem [shape: f32[32,10], index: 9, kind: input, shape index: {}]   ;;  %s13008_s10 = inlined_call_operand.vmem [shape: f32[1,10], index: 10, kind: input, shape index: {}]   ;;  %s13009_s11 = inlined_call_operand.vmem [shape: f32[16,32], index: 11, kind: output, shape index: {0}]   ;;  %s13010_s12 = inlined_call_operand.vmem [shape: f32[16,10], index: 12, kind: output, shape index: {1}]  }
   0x1 LB: > { %s7221_s22 = sadd.s32 4294967295, %s10816_s21   ;;  %p7225_p0 = scmp.ge.s32.totalorder %s10816_s21, 1  ;;  %s10816_s21 = sphi %s10887_s21, %s23_s21  }
   0x2   : > { %p365_p1 = scmp.lt.s32.totalorder %s10816_s21, 3 }
   0x4   : > { %p366_p2 = pnand %p7225_p0, %p365_p1 }
   0x6   : > { %369 = sbr.rel (%p366_p2) target bundleno = 1538 (0x602), region = 64 }
   0xd   : > { %v7235_v0 = vld [vmem:[%s12999_s1 + $0x20] sm:$0xff]  ;;  %v7236_v1 = vld [vmem:[%s12999_s1 + $0x28] sm:$0xff]  ;;  %vm464_vm0 = vcmask 1043456   ;;  %p410_p3 = scmp.lt.s32.totalorder %s7221_s22, 1  ;;  %v7237_v5 = vld [vmem:[%s12999_s1 + $0x30] sm:$0xff]  ;;  %vm10818_vm1 = vmmov 1  }
   0xe   : > { %v7302_v2 = vld [vmem:[%s12999_s1 + $0xc0] sm:$0xff]  ;;  %v10904_v3 = vpack.c.bf16 %v7236_v1, %v7235_v0  ;;  %v7303_v4 = vld [vmem:[%s12999_s1 + $0xc8] sm:$0xff]  ;;  %v7238_v6 = vld [vmem:[%s12999_s1 + $0x38] sm:$0xf]  ;;  %vm445_vm3 = vcmask 228352   ;;  %vm4729_vm4 = vcmask 588800  }
   0xf   : > { %v10915_v7 = vpack.c.bf16 %v7303_v4, %v7302_v2  ;;  %v10917_v8 = vpack.c.bf16 %v7238_v6, %v7237_v5  ;;  %vm10919_vm2 = vmpackc.low %vm464_vm0, %vm10818_vm1  ;;  %v7304_v10 = vld [vmem:[%s12999_s1 + $0xd0] sm:$0xff]  ;;  %v7305_v11 = vld [vmem:[%s12999_s1 + $0xd8] sm:$0xf]  ;;  %s13026_s22 = smov (!%p410_p3, %s7221_s22), 1  ;;  %vm10820_vm5 = vmmov 0   ;;  %vm6638_vm6 = vcmask 523264  }
  0x10   : > { %9756 = vmatprep.subr.bf16.mxu0 %v10904_v3  ;;  %v10932_v12 = vpack.c.bf16 %v7305_v11, %v7304_v10  ;;  %v429_v13 = vld [vmem:[%s12999_s1] sm:$0xff]  ;;  %v430_v14 = vld [vmem:[%s12999_s1 + $0x8] sm:$0xff]  ;;  %s10797_s29 = smul.u32 224, %s13026_s22  ;;  %v431_v20 = vld [vmem:[%s12999_s1 + $0x10] sm:$0xff]  ;;  %s7227_s15 = sshll.u32 %s13026_s22, 3  ;;  %vm7060_vm7 = vcmask 261120  }
  0x11   : > { %v7298_v15 = vld [vmem:[%s12999_s1 + $0xa0] sm:$0xff]  ;;  %9806 = vmatprep.subr.bf16.mxu1 %v10915_v7  ;;  %9758 = vmatpush3.bf16.msra.mxu0 %v10904_v3  ;;  %v7299_v16 = vld [vmem:[%s12999_s1 + $0xa8] sm:$0xff]  ;;  %v10961_v17 = vpack.c.bf16 %v430_v14, %v429_v13  ;;  %v432_v21 = vld [vmem:[%s12999_s1 + $0x18] sm:$0xf]  ;;  %s418_s19 = scalar_lea.vmem %s13009_s11, %s7227_s15  ;;  %s422_s26 = scalar_lea.vmem %s13010_s12, %s7227_s15  ;;  %vm7135_vm8 = vcmask 80896  }
  0x12   : > { %9808 = vmatpush3.bf16.msra.mxu1 %v10915_v7  ;;  %9761 = vmatprep.subr.msk.bf16.mxu0 %vm10919_vm2, %v10917_v8  ;;  %s10959_s16 = scalar_lea.vmem %s12998_s0, %s10797_s29  ;;  %v10963_v18 = vpack.c.bf16 %v7299_v16, %v7298_v15  ;;  %v7300_v23 = vld [vmem:[%s12999_s1 + $0xb0] sm:$0xff]  ;;  %v7301_v24 = vld [vmem:[%s12999_s1 + $0xb8] sm:$0xf]  ;;  %v10998_v26 = vpack.c.bf16 %v432_v21, %v431_v20  ;;  %v7259_v28 = vld [vmem:[%s12999_s1 + $0x40] sm:$0xff] }
  0x13   : > { %9811 = vmatprep.subr.msk.bf16.mxu1 %vm10919_vm2, %v10932_v12  ;;  %v10966_v19 = vld [vmem:[%s10959_s16 + $0x38] sm:$0xff]  ;;  %v10980_v22 = vld [vmem:[%s10959_s16 + $0x40] sm:$0xff]  ;;  %v10996_v25 = vld [vmem:[%s10959_s16 + $0x48] sm:$0xff]  ;;  %v11002_v27 = vpack.c.bf16 %v7301_v24, %v7300_v23 }
  0x14   : > { %8497 = vmatprep.mubr.msk.f32.mxu0 %vm445_vm3, %v10966_v19  ;;  %8582 = vmatprep.mubr.msk.f32.mxu1 %vm445_vm3, %v10966_v19  ;;  %v7260_v29 = vld [vmem:[%s12999_s1 + $0x48] sm:$0xff]  ;;  %v11014_v30 = vld [vmem:[%s10959_s16 + $0x50] sm:$0xff]  ;;  %v7320_v31 = vld [vmem:[%s12999_s1 + $0xe0] sm:$0xff] }
  0x15   : > { %9764 = vmatpush3.bf16.msk.msra.mxu0 %vm10919_vm2, %v10917_v8  ;;  %v7321_v32 = vld [vmem:[%s12999_s1 + $0xe8] sm:$0xff]  ;;  %v11027_v33 = vld [vmem:[%s10959_s16 + $0x58] sm:$0xff]  ;;  %v11033_v34 = vpack.c.bf16 %v7260_v29, %v7259_v28  ;;  %v11047_v36 = vld [vmem:[%s10959_s16 + $0x60] sm:$0xff] }
  0x16   : > { %9814 = vmatpush3.bf16.msk.msra.mxu1 %vm10919_vm2, %v10932_v12  ;;  %9766 = vmatprep.subr.bf16.mxu0 %v10961_v17  ;;  %v11040_v35 = vpack.c.bf16 %v7321_v32, %v7320_v31  ;;  %v423_v37 = vld [vmem:[%s10959_s16] sm:$0xff]  ;;  %v7261_v38 = vld [vmem:[%s12999_s1 + $0x50] sm:$0xff]  ;;  %v7262_v39 = vld [vmem:[%s12999_s1 + $0x58] sm:$0xf] }
  0x17   : > { %9816 = vmatprep.subr.bf16.mxu1 %v10963_v18  ;;  %v11072_v40 = vld [vmem:[%s10959_s16 + $0x8] sm:$0xff]  ;;  %v7322_v41 = vld [vmem:[%s12999_s1 + $0xf0] sm:$0xff]  ;;  %v7323_v42 = vld [vmem:[%s12999_s1 + $0xf8] sm:$0xf]  ;;  %v11084_v44 = vpack.c.bf16 %v7262_v39, %v7261_v38 }
  0x18   : > { %8498 = vmatmul.mubr.msk.f32.vlgmr.msra.gmra.mrb[0].mxu0 %vm445_vm3, %v10980_v22  ;;  %v11082_v43 = vld [vmem:[%s10959_s16 + $0x10] sm:$0xff]  ;;  %v11088_v45 = vpack.c.bf16 %v7323_v42, %v7322_v41  ;;  %v7276_v46 = vld [vmem:[%s12999_s1 + $0x60] sm:$0xff]  ;;  %v7277_v47 = vld [vmem:[%s12999_s1 + $0x68] sm:$0xff] }
  0x19   : > { %8583 = vmatmul.mubr.msk.f32.vlgmr.msra.gmra.mrb[0].mxu1 %vm445_vm3, %v10980_v22  ;;  %9768 = vmatpush3.bf16.msra.mxu0 %v10961_v17  ;;  %v11100_v48 = vld [vmem:[%s10959_s16 + $0x18] sm:$0xff]  ;;  %v7331_v49 = vld [vmem:[%s12999_s1 + $0x100] sm:$0xff]  ;;  %v7332_v50 = vld [vmem:[%s12999_s1 + $0x108] sm:$0xff]  ;;  %v11119_v52 = vpack.c.bf16 %v7277_v47, %v7276_v46 }
  0x1a   : > { %8500 = vmatprep.mubr.msk.f32.mxu0 %vm445_vm3, %v10996_v25  ;;  %8585 = vmatprep.mubr.msk.f32.mxu1 %vm445_vm3, %v10996_v25  ;;  %v11113_v51 = vld [vmem:[%s10959_s16 + $0x20] sm:$0xff]  ;;  %v11126_v53 = vpack.c.bf16 %v7332_v50, %v7331_v49  ;;  %v11133_v54 = vld [vmem:[%s10959_s16 + $0x28] sm:$0xff]  ;;  %v11141_v55 = vld [vmem:[%s10959_s16 + $0x70] sm:$0xff] }
  0x1b   : > { %9818 = vmatpush3.bf16.msra.mxu1 %v10963_v18  ;;  %9771 = vmatprep.subr.msk.bf16.mxu0 %vm10919_vm2, %v10998_v26  ;;  %v7278_v56 = vld [vmem:[%s12999_s1 + $0x70] sm:$0xff]  ;;  %v7279_v57 = vld [vmem:[%s12999_s1 + $0x78] sm:$0xf]  ;;  %v11172_v61 = vld [vmem:[%s10959_s16 + $0x80] sm:$0xff] }
  0x1c   : > { %8501 = vmatmul.mubr.msk.f32.gmra.mrb[2].mxu0 %vm445_vm3, %v11014_v30  ;;  %9821 = vmatprep.subr.msk.bf16.mxu1 %vm10919_vm2, %v11002_v27  ;;  %v11161_v58 = vld [vmem:[%s10959_s16 + $0x78] sm:$0xff]  ;;  %v7333_v59 = vld [vmem:[%s12999_s1 + $0x110] sm:$0xff]  ;;  %v11174_v62 = vpack.c.bf16 %v7279_v57, %v7278_v56  ;;  %v7287_v0 = vld [vmem:[%s12999_s1 + $0x80] sm:$0xff] }
  0x1d   : > { %8586 = vmatmul.mubr.msk.f32.gmra.mrb[2].mxu1 %vm445_vm3, %v11014_v30  ;;  %8503 = vmatprep.mubr.msk.f32.mxu0 %vm445_vm3, %v11027_v33  ;;  %v7334_v60 = vld [vmem:[%s12999_s1 + $0x118] sm:$0xf]  ;;  %v7288_v1 = vld [vmem:[%s12999_s1 + $0x88] sm:$0xff]  ;;  %v7342_v4 = vld [vmem:[%s12999_s1 + $0x120] sm:$0xff] }
  0x1e   : > { %9774 = vmatpush3.bf16.msk.msra.mxu0 %vm10919_vm2, %v10998_v26  ;;  %8588 = vmatprep.mubr.msk.f32.mxu1 %vm445_vm3, %v11027_v33  ;;  %v11178_v63 = vpack.c.bf16 %v7334_v60, %v7333_v59  ;;  %v11190_v2 = vld [vmem:[%s10959_s16 + $0x88] sm:$0xff]  ;;  %v11203_v6 = vld [vmem:[%s10959_s16 + $0x90] sm:$0xff]  ;;  %v11209_v10 = vpack.c.bf16 %v7288_v1, %v7287_v0  ;;  %v11223_v13 = vld [vmem:[%s10959_s16 + $0x98] sm:$0xff] }
  0x1f   : > { %9824 = vmatpush3.bf16.msk.msra.mxu1 %vm10919_vm2, %v11002_v27  ;;  %9776 = vmatprep.subr.bf16.mxu0 %v11033_v34  ;;  %v7343_v5 = vld [vmem:[%s12999_s1 + $0x128] sm:$0xff]  ;;  %v7289_v15 = vld [vmem:[%s12999_s1 + $0x90] sm:$0xff]  ;;  %v7290_v16 = vld [vmem:[%s12999_s1 + $0x98] sm:$0xf] }
  0x20   : > { %8504 = vmatmul.mubr.msk.f32.gmra.mrb[4].mxu0 %vm445_vm3, %v11047_v36  ;;  %9826 = vmatprep.subr.bf16.mxu1 %v11040_v35  ;;  %v11216_v11 = vpack.c.bf16 %v7343_v5, %v7342_v4  ;;  %v11231_v14 = vld [vmem:[%s10959_s16 + $0xa8] sm:$0xff]  ;;  %v11251_v20 = vld [vmem:[%s10959_s16 + $0xb0] sm:$0xff]  ;;  %v7345_v23 = vld [vmem:[%s12999_s1 + $0x138] sm:$0xf]  ;;  %v11264_v28 = vpack.c.bf16 %v7290_v16, %v7289_v15 }
  0x21   : > { %8589 = vmatmul.mubr.msk.f32.gmra.mrb[4].mxu1 %vm445_vm3, %v11047_v36  ;;  %8514 = vmatprep.mubr.msk.f32.mxu0 %vm445_vm3, %v423_v37  ;;  %v7344_v21 = vld [vmem:[%s12999_s1 + $0x130] sm:$0xff]  ;;  %v11262_v24 = vld [vmem:[%s10959_s16 + $0xb8] sm:$0xff]  ;;  %v11274_v31 = vld [vmem:[%s10959_s16 + $0xc0] sm:$0xff] }
  0x22   : > { %8599 = vmatprep.mubr.msk.f32.mxu1 %vm445_vm3, %v423_v37  ;;  %v11268_v29 = vpack.c.bf16 %v7345_v23, %v7344_v21  ;;  %v11281_v32 = vld [vmem:[%s10959_s16 + $0xc8] sm:$0xff]  ;;  %v11297_v37 = vld [vmem:[%s10959_s16 + $0xd0] sm:$0xff]  ;;  %v7652_v59 = vld [vmem:[%s13001_s3 + $0x1d8] sm:$0xff] }
  0x23   : > { %v11340_v38 = vld [vmem:[%s10959_s16 + $0x30] sm:$0xff]  ;;  %v7654_v1 = vld [vmem:[%s13001_s3 + $0x1e8] sm:$0xff] }
  0x24   : > { %8515 = vmatmul.mubr.msk.f32.vlgmr.msra.gmra.mrb[0].mxu0 %vm445_vm3, %v11072_v40  ;;  %v7587_v56 = vld [vmem:[%s13001_s3 + $0x70] sm:$0xff]  ;;  %v12050_v5 = vld [vmem:[%s13001_s3 + $0x88] sm:$0xff] }
  0x25   : > { %8600 = vmatmul.mubr.msk.f32.vlgmr.msra.gmra.mrb[0].mxu1 %vm445_vm3, %v11072_v40  ;;  %9778 = vmatpush3.bf16.msra.mxu0 %v11033_v34  ;;  %v7651_v57 = vld [vmem:[%s13001_s3 + $0x1d0] sm:$0xff]  ;;  %v4711_v15 = vld [vmem:[%s13001_s3 + $0x8] sm:$0xff] }
  0x26   : > { %8517 = vmatprep.mubr.msk.f32.mxu0 %vm445_vm3, %v11082_v43  ;;  %8602 = vmatprep.mubr.msk.f32.mxu1 %vm445_vm3, %v11082_v43  ;;  %v12021_v60 = vpack.c.bf16 %v7652_v59, %v7651_v57  ;;  %v7638_v16 = vld [vmem:[%s13001_s3 + $0x168] sm:$0xff] }
  0x27   : > { %9828 = vmatpush3.bf16.msra.mxu1 %v11040_v35  ;;  %9781 = vmatprep.subr.msk.bf16.mxu0 %vm10919_vm2, %v11084_v44 }
  0x28   : > { %8518 = vmatmul.mubr.msk.f32.gmra.mrb[2].mxu0 %vm445_vm3, %v11100_v48  ;;  %9831 = vmatprep.subr.msk.bf16.mxu1 %vm10919_vm2, %v11088_v45 }
  0x29   : > { %8603 = vmatmul.mubr.msk.f32.gmra.mrb[2].mxu1 %vm445_vm3, %v11100_v48  ;;  %8520 = vmatprep.mubr.msk.f32.mxu0 %vm445_vm3, %v11113_v51 }
  0x2a   : > { %9784 = vmatpush3.bf16.msk.msra.mxu0 %vm10919_vm2, %v11084_v44  ;;  %8605 = vmatprep.mubr.msk.f32.mxu1 %vm445_vm3, %v11113_v51 }
  0x2b   : > { %9834 = vmatpush3.bf16.msk.msra.mxu1 %vm10919_vm2, %v11088_v45  ;;  %9786 = vmatprep.subr.bf16.mxu0 %v11119_v52 }
  0x2c   : > { %8521 = vmatmul.mubr.msk.f32.gmra.mrb[4].mxu0 %vm445_vm3, %v11133_v54  ;;  %9836 = vmatprep.subr.bf16.mxu1 %v11126_v53 }
  0x2d   : > { %8606 = vmatmul.mubr.msk.f32.gmra.mrb[4].mxu1 %vm445_vm3, %v11133_v54  ;;  %8531 = vmatprep.mubr.msk.f32.mxu0 %vm445_vm3, %v11141_v55 }
  0x2e   : > { %8616 = vmatprep.mubr.msk.f32.mxu1 %vm445_vm3, %v11141_v55 }
  0x30   : > { %8532 = vmatmul.mubr.msk.f32.vlgmr.msra.gmra.mrb[0].mxu0 %vm445_vm3, %v11161_v58 }
  0x31   : > { %8617 = vmatmul.mubr.msk.f32.vlgmr.msra.gmra.mrb[0].mxu1 %vm445_vm3, %v11161_v58  ;;  %9788 = vmatpush3.bf16.msra.mxu0 %v11119_v52 }
  0x32   : > { %8534 = vmatprep.mubr.msk.f32.mxu0 %vm445_vm3, %v11172_v61  ;;  %8619 = vmatprep.mubr.msk.f32.mxu1 %vm445_vm3, %v11172_v61 }
  0x33   : > { %9838 = vmatpush3.bf16.msra.mxu1 %v11126_v53  ;;  %9791 = vmatprep.subr.msk.bf16.mxu0 %vm10919_vm2, %v11174_v62 }
  0x34   : > { %8535 = vmatmul.mubr.msk.f32.gmra.mrb[2].mxu0 %vm445_vm3, %v11190_v2  ;;  %9841 = vmatprep.subr.msk.bf16.mxu1 %vm10919_vm2, %v11178_v63 }
  0x35   : > { %8620 = vmatmul.mubr.msk.f32.gmra.mrb[2].mxu1 %vm445_vm3, %v11190_v2  ;;  %8537 = vmatprep.mubr.msk.f32.mxu0 %vm445_vm3, %v11203_v6 }
  0x36   : > { %9794 = vmatpush3.bf16.msk.msra.mxu0 %vm10919_vm2, %v11174_v62  ;;  %8622 = vmatprep.mubr.msk.f32.mxu1 %vm445_vm3, %v11203_v6 }
  0x37   : > { %9844 = vmatpush3.bf16.msk.msra.mxu1 %vm10919_vm2, %v11178_v63  ;;  %9796 = vmatprep.subr.bf16.mxu0 %v11209_v10 }
  0x38   : > { %8538 = vmatmul.mubr.msk.f32.gmra.mrb[4].mxu0 %vm445_vm3, %v11223_v13  ;;  %9846 = vmatprep.subr.bf16.mxu1 %v11216_v11 }
  0x39   : > { %8623 = vmatmul.mubr.msk.f32.gmra.mrb[4].mxu1 %vm445_vm3, %v11223_v13  ;;  %8548 = vmatprep.mubr.msk.f32.mxu0 %vm445_vm3, %v11231_v14 }
  0x3a   : > { %8633 = vmatprep.mubr.msk.f32.mxu1 %vm445_vm3, %v11231_v14 }
  0x3c   : > { %8549 = vmatmul.mubr.msk.f32.vlgmr.msra.gmra.mrb[0].mxu0 %vm445_vm3, %v11251_v20 }
  0x3d   : > { %8634 = vmatmul.mubr.msk.f32.vlgmr.msra.gmra.mrb[0].mxu1 %vm445_vm3, %v11251_v20  ;;  %9798 = vmatpush3.bf16.msra.mxu0 %v11209_v10 }
  0x3e   : > { %8551 = vmatprep.mubr.msk.f32.mxu0 %vm445_vm3, %v11262_v24  ;;  %8636 = vmatprep.mubr.msk.f32.mxu1 %vm445_vm3, %v11262_v24 }
  0x3f   : > { %9848 = vmatpush3.bf16.msra.mxu1 %v11216_v11  ;;  %9801 = vmatprep.subr.msk.bf16.mxu0 %vm10919_vm2, %v11264_v28 }
  0x40   : > { %8552 = vmatmul.mubr.msk.f32.gmra.mrb[2].mxu0 %vm445_vm3, %v11274_v31  ;;  %9851 = vmatprep.subr.msk.bf16.mxu1 %vm10919_vm2, %v11268_v29 }
  0x41   : > { %8637 = vmatmul.mubr.msk.f32.gmra.mrb[2].mxu1 %vm445_vm3, %v11274_v31  ;;  %8554 = vmatprep.mubr.msk.f32.mxu0 %vm445_vm3, %v11281_v32 }
  0x42   : > { %9804 = vmatpush3.bf16.msk.msra.mxu0 %vm10919_vm2, %v11264_v28  ;;  %8639 = vmatprep.mubr.msk.f32.mxu1 %vm445_vm3, %v11281_v32 }
  0x43   : > { %9854 = vmatpush3.bf16.msk.msra.mxu1 %vm10919_vm2, %v11268_v29  ;;  %9856 = vmatprep.subr.bf16.mxu0 %v10904_v3 }
  0x44   : > { %8555 = vmatmul.mubr.msk.f32.gmra.mrb[4].mxu0 %vm445_vm3, %v11297_v37  ;;  %9906 = vmatprep.subr.bf16.mxu1 %v10915_v7 }
  0x45   : > { %8640 = vmatmul.mubr.msk.f32.gmra.mrb[4].mxu1 %vm445_vm3, %v11297_v37  ;;  %8565 = vmatprep.mubr.msk.f32.mxu0 %vm445_vm3, %v11072_v40 }
  0x46   : > { %8650 = vmatprep.mubr.msk.f32.mxu1 %vm445_vm3, %v11072_v40 }
  0x48   : > { %8566 = vmatmul.mubr.msk.f32.vlgmr.msra.gmra.mrb[0].mxu0 %vm445_vm3, %v11082_v43 }
  0x49   : > { %8651 = vmatmul.mubr.msk.f32.vlgmr.msra.gmra.mrb[0].mxu1 %vm445_vm3, %v11082_v43  ;;  %9858 = vmatpush3.bf16.msra.mxu0 %v10904_v3 }
  0x4a   : > { %8568 = vmatprep.mubr.msk.f32.mxu0 %vm445_vm3, %v11100_v48  ;;  %8653 = vmatprep.mubr.msk.f32.mxu1 %vm445_vm3, %v11100_v48 }
  0x4b   : > { %9908 = vmatpush3.bf16.msra.mxu1 %v10915_v7  ;;  %9861 = vmatprep.subr.msk.bf16.mxu0 %vm10919_vm2, %v10917_v8 }
  0x4c   : > { %8569 = vmatmul.mubr.msk.f32.gmra.mrb[2].mxu0 %vm445_vm3, %v11113_v51  ;;  %9911 = vmatprep.subr.msk.bf16.mxu1 %vm10919_vm2, %v10932_v12 }
  0x4d   : > { %8654 = vmatmul.mubr.msk.f32.gmra.mrb[2].mxu1 %vm445_vm3, %v11113_v51  ;;  %8571 = vmatprep.mubr.msk.f32.mxu0 %vm445_vm3, %v11133_v54 }
  0x4e   : > { %8656 = vmatprep.mubr.msk.f32.mxu1 %vm445_vm3, %v11133_v54  ;;  %9864 = vmatpush3.bf16.msk.msra.mxu0 %vm10919_vm2, %v10917_v8 }
  0x4f   : > { %9914 = vmatpush3.bf16.msk.msra.mxu1 %vm10919_vm2, %v10932_v12  ;;  %9866 = vmatprep.subr.bf16.mxu0 %v10961_v17 }
  0x50   : > { %8572 = vmatmul.mubr.msk.f32.gmra.mrb[4].mxu0 %vm445_vm3, %v11340_v38  ;;  %9916 = vmatprep.subr.bf16.mxu1 %v10963_v18 }
  0x51   : > { %8657 = vmatmul.mubr.msk.f32.gmra.mrb[4].mxu1 %vm445_vm3, %v11340_v38  ;;  %8667 = vmatprep.mubr.msk.f32.mxu0 %vm445_vm3, %v11141_v55 }
  0x52   : > { %8752 = vmatprep.mubr.msk.f32.mxu1 %vm445_vm3, %v11141_v55 }
  0x54   : > { %8668 = vmatmul.mubr.msk.f32.vlgmr.msra.gmra.mrb[6].mxu0 %vm445_vm3, %v11161_v58 }
  0x55   : > { %8753 = vmatmul.mubr.msk.f32.vlgmr.msra.gmra.mrb[6].mxu1 %vm445_vm3, %v11161_v58  ;;  %9868 = vmatpush3.bf16.msra.mxu0 %v10961_v17 }
  0x56   : > { %8670 = vmatprep.mubr.msk.f32.mxu0 %vm445_vm3, %v11172_v61  ;;  %8755 = vmatprep.mubr.msk.f32.mxu1 %vm445_vm3, %v11172_v61 }
  0x57   : > { %9918 = vmatpush3.bf16.msra.mxu1 %v10963_v18  ;;  %9871 = vmatprep.subr.msk.bf16.mxu0 %vm10919_vm2, %v10998_v26 }
  0x58   : > { %8671 = vmatmul.mubr.msk.f32.gmra.mrb[8].mxu0 %vm445_vm3, %v11190_v2  ;;  %9921 = vmatprep.subr.msk.bf16.mxu1 %vm10919_vm2, %v11002_v27 }
  0x59   : > { %8756 = vmatmul.mubr.msk.f32.gmra.mrb[8].mxu1 %vm445_vm3, %v11190_v2  ;;  %8673 = vmatprep.mubr.msk.f32.mxu0 %vm445_vm3, %v11203_v6 }
  0x5a   : > { %9874 = vmatpush3.bf16.msk.msra.mxu0 %vm10919_vm2, %v10998_v26  ;;  %8758 = vmatprep.mubr.msk.f32.mxu1 %vm445_vm3, %v11203_v6 }
  0x5b   : > { %9924 = vmatpush3.bf16.msk.msra.mxu1 %vm10919_vm2, %v11002_v27  ;;  %9876 = vmatprep.subr.bf16.mxu0 %v11033_v34 }
  0x5c   : > { %8674 = vmatmul.mubr.msk.f32.gmra.mrb[10].mxu0 %vm445_vm3, %v11223_v13  ;;  %9926 = vmatprep.subr.bf16.mxu1 %v11040_v35 }
  0x5d   : > { %8759 = vmatmul.mubr.msk.f32.gmra.mrb[10].mxu1 %vm445_vm3, %v11223_v13  ;;  %8684 = vmatprep.mubr.msk.f32.mxu0 %vm445_vm3, %v10966_v19 }
  0x5e   : > { %8769 = vmatprep.mubr.msk.f32.mxu1 %vm445_vm3, %v10966_v19  ;;  %v11543_v19 = vld [vmem:[%s10959_s16 + $0x68] sm:$0xff] }
  0x60   : > { %8685 = vmatmul.mubr.msk.f32.vlgmr.msra.gmra.mrb[6].mxu0 %vm445_vm3, %v10980_v22 }
  0x61   : > { %8770 = vmatmul.mubr.msk.f32.vlgmr.msra.gmra.mrb[6].mxu1 %vm445_vm3, %v10980_v22  ;;  %9878 = vmatpush3.bf16.msra.mxu0 %v11033_v34 }
  0x62   : > { %8687 = vmatprep.mubr.msk.f32.mxu0 %vm445_vm3, %v10996_v25  ;;  %8772 = vmatprep.mubr.msk.f32.mxu1 %vm445_vm3, %v10996_v25 }
  0x63   : > { %9928 = vmatpush3.bf16.msra.mxu1 %v11040_v35  ;;  %9881 = vmatprep.subr.msk.bf16.mxu0 %vm10919_vm2, %v11084_v44 }
  0x64   : > { %8688 = vmatmul.mubr.msk.f32.gmra.mrb[8].mxu0 %vm445_vm3, %v11014_v30  ;;  %9931 = vmatprep.subr.msk.bf16.mxu1 %vm10919_vm2, %v11088_v45 }
  0x65   : > { %8773 = vmatmul.mubr.msk.f32.gmra.mrb[8].mxu1 %vm445_vm3, %v11014_v30  ;;  %8690 = vmatprep.mubr.msk.f32.mxu0 %vm445_vm3, %v11027_v33 }
  0x66   : > { %9884 = vmatpush3.bf16.msk.msra.mxu0 %vm10919_vm2, %v11084_v44  ;;  %8775 = vmatprep.mubr.msk.f32.mxu1 %vm445_vm3, %v11027_v33 }
  0x67   : > { %9934 = vmatpush3.bf16.msk.msra.mxu1 %vm10919_vm2, %v11088_v45  ;;  %9886 = vmatprep.subr.bf16.mxu0 %v11119_v52 }
  0x68   : > { %8691 = vmatmul.mubr.msk.f32.gmra.mrb[10].mxu0 %vm445_vm3, %v11047_v36  ;;  %9936 = vmatprep.subr.bf16.mxu1 %v11126_v53 }
  0x69   : > { %8776 = vmatmul.mubr.msk.f32.gmra.mrb[10].mxu1 %vm445_vm3, %v11047_v36  ;;  %8701 = vmatprep.mubr.msk.f32.mxu0 %vm445_vm3, %v11231_v14 }
  0x6a   : > { %8786 = vmatprep.mubr.msk.f32.mxu1 %vm445_vm3, %v11231_v14 }
  0x6c   : > { %8702 = vmatmul.mubr.msk.f32.vlgmr.msra.gmra.mrb[6].mxu0 %vm445_vm3, %v11251_v20 }
  0x6d   : > { %8787 = vmatmul.mubr.msk.f32.vlgmr.msra.gmra.mrb[6].mxu1 %vm445_vm3, %v11251_v20  ;;  %9888 = vmatpush3.bf16.msra.mxu0 %v11119_v52 }
  0x6e   : > { %8704 = vmatprep.mubr.msk.f32.mxu0 %vm445_vm3, %v11262_v24  ;;  %8789 = vmatprep.mubr.msk.f32.mxu1 %vm445_vm3, %v11262_v24 }
  0x6f   : > { %9938 = vmatpush3.bf16.msra.mxu1 %v11126_v53  ;;  %9891 = vmatprep.subr.msk.bf16.mxu0 %vm10919_vm2, %v11174_v62 }
  0x70   : > { %8705 = vmatmul.mubr.msk.f32.gmra.mrb[8].mxu0 %vm445_vm3, %v11274_v31  ;;  %9941 = vmatprep.subr.msk.bf16.mxu1 %vm10919_vm2, %v11178_v63 }
  0x71   : > { %8790 = vmatmul.mubr.msk.f32.gmra.mrb[8].mxu1 %vm445_vm3, %v11274_v31  ;;  %8707 = vmatprep.mubr.msk.f32.mxu0 %vm445_vm3, %v11281_v32 }
  0x72   : > { %9894 = vmatpush3.bf16.msk.msra.mxu0 %vm10919_vm2, %v11174_v62  ;;  %8792 = vmatprep.mubr.msk.f32.mxu1 %vm445_vm3, %v11281_v32 }
  0x73   : > { %9944 = vmatpush3.bf16.msk.msra.mxu1 %vm10919_vm2, %v11178_v63  ;;  %9896 = vmatprep.subr.bf16.mxu0 %v11209_v10 }
  0x74   : > { %8708 = vmatmul.mubr.msk.f32.gmra.mrb[10].mxu0 %vm445_vm3, %v11297_v37  ;;  %9946 = vmatprep.subr.bf16.mxu1 %v11216_v11 }
  0x75   : > { %8793 = vmatmul.mubr.msk.f32.gmra.mrb[10].mxu1 %vm445_vm3, %v11297_v37  ;;  %8718 = vmatprep.mubr.msk.f32.mxu0 %vm445_vm3, %v11072_v40 }
  0x76   : > { %8803 = vmatprep.mubr.msk.f32.mxu1 %vm445_vm3, %v11072_v40 }
  0x78   : > { %8719 = vmatmul.mubr.msk.f32.vlgmr.msra.gmra.mrb[6].mxu0 %vm445_vm3, %v11082_v43 }
  0x79   : > { %8804 = vmatmul.mubr.msk.f32.vlgmr.msra.gmra.mrb[6].mxu1 %vm445_vm3, %v11082_v43  ;;  %9898 = vmatpush3.bf16.msra.mxu0 %v11209_v10 }
  0x7a   : > { %8721 = vmatprep.mubr.msk.f32.mxu0 %vm445_vm3, %v11100_v48  ;;  %8806 = vmatprep.mubr.msk.f32.mxu1 %vm445_vm3, %v11100_v48 }
  0x7b   : > { %9948 = vmatpush3.bf16.msra.mxu1 %v11216_v11  ;;  %9901 = vmatprep.subr.msk.bf16.mxu0 %vm10919_vm2, %v11264_v28 }
  0x7c   : > { %8722 = vmatmul.mubr.msk.f32.gmra.mrb[8].mxu0 %vm445_vm3, %v11113_v51  ;;  %9951 = vmatprep.subr.msk.bf16.mxu1 %vm10919_vm2, %v11268_v29 }
  0x7d   : > { %8807 = vmatmul.mubr.msk.f32.gmra.mrb[8].mxu1 %vm445_vm3, %v11113_v51  ;;  %8724 = vmatprep.mubr.msk.f32.mxu0 %vm445_vm3, %v11133_v54 }
  0x7e   : > { %9904 = vmatpush3.bf16.msk.msra.mxu0 %vm10919_vm2, %v11264_v28  ;;  %8809 = vmatprep.mubr.msk.f32.mxu1 %vm445_vm3, %v11133_v54 }
  0x7f   : > { %9954 = vmatpush3.bf16.msk.msra.mxu1 %vm10919_vm2, %v11268_v29  ;;  %9956 = vmatprep.subr.bf16.mxu0 %v10904_v3 }
  0x80   : > { %8725 = vmatmul.mubr.msk.f32.gmra.mrb[10].mxu0 %vm445_vm3, %v11340_v38  ;;  %10006 = vmatprep.subr.bf16.mxu1 %v10915_v7 }
  0x81   : > { %8810 = vmatmul.mubr.msk.f32.gmra.mrb[10].mxu1 %vm445_vm3, %v11340_v38  ;;  %8735 = vmatprep.mubr.msk.f32.mxu0 %vm445_vm3, %v10980_v22 }
  0x82   : > { %8820 = vmatprep.mubr.msk.f32.mxu1 %vm445_vm3, %v10980_v22 }
  0x84   : > { %8736 = vmatmul.mubr.msk.f32.vlgmr.msra.gmra.mrb[6].mxu0 %vm445_vm3, %v10996_v25 }
  0x85   : > { %8821 = vmatmul.mubr.msk.f32.vlgmr.msra.gmra.mrb[6].mxu1 %vm445_vm3, %v10996_v25  ;;  %9958 = vmatpush3.bf16.msra.mxu0 %v10904_v3 }
  0x86   : > { %8738 = vmatprep.mubr.msk.f32.mxu0 %vm445_vm3, %v11014_v30  ;;  %8823 = vmatprep.mubr.msk.f32.mxu1 %vm445_vm3, %v11014_v30 }
  0x87   : > { %10008 = vmatpush3.bf16.msra.mxu1 %v10915_v7  ;;  %9961 = vmatprep.subr.msk.bf16.mxu0 %vm10919_vm2, %v10917_v8 }
  0x88   : > { %8739 = vmatmul.mubr.msk.f32.gmra.mrb[8].mxu0 %vm445_vm3, %v11027_v33  ;;  %10011 = vmatprep.subr.msk.bf16.mxu1 %vm10919_vm2, %v10932_v12 }
  0x89   : > { %8824 = vmatmul.mubr.msk.f32.gmra.mrb[8].mxu1 %vm445_vm3, %v11027_v33  ;;  %8741 = vmatprep.mubr.msk.f32.mxu0 %vm445_vm3, %v11047_v36 }
  0x8a   : > { %8826 = vmatprep.mubr.msk.f32.mxu1 %vm445_vm3, %v11047_v36  ;;  %9964 = vmatpush3.bf16.msk.msra.mxu0 %vm10919_vm2, %v10917_v8 }
  0x8b   : > { %10014 = vmatpush3.bf16.msk.msra.mxu1 %vm10919_vm2, %v10932_v12  ;;  %9966 = vmatprep.subr.bf16.mxu0 %v10961_v17 }
  0x8c   : > { %8742 = vmatmul.mubr.msk.f32.gmra.mrb[10].mxu0 %vm445_vm3, %v11543_v19  ;;  %10016 = vmatprep.subr.bf16.mxu1 %v10963_v18 }
  0x8d   : > { %8827 = vmatmul.mubr.msk.f32.gmra.mrb[10].mxu1 %vm445_vm3, %v11543_v19  ;;  %8837 = vmatprep.mubr.msk.f32.mxu0 %vm445_vm3, %v11231_v14 }
  0x8e   : > { %8922 = vmatprep.mubr.msk.f32.mxu1 %vm445_vm3, %v11231_v14 }
  0x90   : > { %8838 = vmatmul.mubr.msk.f32.vlgmr.msra.gmra.mrb[12].mxu0 %vm445_vm3, %v11251_v20 }
  0x91   : > { %8923 = vmatmul.mubr.msk.f32.vlgmr.msra.gmra.mrb[12].mxu1 %vm445_vm3, %v11251_v20  ;;  %9968 = vmatpush3.bf16.msra.mxu0 %v10961_v17 }
  0x92   : > { %8840 = vmatprep.mubr.msk.f32.mxu0 %vm445_vm3, %v11262_v24  ;;  %8925 = vmatprep.mubr.msk.f32.mxu1 %vm445_vm3, %v11262_v24 }
  0x93   : > { %10018 = vmatpush3.bf16.msra.mxu1 %v10963_v18  ;;  %9971 = vmatprep.subr.msk.bf16.mxu0 %vm10919_vm2, %v10998_v26 }
  0x94   : > { %8841 = vmatmul.mubr.msk.f32.gmra.mrb[14].mxu0 %vm445_vm3, %v11274_v31  ;;  %10021 = vmatprep.subr.msk.bf16.mxu1 %vm10919_vm2, %v11002_v27 }
  0x95   : > { %8926 = vmatmul.mubr.msk.f32.gmra.mrb[14].mxu1 %vm445_vm3, %v11274_v31  ;;  %8843 = vmatprep.mubr.msk.f32.mxu0 %vm445_vm3, %v11281_v32 }
  0x96   : > { %9974 = vmatpush3.bf16.msk.msra.mxu0 %vm10919_vm2, %v10998_v26  ;;  %8928 = vmatprep.mubr.msk.f32.mxu1 %vm445_vm3, %v11281_v32 }
  0x97   : > { %10024 = vmatpush3.bf16.msk.msra.mxu1 %vm10919_vm2, %v11002_v27  ;;  %9976 = vmatprep.subr.bf16.mxu0 %v11033_v34 }
  0x98   : > { %8844 = vmatmul.mubr.msk.f32.gmra.mrb[16].mxu0 %vm445_vm3, %v11297_v37  ;;  %10026 = vmatprep.subr.bf16.mxu1 %v11040_v35 }
  0x99   : > { %8929 = vmatmul.mubr.msk.f32.gmra.mrb[16].mxu1 %vm445_vm3, %v11297_v37  ;;  %8854 = vmatprep.mubr.msk.f32.mxu0 %vm445_vm3, %v11141_v55 }
  0x9a   : > { %8939 = vmatprep.mubr.msk.f32.mxu1 %vm445_vm3, %v11141_v55  ;;  %v7586_v55 = vld [vmem:[%s13001_s3 + $0x68] sm:$0xff] }
  0x9c   : > { %8855 = vmatmul.mubr.msk.f32.vlgmr.msra.gmra.mrb[12].mxu0 %vm445_vm3, %v11161_v58 }
  0x9d   : > { %8940 = vmatmul.mubr.msk.f32.vlgmr.msra.gmra.mrb[12].mxu1 %vm445_vm3, %v11161_v58  ;;  %9978 = vmatpush3.bf16.msra.mxu0 %v11033_v34 }
  0x9e   : > { %8857 = vmatprep.mubr.msk.f32.mxu0 %vm445_vm3, %v11172_v61  ;;  %8942 = vmatprep.mubr.msk.f32.mxu1 %vm445_vm3, %v11172_v61 }
  0x9f   : > { %10028 = vmatpush3.bf16.msra.mxu1 %v11040_v35  ;;  %9981 = vmatprep.subr.msk.bf16.mxu0 %vm10919_vm2, %v11084_v44 }
  0xa0   : > { %8858 = vmatmul.mubr.msk.f32.gmra.mrb[14].mxu0 %vm445_vm3, %v11190_v2  ;;  %10031 = vmatprep.subr.msk.bf16.mxu1 %vm10919_vm2, %v11088_v45 }
  0xa1   : > { %8943 = vmatmul.mubr.msk.f32.gmra.mrb[14].mxu1 %vm445_vm3, %v11190_v2  ;;  %8860 = vmatprep.mubr.msk.f32.mxu0 %vm445_vm3, %v11203_v6 }
  0xa2   : > { %9984 = vmatpush3.bf16.msk.msra.mxu0 %vm10919_vm2, %v11084_v44  ;;  %8945 = vmatprep.mubr.msk.f32.mxu1 %vm445_vm3, %v11203_v6 }
  0xa3   : > { %10034 = vmatpush3.bf16.msk.msra.mxu1 %vm10919_vm2, %v11088_v45  ;;  %9986 = vmatprep.subr.bf16.mxu0 %v11119_v52 }
  0xa4   : > { %8861 = vmatmul.mubr.msk.f32.gmra.mrb[16].mxu0 %vm445_vm3, %v11223_v13  ;;  %10036 = vmatprep.subr.bf16.mxu1 %v11126_v53 }
  0xa5   : > { %8946 = vmatmul.mubr.msk.f32.gmra.mrb[16].mxu1 %vm445_vm3, %v11223_v13  ;;  %8871 = vmatprep.mubr.msk.f32.mxu0 %vm445_vm3, %v11072_v40 }
  0xa6   : > { %8956 = vmatprep.mubr.msk.f32.mxu1 %vm445_vm3, %v11072_v40 }
  0xa8   : > { %8872 = vmatmul.mubr.msk.f32.vlgmr.msra.gmra.mrb[12].mxu0 %vm445_vm3, %v11082_v43 }
  0xa9   : > { %8957 = vmatmul.mubr.msk.f32.vlgmr.msra.gmra.mrb[12].mxu1 %vm445_vm3, %v11082_v43  ;;  %9988 = vmatpush3.bf16.msra.mxu0 %v11119_v52 }
  0xaa   : > { %8874 = vmatprep.mubr.msk.f32.mxu0 %vm445_vm3, %v11100_v48  ;;  %8959 = vmatprep.mubr.msk.f32.mxu1 %vm445_vm3, %v11100_v48 }
  0xab   : > { %10038 = vmatpush3.bf16.msra.mxu1 %v11126_v53  ;;  %9991 = vmatprep.subr.msk.bf16.mxu0 %vm10919_vm2, %v11174_v62 }
  0xac   : > { %8875 = vmatmul.mubr.msk.f32.gmra.mrb[14].mxu0 %vm445_vm3, %v11113_v51  ;;  %10041 = vmatprep.subr.msk.bf16.mxu1 %vm10919_vm2, %v11178_v63 }
  0xad   : > { %8960 = vmatmul.mubr.msk.f32.gmra.mrb[14].mxu1 %vm445_vm3, %v11113_v51  ;;  %8877 = vmatprep.mubr.msk.f32.mxu0 %vm445_vm3, %v11133_v54 }
  0xae   : > { %9994 = vmatpush3.bf16.msk.msra.mxu0 %vm10919_vm2, %v11174_v62  ;;  %8962 = vmatprep.mubr.msk.f32.mxu1 %vm445_vm3, %v11133_v54 }
  0xaf   : > { %10044 = vmatpush3.bf16.msk.msra.mxu1 %vm10919_vm2, %v11178_v63  ;;  %9996 = vmatprep.subr.bf16.mxu0 %v11209_v10 }
  0xb0   : > { %8878 = vmatmul.mubr.msk.f32.gmra.mrb[16].mxu0 %vm445_vm3, %v11340_v38  ;;  %10046 = vmatprep.subr.bf16.mxu1 %v11216_v11 }
  0xb1   : > { %8963 = vmatmul.mubr.msk.f32.gmra.mrb[16].mxu1 %vm445_vm3, %v11340_v38  ;;  %8888 = vmatprep.mubr.msk.f32.mxu0 %vm445_vm3, %v10980_v22 }
  0xb2   : > { %8973 = vmatprep.mubr.msk.f32.mxu1 %vm445_vm3, %v10980_v22 }
  0xb4   : > { %8889 = vmatmul.mubr.msk.f32.vlgmr.msra.gmra.mrb[12].mxu0 %vm445_vm3, %v10996_v25 }
  0xb5   : > { %8974 = vmatmul.mubr.msk.f32.vlgmr.msra.gmra.mrb[12].mxu1 %vm445_vm3, %v10996_v25  ;;  %9998 = vmatpush3.bf16.msra.mxu0 %v11209_v10 }
  0xb6   : > { %8891 = vmatprep.mubr.msk.f32.mxu0 %vm445_vm3, %v11014_v30  ;;  %8976 = vmatprep.mubr.msk.f32.mxu1 %vm445_vm3, %v11014_v30 }
  0xb7   : > { %10048 = vmatpush3.bf16.msra.mxu1 %v11216_v11  ;;  %10001 = vmatprep.subr.msk.bf16.mxu0 %vm10919_vm2, %v11264_v28 }
  0xb8   : > { %8892 = vmatmul.mubr.msk.f32.gmra.mrb[14].mxu0 %vm445_vm3, %v11027_v33  ;;  %10051 = vmatprep.subr.msk.bf16.mxu1 %vm10919_vm2, %v11268_v29 }
  0xb9   : > { %8977 = vmatmul.mubr.msk.f32.gmra.mrb[14].mxu1 %vm445_vm3, %v11027_v33  ;;  %8894 = vmatprep.mubr.msk.f32.mxu0 %vm445_vm3, %v11047_v36 }
  0xba   : > { %10004 = vmatpush3.bf16.msk.msra.mxu0 %vm10919_vm2, %v11264_v28  ;;  %8979 = vmatprep.mubr.msk.f32.mxu1 %vm445_vm3, %v11047_v36 }
  0xbb   : > { %10054 = vmatpush3.bf16.msk.msra.mxu1 %vm10919_vm2, %v11268_v29  ;;  %10056 = vmatprep.subr.bf16.mxu0 %v10904_v3 }
  0xbc   : > { %8895 = vmatmul.mubr.msk.f32.gmra.mrb[16].mxu0 %vm445_vm3, %v11543_v19  ;;  %10106 = vmatprep.subr.bf16.mxu1 %v10915_v7 }
  0xbd   : > { %8980 = vmatmul.mubr.msk.f32.gmra.mrb[16].mxu1 %vm445_vm3, %v11543_v19  ;;  %8905 = vmatprep.mubr.msk.f32.mxu0 %vm445_vm3, %v11161_v58 }
  0xbe   : > { %8990 = vmatprep.mubr.msk.f32.mxu1 %vm445_vm3, %v11161_v58 }
  0xc0   : > { %8906 = vmatmul.mubr.msk.f32.vlgmr.msra.gmra.mrb[12].mxu0 %vm445_vm3, %v11172_v61 }
  0xc1   : > { %8991 = vmatmul.mubr.msk.f32.vlgmr.msra.gmra.mrb[12].mxu1 %vm445_vm3, %v11172_v61  ;;  %10058 = vmatpush3.bf16.msra.mxu0 %v10904_v3  ;;  %v11746_v3 = vld [vmem:[%s10959_s16 + $0xa0] sm:$0xff] }
  0xc2   : > { %8908 = vmatprep.mubr.msk.f32.mxu0 %vm445_vm3, %v11190_v2  ;;  %8993 = vmatprep.mubr.msk.f32.mxu1 %vm445_vm3, %v11190_v2 }
  0xc3   : > { %10108 = vmatpush3.bf16.msra.mxu1 %v10915_v7  ;;  %10061 = vmatprep.subr.msk.bf16.mxu0 %vm10919_vm2, %v10917_v8  ;;  %v7539_v7 = vld [vmem:[%s10959_s16 + $0xd8] sm:$0xff] }
  0xc4   : > { %8909 = vmatmul.mubr.msk.f32.gmra.mrb[14].mxu0 %vm445_vm3, %v11203_v6  ;;  %10111 = vmatprep.subr.msk.bf16.mxu1 %vm10919_vm2, %v10932_v12 }
  0xc5   : > { %8994 = vmatmul.mubr.msk.f32.gmra.mrb[14].mxu1 %vm445_vm3, %v11203_v6  ;;  %8911 = vmatprep.mubr.msk.f32.mxu0 %vm445_vm3, %v11223_v13 }
  0xc6   : > { %8996 = vmatprep.mubr.msk.f32.mxu1 %vm445_vm3, %v11223_v13  ;;  %10064 = vmatpush3.bf16.msk.msra.mxu0 %vm10919_vm2, %v10917_v8 }
  0xc7   : > { %10114 = vmatpush3.bf16.msk.msra.mxu1 %vm10919_vm2, %v10932_v12  ;;  %10066 = vmatprep.subr.bf16.mxu0 %v10961_v17 }
  0xc8   : > { %8912 = vmatmul.mubr.msk.f32.gmra.mrb[16].mxu0 %vm445_vm3, %v11746_v3  ;;  %10116 = vmatprep.subr.bf16.mxu1 %v10963_v18 }
  0xc9   : > { %8997 = vmatmul.mubr.msk.f32.gmra.mrb[16].mxu1 %vm445_vm3, %v11746_v3  ;;  %9007 = vmatprep.mubr.msk.f32.mxu0 %vm445_vm3, %v11072_v40 }
  0xca   : > { %9092 = vmatprep.mubr.msk.f32.mxu1 %vm445_vm3, %v11072_v40 }
  0xcc   : > { %9008 = vmatmul.mubr.msk.f32.vlgmr.msra.gmra.mrb[18].mxu0 %vm445_vm3, %v11082_v43 }
  0xcd   : > { %9093 = vmatmul.mubr.msk.f32.vlgmr.msra.gmra.mrb[18].mxu1 %vm445_vm3, %v11082_v43  ;;  %10068 = vmatpush3.bf16.msra.mxu0 %v10961_v17  ;;  %v7649_v43 = vld [vmem:[%s13001_s3 + $0x1c0] sm:$0xff] }
  0xce   : > { %9010 = vmatprep.mubr.msk.f32.mxu0 %vm445_vm3, %v11100_v48  ;;  %9095 = vmatprep.mubr.msk.f32.mxu1 %vm445_vm3, %v11100_v48 }
  0xcf   : > { %10118 = vmatpush3.bf16.msra.mxu1 %v10963_v18  ;;  %10071 = vmatprep.subr.msk.bf16.mxu0 %vm10919_vm2, %v10998_v26 }
  0xd0   : > { %9011 = vmatmul.mubr.msk.f32.gmra.mrb[20].mxu0 %vm445_vm3, %v11113_v51  ;;  %10121 = vmatprep.subr.msk.bf16.mxu1 %vm10919_vm2, %v11002_v27 }
  0xd1   : > { %9096 = vmatmul.mubr.msk.f32.gmra.mrb[20].mxu1 %vm445_vm3, %v11113_v51  ;;  %9013 = vmatprep.mubr.msk.f32.mxu0 %vm445_vm3, %v11133_v54 }
  0xd2   : > { %10074 = vmatpush3.bf16.msk.msra.mxu0 %vm10919_vm2, %v10998_v26  ;;  %9098 = vmatprep.mubr.msk.f32.mxu1 %vm445_vm3, %v11133_v54  ;;  %v7583_v26 = vld [vmem:[%s13001_s3 + $0x50] sm:$0xff] }
  0xd3   : > { %10124 = vmatpush3.bf16.msk.msra.mxu1 %vm10919_vm2, %v11002_v27  ;;  %10076 = vmatprep.subr.bf16.mxu0 %v11033_v34  ;;  %v7647_v27 = vld [vmem:[%s13001_s3 + $0x1b0] sm:$0xff] }
  0xd4   : > { %9014 = vmatmul.mubr.msk.f32.gmra.mrb[22].mxu0 %vm445_vm3, %v11340_v38  ;;  %10126 = vmatprep.subr.bf16.mxu1 %v11040_v35 }
  0xd5   : > { %9099 = vmatmul.mubr.msk.f32.gmra.mrb[22].mxu1 %vm445_vm3, %v11340_v38  ;;  %9024 = vmatprep.mubr.msk.f32.mxu0 %vm445_vm3, %v11231_v14 }
  0xd6   : > { %9109 = vmatprep.mubr.msk.f32.mxu1 %vm445_vm3, %v11231_v14 }
  0xd8   : > { %9025 = vmatmul.mubr.msk.f32.vlgmr.msra.gmra.mrb[18].mxu0 %vm445_vm3, %v11251_v20 }
  0xd9   : > { %9110 = vmatmul.mubr.msk.f32.vlgmr.msra.gmra.mrb[18].mxu1 %vm445_vm3, %v11251_v20  ;;  %10078 = vmatpush3.bf16.msra.mxu0 %v11033_v34  ;;  %v7648_v34 = vld [vmem:[%s13001_s3 + $0x1b8] sm:$0xff] }
  0xda   : > { %9027 = vmatprep.mubr.msk.f32.mxu0 %vm445_vm3, %v11262_v24  ;;  %9112 = vmatprep.mubr.msk.f32.mxu1 %vm445_vm3, %v11262_v24  ;;  %v11978_v41 = vpack.c.bf16 %v7648_v34, %v7647_v27  ;;  %v7627_v27 = vld [vmem:[%s13001_s3 + $0x130] sm:$0xff] }
  0xdb   : > { %10128 = vmatpush3.bf16.msra.mxu1 %v11040_v35  ;;  %10081 = vmatprep.subr.msk.bf16.mxu0 %vm10919_vm2, %v11084_v44  ;;  %v7584_v35 = vld [vmem:[%s13001_s3 + $0x58] sm:$0xff] }
  0xdc   : > { %9028 = vmatmul.mubr.msk.f32.gmra.mrb[20].mxu0 %vm445_vm3, %v11274_v31  ;;  %10131 = vmatprep.subr.msk.bf16.mxu1 %vm10919_vm2, %v11088_v45 }
  0xdd   : > { %9113 = vmatmul.mubr.msk.f32.gmra.mrb[20].mxu1 %vm445_vm3, %v11274_v31  ;;  %9030 = vmatprep.mubr.msk.f32.mxu0 %vm445_vm3, %v11281_v32 }
  0xde   : > { %10084 = vmatpush3.bf16.msk.msra.mxu0 %vm10919_vm2, %v11084_v44  ;;  %9115 = vmatprep.mubr.msk.f32.mxu1 %vm445_vm3, %v11281_v32  ;;  %v7650_v44 = vld [vmem:[%s13001_s3 + $0x1c8] sm:$0xff] }
  0xdf   : > { %10134 = vmatpush3.bf16.msk.msra.mxu1 %vm10919_vm2, %v11088_v45  ;;  %10086 = vmatprep.subr.bf16.mxu0 %v11119_v52  ;;  %v11993_v47 = vpack.c.bf16 %v7650_v44, %v7649_v43 }
  0xe0   : > { %9031 = vmatmul.mubr.msk.f32.gmra.mrb[22].mxu0 %vm445_vm3, %v11297_v37  ;;  %10136 = vmatprep.subr.bf16.mxu1 %v11126_v53 }
  0xe1   : > { %9116 = vmatmul.mubr.msk.f32.gmra.mrb[22].mxu1 %vm445_vm3, %v11297_v37  ;;  %9041 = vmatprep.mubr.msk.f32.mxu0 %vm445_vm3, %v10980_v22 }
  0xe2   : > { %9126 = vmatprep.mubr.msk.f32.mxu1 %vm445_vm3, %v10980_v22 }
  0xe4   : > { %9042 = vmatmul.mubr.msk.f32.vlgmr.msra.gmra.mrb[18].mxu0 %vm445_vm3, %v10996_v25 }
  0xe5   : > { %9127 = vmatmul.mubr.msk.f32.vlgmr.msra.gmra.mrb[18].mxu1 %vm445_vm3, %v10996_v25  ;;  %10088 = vmatpush3.bf16.msra.mxu0 %v11119_v52  ;;  %v7582_v25 = vld [vmem:[%s13001_s3 + $0x48] sm:$0xff] }
  0xe6   : > { %9044 = vmatprep.mubr.msk.f32.mxu0 %vm445_vm3, %v11014_v30  ;;  %9129 = vmatprep.mubr.msk.f32.mxu1 %vm445_vm3, %v11014_v30 }
  0xe7   : > { %10138 = vmatpush3.bf16.msra.mxu1 %v11126_v53  ;;  %10091 = vmatprep.subr.msk.bf16.mxu0 %vm10919_vm2, %v11174_v62 }
  0xe8   : > { %9045 = vmatmul.mubr.msk.f32.gmra.mrb[20].mxu0 %vm445_vm3, %v11027_v33  ;;  %10141 = vmatprep.subr.msk.bf16.mxu1 %vm10919_vm2, %v11178_v63 }
  0xe9   : > { %9130 = vmatmul.mubr.msk.f32.gmra.mrb[20].mxu1 %vm445_vm3, %v11027_v33  ;;  %9047 = vmatprep.mubr.msk.f32.mxu0 %vm445_vm3, %v11047_v36  ;;  %v11963_v33 = vpack.c.bf16 %v7583_v26, %v7582_v25 }
  0xea   : > { %10094 = vmatpush3.bf16.msk.msra.mxu0 %vm10919_vm2, %v11174_v62  ;;  %9132 = vmatprep.mubr.msk.f32.mxu1 %vm445_vm3, %v11047_v36  ;;  %v7585_v36 = vld [vmem:[%s13001_s3 + $0x60] sm:$0xff] }
  0xeb   : > { %10144 = vmatpush3.bf16.msk.msra.mxu1 %vm10919_vm2, %v11178_v63  ;;  %10096 = vmatprep.subr.bf16.mxu0 %v11209_v10  ;;  %v11980_v42 = vpack.c.bf16 %v7585_v36, %v7584_v35  ;;  %v7589_v62 = vld [vmem:[%s13001_s3 + $0x80] sm:$0xff] }
  0xec   : > { %9048 = vmatmul.mubr.msk.f32.gmra.mrb[22].mxu0 %vm445_vm3, %v11543_v19  ;;  %10146 = vmatprep.subr.bf16.mxu1 %v11216_v11  ;;  %v7653_v63 = vld [vmem:[%s13001_s3 + $0x1e0] sm:$0xff] }
  0xed   : > { %9133 = vmatmul.mubr.msk.f32.gmra.mrb[22].mxu1 %vm445_vm3, %v11543_v19  ;;  %9058 = vmatprep.mubr.msk.f32.mxu0 %vm445_vm3, %v11161_v58 }
  0xee   : > { %9143 = vmatprep.mubr.msk.f32.mxu1 %vm445_vm3, %v11161_v58  ;;  %v12016_v58 = vpack.c.bf16 %v7587_v56, %v7586_v55 }
  0xf0   : > { %9059 = vmatmul.mubr.msk.f32.vlgmr.msra.gmra.mrb[18].mxu0 %vm445_vm3, %v11172_v61 }
  0xf1   : > { %9144 = vmatmul.mubr.msk.f32.vlgmr.msra.gmra.mrb[18].mxu1 %vm445_vm3, %v11172_v61  ;;  %10098 = vmatpush3.bf16.msra.mxu0 %v11209_v10  ;;  %v7588_v61 = vld [vmem:[%s13001_s3 + $0x78] sm:$0xff]  ;;  %v4710_v10 = vld [vmem:[%s13001_s3] sm:$0xff] }
  0xf2   : > { %9061 = vmatprep.mubr.msk.f32.mxu0 %vm445_vm3, %v11190_v2  ;;  %9146 = vmatprep.mubr.msk.f32.mxu1 %vm445_vm3, %v11190_v2  ;;  %v12036_v0 = vpack.c.bf16 %v7589_v62, %v7588_v61  ;;  %v12041_v2 = vpack.c.bf16 %v7654_v1, %v7653_v63 }
  0xf3   : > { %10148 = vmatpush3.bf16.msra.mxu1 %v11216_v11  ;;  %10101 = vmatprep.subr.msk.bf16.mxu0 %vm10919_vm2, %v11264_v28 }
  0xf4   : > { %9062 = vmatmul.mubr.msk.f32.gmra.mrb[20].mxu0 %vm445_vm3, %v11203_v6  ;;  %10151 = vmatprep.subr.msk.bf16.mxu1 %vm10919_vm2, %v11268_v29 }
  0xf5   : > { %9147 = vmatmul.mubr.msk.f32.gmra.mrb[20].mxu1 %vm445_vm3, %v11203_v6  ;;  %9064 = vmatprep.mubr.msk.f32.mxu0 %vm445_vm3, %v11223_v13  ;;  %v12055_v6 = vld [vmem:[%s13001_s3 + $0x1f0] sm:$0xff] }
  0xf6   : > { %10104 = vmatpush3.bf16.msk.msra.mxu0 %vm10919_vm2, %v11264_v28  ;;  %9149 = vmatprep.mubr.msk.f32.mxu1 %vm445_vm3, %v11223_v13 }
  0xf7   : > { %10154 = vmatpush3.bf16.msk.msra.mxu1 %vm10919_vm2, %v11268_v29  ;;  %10156 = vmatprep.subr.bf16.mxu0 %v11963_v33 }
  0xf8   : > { %9065 = vmatmul.mubr.msk.f32.gmra.mrb[22].mxu0 %vm445_vm3, %v11746_v3  ;;  %10236 = vmatprep.subr.bf16.mxu1 %v11978_v41 }
  0xf9   : > { %9150 = vmatmul.mubr.msk.f32.gmra.mrb[22].mxu1 %vm445_vm3, %v11746_v3  ;;  %9075 = vmatprep.mubr.msk.f32.mxu0 %vm445_vm3, %v11251_v20 }
  0xfa   : > { %9160 = vmatprep.mubr.msk.f32.mxu1 %vm445_vm3, %v11251_v20  ;;  %v7639_v20 = vld [vmem:[%s13001_s3 + $0x170] sm:$0xff] }
  0xfb   : > { %v12085_v28 = vpack.c.bf16 %v7639_v20, %v7638_v16 }
  0xfc   : > { %9076 = vmatmul.mubr.msk.f32.vlgmr.msra.gmra.mrb[18].mxu0 %vm445_vm3, %v11262_v24 }
  0xfd   : > { %9161 = vmatmul.mubr.msk.f32.vlgmr.msra.gmra.mrb[18].mxu1 %vm445_vm3, %v11262_v24  ;;  %9078 = vmatprep.mubr.msk.f32.mxu0 %vm445_vm3, %v11274_v31  ;;  %v12083_v24 = vpack.c.bf16 %v4711_v15, %v4710_v10  ;;  %v12121_v10 = vld [vmem:[%s13000_s2] ss:$0 sm:$0xff] }
  0xfe   : > { %9163 = vmatprep.mubr.msk.f32.mxu1 %vm445_vm3, %v11274_v31  ;;  %10158 = vmatpush3.bf16.msra.mxu0 %v11963_v33 }
  0xff   : > { %10238 = vmatpush3.bf16.msra.mxu1 %v11978_v41  ;;  %10160 = vmatprep.subr.bf16.mxu0 %v11980_v42 }
 0x100   : > { %9079 = vmatmul.mubr.msk.f32.gmra.mrb[20].mxu0 %vm445_vm3, %v11281_v32  ;;  %10240 = vmatprep.subr.bf16.mxu1 %v11993_v47 }
 0x101   : > { %9164 = vmatmul.mubr.msk.f32.gmra.mrb[20].mxu1 %vm445_vm3, %v11281_v32  ;;  %9081 = vmatprep.mubr.msk.f32.mxu0 %vm445_vm3, %v11297_v37 }
 0x102   : > { %9166 = vmatprep.mubr.msk.f32.mxu1 %vm445_vm3, %v11297_v37  ;;  %10162 = vmatpush3.bf16.msra.mxu0 %v11980_v42 }
 0x103   : > { %10242 = vmatpush3.bf16.msra.mxu1 %v11993_v47  ;;  %10164 = vmatprep.subr.bf16.mxu0 %v12016_v58 }
 0x104   : > { %9082 = vmatmul.mubr.msk.f32.gmra.mrb[22].mxu0 %vm445_vm3, %v7539_v7  ;;  %10244 = vmatprep.subr.bf16.mxu1 %v12021_v60 }
 0x105   : > { %9167 = vmatmul.mubr.msk.f32.gmra.mrb[22].mxu1 %vm445_vm3, %v7539_v7 }
 0x106   : > { %10166 = vmatpush3.bf16.msra.mxu0 %v12016_v58 }
 0x107   : > { %10246 = vmatpush3.bf16.msra.mxu1 %v12021_v60  ;;  %10168 = vmatprep.subr.bf16.mxu0 %v12036_v0 }
 0x108   : > { %10248 = vmatprep.subr.bf16.mxu1 %v12041_v2 }
 0x10a   : > { %10170 = vmatpush3.bf16.msra.mxu0 %v12036_v0 }
 0x10b   : > { %10250 = vmatpush3.bf16.msra.mxu1 %v12041_v2  ;;  %9185 = vmatprep.subr.mxu0 %v12050_v5 }
 0x10c   : > { %9305 = vmatprep.subr.mxu1 %v12055_v6 }
 0x10e   : > { %9186 = vmatpush3.msra.mxu0 %v12050_v5 }
 0x10f   : > { %9306 = vmatpush3.msra.mxu1 %v12055_v6  ;;  %10172 = vmatprep.subr.bf16.mxu0 %v12083_v24 }
 0x110   : > { %10252 = vmatprep.subr.bf16.mxu1 %v12085_v28 }
 0x11b   : > { %v11943_v8 = vpop.f32.mrb[0].mxu0 }
 0x11c   : > { %v8652_v9 = vpop.f32.mrb[0].mxu1  ;;  %v11945_v12 = vpop.f32.mrb[1].mxu0 }
 0x11d   : > { %v1614_v17 = vmax.f32 %v11943_v8, %v8652_v9  ;;  %v11948_v18 = vpop.f32.mrb[1].mxu1 }
 0x11e   : > { %v1613_v22 = vmax.f32 %v11945_v12, %v11948_v18 }
 0x11f   : > { %v11961_v30 = vpop.f32.mrb[2].mxu0 }
 0x120   : > { %v11974_v39 = vpop.f32.mrb[2].mxu1  ;;  %v11976_v40 = vpop.f32.mrb[3].mxu0 }
 0x121   : > { %v1616_v45 = vmax.f32 %v11961_v30, %v11974_v39  ;;  %v11990_v46 = vpop.f32.mrb[3].mxu1 }
 0x122   : > { %v1615_v48 = vmax.f32 %v11976_v40, %v11990_v46 }
 0x123   : > { %v11999_v49 = vpop.f32.mrb[4].mxu0 }
 0x124   : > { %v8658_v50 = vpop.f32.mrb[4].mxu1  ;;  %v1065_v51 = vpop.f32.mrb[5].mxu0 }
 0x125   : > { %v1618_v52 = vmax.f32 %v11999_v49, %v8658_v50  ;;  %v1598_v53 = vpop.f32.mrb[5].mxu1 }
 0x126   : > { %v1617_v54 = vmax.f32 %v1065_v51, %v1598_v53 }
 0x157   : > { %v8737_v4 = vpop.f32.mrb[6].mxu0 }
 0x158   : > { %v12060_v11 = vmax.f32 %v1614_v17, %v8737_v4  ;;  %v12062_v13 = vpop.f32.mrb[6].mxu1  ;;  %v2101_v14 = vpop.f32.mrb[7].mxu0 }
 0x159   : > { %v12078_v21 = vmax.f32 %v1613_v22, %v2101_v14  ;;  %v12080_v23 = vpop.f32.mrb[7].mxu1 }
 0x15a   : > { %v2636_v29 = vmax.f32 %v12060_v11, %v12062_v13 }
 0x15b   : > { %v2635_v31 = vmax.f32 %v12078_v21, %v12080_v23  ;;  %v8740_v32 = vpop.f32.mrb[8].mxu0  ;;  %v7643_v21 = vld [vmem:[%s13001_s3 + $0x190] sm:$0xff] }
 0x15c   : > { %v12094_v37 = vmax.f32 %v1616_v45, %v8740_v32  ;;  %v12096_v38 = vpop.f32.mrb[8].mxu1  ;;  %v2111_v19 = vpop.f32.mrb[9].mxu0 }
 0x15d   : > { %v12098_v3 = vmax.f32 %v1615_v48, %v2111_v19  ;;  %v12100_v7 = vpop.f32.mrb[9].mxu1 }
 0x15e   : > { %v2638_v8 = vmax.f32 %v12094_v37, %v12096_v38  ;;  %v7603_v38 = vld [vmem:[%s13001_s3 + $0xb0] sm:$0xff] }
 0x15f   : > { %v2637_v9 = vmax.f32 %v12098_v3, %v12100_v7  ;;  %v8743_v12 = vpop.f32.mrb[10].mxu0  ;;  %v7666_v7 = vld [vmem:[%s13001_s3 + $0x208] sm:$0xff] }
 0x160   : > { %v12106_v17 = vmax.f32 %v1618_v52, %v8743_v12  ;;  %v12108_v18 = vpop.f32.mrb[10].mxu1  ;;  %v2121_v22 = vpop.f32.mrb[11].mxu0  ;;  %v4712_v12 = vld [vmem:[%s13001_s3 + $0x10] sm:$0xff]  ;;  %v2651_v3 = vadd.f32 %v12121_v10, %v2638_v8 }
 0x161   : > { %v12110_v25 = vmax.f32 %v1617_v54, %v2121_v22  ;;  %v12112_v26 = vpop.f32.mrb[11].mxu1  ;;  %v4713_v22 = vld [vmem:[%s13001_s3 + $0x18] sm:$0xff] }
 0x163   : > { %v2639_v30 = vmax.f32 %v12110_v25, %v12112_v26  ;;  %v7680_v25 = vld [vmem:[%s13001_s3 + $0x258] sm:$0xff] }
 0x193   : > { %v8907_v34 = vpop.f32.mrb[12].mxu0 }
 0x194   : > { %v8992_v35 = vpop.f32.mrb[12].mxu1  ;;  %v3142_v36 = vpop.f32.mrb[13].mxu0 }
 0x195   : > { %v3671_v39 = vmax.f32 %v8907_v34, %v8992_v35  ;;  %v3635_v40 = vpop.f32.mrb[13].mxu1 }
 0x196   : > { %v3670_v43 = vmax.f32 %v3142_v36, %v3635_v40  ;;  %v7641_v40 = vld [vmem:[%s13001_s3 + $0x180] sm:$0xff] }
 0x197   : > { %v8910_v44 = vpop.f32.mrb[14].mxu0 }
 0x198   : > { %v8995_v45 = vpop.f32.mrb[14].mxu1  ;;  %v3152_v46 = vpop.f32.mrb[15].mxu0 }
 0x199   : > { %v3673_v48 = vmax.f32 %v8910_v44, %v8995_v45  ;;  %v3645_v49 = vpop.f32.mrb[15].mxu1 }
 0x19a   : > { %v3672_v50 = vmax.f32 %v3152_v46, %v3645_v49 }
 0x19b   : > { %v8913_v51 = vpop.f32.mrb[16].mxu0 }
 0x19c   : > { %v8998_v52 = vpop.f32.mrb[16].mxu1  ;;  %v3162_v53 = vpop.f32.mrb[17].mxu0 }
 0x19d   : > { %v3675_v54 = vmax.f32 %v8913_v51, %v8998_v52  ;;  %v3655_v55 = vpop.f32.mrb[17].mxu1 }
 0x19e   : > { %v3674_v56 = vmax.f32 %v3162_v53, %v3655_v55 }
 0x1cf   : > { %v9077_v57 = vpop.f32.mrb[18].mxu0 }
 0x1d0   : > { %v4194_v59 = vmax.f32 %v3671_v39, %v9077_v57  ;;  %v9162_v61 = vpop.f32.mrb[18].mxu1  ;;  %v4158_v62 = vpop.f32.mrb[19].mxu0  ;;  %v7640_v39 = vld [vmem:[%s13001_s3 + $0x178] sm:$0xff] }
 0x1d1   : > { %v4193_v63 = vmax.f32 %v3670_v43, %v4158_v62  ;;  %v4657_v1 = vpop.f32.mrb[19].mxu1  ;;  %v12148_v55 = vpack.c.bf16 %v7641_v40, %v7640_v39  ;;  %v2648_v62 = vadd.f32 %v12121_v10, %v2635_v31  ;;  %v7599_v39 = vld [vmem:[%s13001_s3 + $0x90] sm:$0xff]  ;;  %v7600_v40 = vld [vmem:[%s13001_s3 + $0x98] sm:$0xff] }
 0x1d2   : > { %v4693_v4 = vmax.f32 %v4194_v59, %v9162_v61  ;;  %v12263_v11 = vpack.c.bf16 %v7600_v40, %v7599_v39  ;;  %v7671_v39 = vld [vmem:[%s13001_s3 + $0x230] sm:$0xff] }
 0x1d3   : > { %v4692_v14 = vmax.f32 %v4193_v63, %v4657_v1  ;;  %v9080_v15 = vpop.f32.mrb[20].mxu0  ;;  %v4715_v63 = vld [vmem:[%s13001_s3 + $0x28] sm:$0xff] }
 0x1d4   : > { %v4699_v16 = vadd.f32 %v12121_v10, %v4693_v4  ;;  %v4196_v20 = vmax.f32 %v3673_v48, %v9080_v15  ;;  %v9165_v32 = vpop.f32.mrb[20].mxu1  ;;  %v4168_v19 = vpop.f32.mrb[21].mxu0  ;;  %v12139_v48 = vpack.c.bf16 %v4713_v22, %v4712_v12  ;;  %v7642_v1 = vld [vmem:[%s13001_s3 + $0x188] sm:$0xff]  ;;  %v2654_v12 = vmax.f32 %v2648_v62, 0.0  ;;  %v7604_v62 = vld [vmem:[%s13001_s3 + $0xb8] sm:$0xff] }
 0x1d5   : > { %v4698_v34 = vadd.f32 %v12121_v10, %v4692_v14  ;;  %v4195_v35 = vmax.f32 %v3672_v50, %v4168_v19  ;;  %v4667_v36 = vpop.f32.mrb[21].mxu1  ;;  %v4716_v14 = vld [vmem:[%s13001_s3 + $0x30] sm:$0xff]  ;;  %v7645_v19 = vld [vmem:[%s13001_s3 + $0x1a0] sm:$0xff] }
 0x1d6   : > { %v4695_v43 = vmax.f32 %v4196_v20, %v9165_v32  ;;  %v12141_v49 = vmax.f32 %v4699_v16, 0.0  ;;  %v12200_v16 = vpack.c.bf16 %v7643_v21, %v7642_v1  ;;  %v4717_v20 = vld [vmem:[%s13001_s3 + $0x38] sm:$0xff]  ;;  %v7669_v1 = vld [vmem:[%s13001_s3 + $0x220] sm:$0xff]  ;;  %v12311_v21 = vmax.f32 %v2651_v3, 0.0  ;;  %v7678_v3 = vld [vmem:[%s13001_s3 + $0x248] sm:$0xff] }
 0x1d7   : > { %v12137_v44 = vmax.f32 %v4698_v34, 0.0  ;;  %v4694_v45 = vmax.f32 %v4195_v35, %v4667_v36  ;;  %v9083_v46 = vpop.f32.mrb[22].mxu0  ;;  %v7644_v32 = vld [vmem:[%s13001_s3 + $0x198] sm:$0xff]  ;;  %v12219_v22 = vpack.c.bf16 %v4717_v20, %v4716_v14  ;;  %v12232_v35 = vld [vmem:[%s13001_s3 + $0x40] sm:$0xff]  ;;  %v12237_v36 = vld [vmem:[%s13001_s3 + $0x1a8] sm:$0xff]  ;;  %v12322_v14 = vpack.c.bf16 %v7604_v62, %v7603_v38 }
 0x1d8   : > { %v4701_v50 = vadd.f32 %v12121_v10, %v4695_v43  ;;  %v12144_v51 = vmax.f32 %v3675_v54, %v9083_v46  ;;  %v12146_v52 = vpop.f32.mrb[22].mxu1  ;;  %v4178_v53 = vpop.f32.mrb[23].mxu0  ;;  %v4714_v54 = vld [vmem:[%s13001_s3 + $0x20] sm:$0xff]  ;;  %v12221_v34 = vpack.c.bf16 %v7645_v19, %v7644_v32  ;;  %v2649_v43 = vadd.f32 %v12121_v10, %v2636_v29  ;;  %v7606_v19 = vld [vmem:[%s13001_s3 + $0xc8] sm:$0xff] }
 0x1d9   : > { %13018 = vst [vmem:[#allocation3_spill] sm:$0xff] %v12146_v52  ;;  %v4700_v57 = vadd.f32 %v12121_v10, %v4694_v45  ;;  %v12151_v59 = vmax.f32 %v3674_v56, %v4178_v53  ;;  %v12153_v61 = vpop.f32.mrb[23].mxu1  ;;  %9187 = vmatprep.mubr.msk.f32.mxu0 %vm4729_vm4, %v12137_v44  ;;  %9307 = vmatprep.mubr.msk.f32.mxu1 %vm4729_vm4, %v12137_v44  ;;  %v7664_v45 = vld [vmem:[%s13001_s3 + $0x1f8] sm:$0xff]  ;;  %v7665_v46 = vld [vmem:[%s13001_s3 + $0x200] sm:$0xff]  ;;  %v7602_v53 = vld [vmem:[%s13001_s3 + $0xa8] sm:$0xff] }
 0x1da   : > { %13017 = vst [vmem:[#allocation2_spill] sm:$0xff] %v12144_v51  ;;  %9188 = vmatmul.mubr.msk.f32.vlgmr.msra.gmra.mrb[24].mxu0 %vm4729_vm4, %v12141_v49  ;;  %9308 = vmatmul.mubr.msk.f32.vlgmr.msra.gmra.mrb[24].mxu1 %vm4729_vm4, %v12141_v49  ;;  %v12187_v4 = vmax.f32 %v4701_v50, 0.0  ;;  %v12198_v15 = vpack.c.bf16 %v4715_v63, %v4714_v54  ;;  %v2650_v50 = vadd.f32 %v12121_v10, %v2637_v9  ;;  %v7601_v29 = vld [vmem:[%s13001_s3 + $0xa0] sm:$0xff]  ;;  %v7667_v9 = vld [vmem:[%s13001_s3 + $0x210] sm:$0xff]  ;;  %v7668_v63 = vld [vmem:[%s13001_s3 + $0x218] sm:$0xff] }
 0x1db   : > { %v12181_v23 = vmax.f32 %v4700_v57, 0.0  ;;  %v4696_v31 = vmax.f32 %v12151_v59, %v12153_v61  ;;  %10174 = vmatpush3.bf16.msra.mxu0 %v12083_v24  ;;  %10254 = vmatpush3.bf16.msra.mxu1 %v12085_v28  ;;  %v12265_v13 = vpack.c.bf16 %v7665_v46, %v7664_v45  ;;  %v12273_v57 = vmax.f32 %v2649_v43, 0.0  ;;  %v7605_v32 = vld [vmem:[%s13001_s3 + $0xc0] sm:$0xff]  ;;  %v12360_v45 = vld [vmem:[%s13001_s3 + $0xd0] sm:$0xff]  ;;  %v12365_v46 = vld [vmem:[%s13001_s3 + $0x238] sm:$0xff] }
 0x1dc   : > { %10176 = vmatprep.subr.bf16.mxu0 %v12139_v48  ;;  %10256 = vmatprep.subr.bf16.mxu1 %v12148_v55  ;;  %v12287_v54 = vmax.f32 %v2650_v50, 0.0  ;;  %v12292_v37 = vpack.c.bf16 %v7602_v53, %v7601_v29  ;;  %v12300_v8 = vpack.c.bf16 %v7667_v9, %v7666_v7  ;;  %v12324_v20 = vpack.c.bf16 %v7669_v1, %v7668_v63  ;;  %v7612_v50 = vld [vmem:[%s13001_s3 + $0xd8] sm:$0xff]  ;;  %v7613_v29 = vld [vmem:[%s13001_s3 + $0xe0] sm:$0xff]  ;;  %v7614_v62 = vld [vmem:[%s13001_s3 + $0xe8] sm:$0xff] }
 0x1dd   : > { %9190 = vmatprep.mubr.msk.f32.mxu0 %vm4729_vm4, %v12181_v23  ;;  %9310 = vmatprep.mubr.msk.f32.mxu1 %vm4729_vm4, %v12181_v23  ;;  %v12347_v40 = vpack.c.bf16 %v7606_v19, %v7605_v32  ;;  %v7677_v53 = vld [vmem:[%s13001_s3 + $0x240] sm:$0xff]  ;;  %v12383_v7 = vpack.c.bf16 %v7613_v29, %v7612_v50  ;;  %v2652_v9 = vadd.f32 %v12121_v10, %v2639_v30  ;;  %v7615_v63 = vld [vmem:[%s13001_s3 + $0xf0] sm:$0xff]  ;;  %v7616_v30 = vld [vmem:[%s13001_s3 + $0xf8] sm:$0xff] }
 0x1de   : > { %9191 = vmatmul.mubr.msk.f32.gmra.mrb[26].mxu0 %vm4729_vm4, %v12187_v4  ;;  %9311 = vmatmul.mubr.msk.f32.gmra.mrb[26].mxu1 %vm4729_vm4, %v12187_v4  ;;  %v12389_v38 = vpack.c.bf16 %v7678_v3, %v7677_v53  ;;  %v7679_v1 = vld [vmem:[%s13001_s3 + $0x250] sm:$0xff]  ;;  %v12410_v26 = vpack.c.bf16 %v7615_v63, %v7614_v62  ;;  %v7617_v32 = vld [vmem:[%s13001_s3 + $0x100] sm:$0xff]  ;;  %v7682_v50 = vld [vmem:[%s13001_s3 + $0x268] sm:$0xff] }
 0x1df   : > { %10178 = vmatpush3.bf16.msra.mxu0 %v12139_v48  ;;  %10258 = vmatpush3.bf16.msra.mxu1 %v12148_v55  ;;  %v12418_v19 = vmax.f32 %v2652_v9, 0.0  ;;  %v12437_v29 = vpack.c.bf16 %v7617_v32, %v7616_v30  ;;  %v7618_v3 = vld [vmem:[%s13001_s3 + $0x108] sm:$0xff]  ;;  %v7619_v9 = vld [vmem:[%s13001_s3 + $0x110] sm:$0xff]  ;;  %v7684_v63 = vld [vmem:[%s13001_s3 + $0x278] sm:$0xff] }
 0x1e0   : > { %9211 = vmatprep.mubr.msk.f32.mxu0 %vm4729_vm4, %v2654_v12  ;;  %9331 = vmatprep.mubr.msk.f32.mxu1 %vm4729_vm4, %v2654_v12  ;;  %v7670_v12 = vld [vmem:[%s13001_s3 + $0x228] sm:$0xff]  ;;  %v7683_v62 = vld [vmem:[%s13001_s3 + $0x270] sm:$0xff]  ;;  %v12476_v30 = vld [vmem:[%s13001_s3 + $0x118] sm:$0xff] }
 0x1e1   : > { %10180 = vmatprep.subr.bf16.mxu0 %v12198_v15  ;;  %10260 = vmatprep.subr.bf16.mxu1 %v12200_v16  ;;  %v12351_v43 = vpack.c.bf16 %v7671_v39, %v7670_v12  ;;  %v12423_v12 = vpack.c.bf16 %v7680_v25, %v7679_v1  ;;  %v7681_v39 = vld [vmem:[%s13001_s3 + $0x260] sm:$0xff]  ;;  %v12464_v1 = vpack.c.bf16 %v7619_v9, %v7618_v3  ;;  %v7690_v3 = vld [vmem:[%s13001_s3 + $0x288] sm:$0xff]  ;;  %v7691_v9 = vld [vmem:[%s13001_s3 + $0x290] sm:$0xff] }
 0x1e2   : > { %v12442_v53 = vpack.c.bf16 %v7682_v50, %v7681_v39  ;;  %v12467_v25 = vpack.c.bf16 %v7684_v63, %v7683_v62  ;;  %v12481_v32 = vld [vmem:[%s13001_s3 + $0x280] sm:$0xff]  ;;  %v7626_v50 = vld [vmem:[%s13001_s3 + $0x128] sm:$0xff]  ;;  %v4702_v63 = vadd.f32 %v12121_v10, %v4696_v31  ;;  %v12505_v56 = vpack.c.bf16 %v7691_v9, %v7690_v3  ;;  %v7628_v52 = vld [vmem:[%s13001_s3 + $0x138] sm:$0xff] }
 0x1e3   : > { %10182 = vmatpush3.bf16.msra.mxu0 %v12198_v15  ;;  %10262 = vmatpush3.bf16.msra.mxu1 %v12200_v16  ;;  %v7625_v39 = vld [vmem:[%s13001_s3 + $0x120] sm:$0xff]  ;;  %v12526_v61 = vpack.c.bf16 %v7628_v52, %v7627_v27  ;;  %v7694_v27 = vld [vmem:[%s13001_s3 + $0x2a8] sm:$0xff]  ;;  %v7695_v52 = vld [vmem:[%s13001_s3 + $0x2b0] sm:$0xff] }
 0x1e4   : > { %10184 = vmatprep.subr.bf16.mxu0 %v12219_v22  ;;  %10264 = vmatprep.subr.bf16.mxu1 %v12221_v34  ;;  %v12499_v62 = vpack.c.bf16 %v7626_v50, %v7625_v39  ;;  %v7692_v39 = vld [vmem:[%s13001_s3 + $0x298] sm:$0xff]  ;;  %v7693_v59 = vld [vmem:[%s13001_s3 + $0x2a0] sm:$0xff]  ;;  %v7630_v50 = vld [vmem:[%s13001_s3 + $0x148] sm:$0xff]  ;;  %v12534_v3 = vmax.f32 %v4702_v63, 0.0 }
 0x1e5   : > { %v7629_v31 = vld [vmem:[%s13001_s3 + $0x140] sm:$0xff]  ;;  %v12539_v9 = vpack.c.bf16 %v7693_v59, %v7692_v39  ;;  %v12558_v39 = vpack.c.bf16 %v7695_v52, %v7694_v27  ;;  %v7631_v59 = vld [vmem:[%s13001_s3 + $0x150] sm:$0xff]  ;;  %v7632_v51 = vld [vmem:[%s13001_s3 + $0x158] sm:$0xff] }
 0x1e6   : > { %v12553_v63 = vpack.c.bf16 %v7630_v50, %v7629_v31  ;;  %v7696_v31 = vld [vmem:[%s13001_s3 + $0x2b8] sm:$0xff]  ;;  %v7697_v50 = vld [vmem:[%s13001_s3 + $0x2c0] sm:$0xff]  ;;  %v12580_v27 = vpack.c.bf16 %v7632_v51, %v7631_v59  ;;  %v12597_v51 = vld [vmem:[%s13001_s3 + $0x2c8] sm:$0xff]  ;;  %v13020_v59 = vmax.f32 %v12106_v17, %v12108_v18 }
 0x1e7   : > { %10186 = vmatpush3.bf16.msra.mxu0 %v12219_v22  ;;  %10266 = vmatpush3.bf16.msra.mxu1 %v12221_v34  ;;  %13019 = vst [vmem:[#allocation4_spill] sm:$0xff] %v12539_v9  ;;  %v12583_v52 = vpack.c.bf16 %v7697_v50, %v7696_v31  ;;  %v7747_v17 = vld [vmem:[%s13003_s5 + $0x58] sm:$0xff]  ;;  %v6623_v18 = vld [vmem:[%s13003_s5 + $0x10] sm:$0xff] }
 0x1e8   : > { %9209 = vmatprep.subr.mxu0 %v12232_v35  ;;  %9329 = vmatprep.subr.mxu1 %v12237_v36  ;;  %v2653_v31 = vadd.f32 %v12121_v10, %v13020_v59 }
 0x1ea   : > { %v12614_v50 = vmax.f32 %v2653_v31, 0.0 }
 0x1eb   : > { %9210 = vmatpush3.msra.mxu0 %v12232_v35  ;;  %9330 = vmatpush3.msra.mxu1 %v12237_v36 }
 0x1ec   : > { %9212 = vmatmul.mubr.msk.f32.vlgmr.msra.gmra.mrb[24].mxu0 %vm4729_vm4, %v12273_v57  ;;  %10188 = vmatprep.subr.bf16.mxu0 %v12263_v11 }
 0x1ed   : > { %9332 = vmatmul.mubr.msk.f32.vlgmr.msra.gmra.mrb[24].mxu1 %vm4729_vm4, %v12273_v57  ;;  %10268 = vmatprep.subr.bf16.mxu1 %v12265_v13 }
 0x1ee   : > { %9214 = vmatprep.mubr.msk.f32.mxu0 %vm4729_vm4, %v12287_v54  ;;  %10190 = vmatpush3.bf16.msra.mxu0 %v12263_v11 }
 0x1ef   : > { %9334 = vmatprep.mubr.msk.f32.mxu1 %vm4729_vm4, %v12287_v54  ;;  %10270 = vmatpush3.bf16.msra.mxu1 %v12265_v13 }
 0x1f0   : > { %9215 = vmatmul.mubr.msk.f32.gmra.mrb[26].mxu0 %vm4729_vm4, %v12311_v21  ;;  %10192 = vmatprep.subr.bf16.mxu0 %v12292_v37 }
 0x1f1   : > { %9335 = vmatmul.mubr.msk.f32.gmra.mrb[26].mxu1 %vm4729_vm4, %v12311_v21  ;;  %10272 = vmatprep.subr.bf16.mxu1 %v12300_v8 }
 0x1f2   : > { %10194 = vmatpush3.bf16.msra.mxu0 %v12292_v37  ;;  %9235 = vmatprep.mubr.msk.f32.mxu0 %vm4729_vm4, %v12273_v57 }
 0x1f3   : > { %10274 = vmatpush3.bf16.msra.mxu1 %v12300_v8  ;;  %9355 = vmatprep.mubr.msk.f32.mxu1 %vm4729_vm4, %v12273_v57 }
 0x1f4   : > { %10196 = vmatprep.subr.bf16.mxu0 %v12322_v14  ;;  %10276 = vmatprep.subr.bf16.mxu1 %v12324_v20 }
 0x1f6   : > { %10198 = vmatpush3.bf16.msra.mxu0 %v12322_v14 }
 0x1f7   : > { %10278 = vmatpush3.bf16.msra.mxu1 %v12324_v20  ;;  %10200 = vmatprep.subr.bf16.mxu0 %v12347_v40 }
 0x1f8   : > { %10280 = vmatprep.subr.bf16.mxu1 %v12351_v43 }
 0x1fa   : > { %10202 = vmatpush3.bf16.msra.mxu0 %v12347_v40 }
 0x1fb   : > { %10282 = vmatpush3.bf16.msra.mxu1 %v12351_v43  ;;  %9233 = vmatprep.subr.mxu0 %v12360_v45 }
 0x1fc   : > { %9353 = vmatprep.subr.mxu1 %v12365_v46 }
 0x1fe   : > { %9234 = vmatpush3.msra.mxu0 %v12360_v45 }
 0x1ff   : > { %9354 = vmatpush3.msra.mxu1 %v12365_v46  ;;  %9236 = vmatmul.mubr.msk.f32.vlgmr.msra.gmra.mrb[24].mxu0 %vm4729_vm4, %v12287_v54 }
 0x200   : > { %10204 = vmatprep.subr.bf16.mxu0 %v12383_v7  ;;  %9356 = vmatmul.mubr.msk.f32.vlgmr.msra.gmra.mrb[24].mxu1 %vm4729_vm4, %v12287_v54 }
 0x201   : > { %10284 = vmatprep.subr.bf16.mxu1 %v12389_v38  ;;  %9238 = vmatprep.mubr.msk.f32.mxu0 %vm4729_vm4, %v12311_v21 }
 0x202   : > { %10206 = vmatpush3.bf16.msra.mxu0 %v12383_v7  ;;  %9358 = vmatprep.mubr.msk.f32.mxu1 %vm4729_vm4, %v12311_v21 }
 0x203   : > { %10286 = vmatpush3.bf16.msra.mxu1 %v12389_v38  ;;  %9239 = vmatmul.mubr.msk.f32.gmra.mrb[26].mxu0 %vm4729_vm4, %v12418_v19 }
 0x204   : > { %10208 = vmatprep.subr.bf16.mxu0 %v12410_v26  ;;  %9359 = vmatmul.mubr.msk.f32.gmra.mrb[26].mxu1 %vm4729_vm4, %v12418_v19 }
 0x205   : > { %10288 = vmatprep.subr.bf16.mxu1 %v12423_v12  ;;  %9259 = vmatprep.mubr.msk.f32.mxu0 %vm4729_vm4, %v12141_v49 }
 0x206   : > { %10210 = vmatpush3.bf16.msra.mxu0 %v12410_v26  ;;  %9379 = vmatprep.mubr.msk.f32.mxu1 %vm4729_vm4, %v12141_v49 }
 0x207   : > { %10290 = vmatpush3.bf16.msra.mxu1 %v12423_v12  ;;  %10212 = vmatprep.subr.bf16.mxu0 %v12437_v29 }
 0x208   : > { %10292 = vmatprep.subr.bf16.mxu1 %v12442_v53 }
 0x20a   : > { %10214 = vmatpush3.bf16.msra.mxu0 %v12437_v29 }
 0x20b   : > { %10294 = vmatpush3.bf16.msra.mxu1 %v12442_v53  ;;  %10216 = vmatprep.subr.bf16.mxu0 %v12464_v1 }
 0x20c   : > { %10296 = vmatprep.subr.bf16.mxu1 %v12467_v25 }
 0x20e   : > { %10218 = vmatpush3.bf16.msra.mxu0 %v12464_v1 }
 0x20f   : > { %10298 = vmatpush3.bf16.msra.mxu1 %v12467_v25  ;;  %9257 = vmatprep.subr.mxu0 %v12476_v30 }
 0x210   : > { %9377 = vmatprep.subr.mxu1 %v12481_v32 }
 0x212   : > { %9258 = vmatpush3.msra.mxu0 %v12476_v30 }
 0x213   : > { %9378 = vmatpush3.msra.mxu1 %v12481_v32  ;;  %9260 = vmatmul.mubr.msk.f32.vlgmr.msra.gmra.mrb[24].mxu0 %vm4729_vm4, %v12181_v23 }
 0x214   : > { %10220 = vmatprep.subr.bf16.mxu0 %v12499_v62  ;;  %9380 = vmatmul.mubr.msk.f32.vlgmr.msra.gmra.mrb[24].mxu1 %vm4729_vm4, %v12181_v23 }
 0x215   : > { %10300 = vmatprep.subr.bf16.mxu1 %v12505_v56  ;;  %9262 = vmatprep.mubr.msk.f32.mxu0 %vm4729_vm4, %v12187_v4 }
 0x216   : > { %10222 = vmatpush3.bf16.msra.mxu0 %v12499_v62  ;;  %9382 = vmatprep.mubr.msk.f32.mxu1 %vm4729_vm4, %v12187_v4 }
 0x217   : > { %10302 = vmatpush3.bf16.msra.mxu1 %v12505_v56  ;;  %9263 = vmatmul.mubr.msk.f32.gmra.mrb[26].mxu0 %vm4729_vm4, %v12534_v3 }
 0x218   : > { %10224 = vmatprep.subr.bf16.mxu0 %v12526_v61  ;;  %9383 = vmatmul.mubr.msk.f32.gmra.mrb[26].mxu1 %vm4729_vm4, %v12534_v3 }
 0x219   : > { %10304 = vmatprep.subr.bf16.mxu1 %v12539_v9  ;;  %9283 = vmatprep.mubr.msk.f32.mxu0 %vm4729_vm4, %v12287_v54 }
 0x21a   : > { %10226 = vmatpush3.bf16.msra.mxu0 %v12526_v61  ;;  %9403 = vmatprep.mubr.msk.f32.mxu1 %vm4729_vm4, %v12287_v54 }
 0x21b   : > { %10306 = vmatpush3.bf16.msra.mxu1 %v12539_v9  ;;  %10228 = vmatprep.subr.bf16.mxu0 %v12553_v63  ;;  %v12592_v9 = vld [vmem:[%s13001_s3 + $0x160] sm:$0xff] }
 0x21c   : > { %10308 = vmatprep.subr.bf16.mxu1 %v12558_v39 }
 0x21e   : > { %10230 = vmatpush3.bf16.msra.mxu0 %v12553_v63 }
 0x21f   : > { %10310 = vmatpush3.bf16.msra.mxu1 %v12558_v39  ;;  %10232 = vmatprep.subr.bf16.mxu0 %v12580_v27 }
 0x220   : > { %10312 = vmatprep.subr.bf16.mxu1 %v12583_v52 }
 0x222   : > { %10234 = vmatpush3.bf16.msra.mxu0 %v12580_v27 }
 0x223   : > { %10314 = vmatpush3.bf16.msra.mxu1 %v12583_v52  ;;  %9281 = vmatprep.subr.mxu0 %v12592_v9 }
 0x224   : > { %9401 = vmatprep.subr.mxu1 %v12597_v51 }
 0x226   : > { %9282 = vmatpush3.msra.mxu0 %v12592_v9 }
 0x227   : > { %9402 = vmatpush3.msra.mxu1 %v12597_v51  ;;  %9284 = vmatmul.mubr.msk.f32.vlgmr.msra.gmra.mrb[24].mxu0 %vm4729_vm4, %v12311_v21 }
 0x228   : > { %9404 = vmatmul.mubr.msk.f32.vlgmr.msra.gmra.mrb[24].mxu1 %vm4729_vm4, %v12311_v21  ;;  %10316 = vmatprep.subr.bf16.mxu0 %v11963_v33 }
 0x229   : > { %10396 = vmatprep.subr.bf16.mxu1 %v11978_v41  ;;  %9286 = vmatprep.mubr.msk.f32.mxu0 %vm4729_vm4, %v12418_v19 }
 0x22a   : > { %9406 = vmatprep.mubr.msk.f32.mxu1 %vm4729_vm4, %v12418_v19  ;;  %10318 = vmatpush3.bf16.msra.mxu0 %v11963_v33  ;;  %v13021_v33 = vld [vmem:[#allocation4_spill] sm:$0xff] }
 0x22b   : > { %10398 = vmatpush3.bf16.msra.mxu1 %v11978_v41  ;;  %9287 = vmatmul.mubr.msk.f32.gmra.mrb[26].mxu0 %vm4729_vm4, %v12614_v50  ;;  %v7744_v41 = vld [vmem:[%s13003_s5 + $0x40] sm:$0xff] }
 0x22c   : > { %9407 = vmatmul.mubr.msk.f32.gmra.mrb[26].mxu1 %vm4729_vm4, %v12614_v50  ;;  %10320 = vmatprep.subr.bf16.mxu0 %v11980_v42 }
 0x22d   : > { %10400 = vmatprep.subr.bf16.mxu1 %v11993_v47  ;;  %9427 = vmatprep.mubr.msk.f32.mxu0 %vm4729_vm4, %v12273_v57 }
 0x22e   : > { %10322 = vmatpush3.bf16.msra.mxu0 %v11980_v42  ;;  %9547 = vmatprep.mubr.msk.f32.mxu1 %vm4729_vm4, %v12273_v57  ;;  %v7745_v42 = vld [vmem:[%s13003_s5 + $0x48] sm:$0xff] }
 0x22f   : > { %10402 = vmatpush3.bf16.msra.mxu1 %v11993_v47  ;;  %10324 = vmatprep.subr.bf16.mxu0 %v12016_v58  ;;  %v6621_v47 = vld [vmem:[%s13003_s5] sm:$0xff] }
 0x230   : > { %10404 = vmatprep.subr.bf16.mxu1 %v12021_v60 }
 0x232   : > { %10326 = vmatpush3.bf16.msra.mxu0 %v12016_v58  ;;  %v6622_v58 = vld [vmem:[%s13003_s5 + $0x8] sm:$0xff] }
 0x233   : > { %10406 = vmatpush3.bf16.msra.mxu1 %v12021_v60  ;;  %10328 = vmatprep.subr.bf16.mxu0 %v12036_v0  ;;  %v13022_v60 = vld [vmem:[#allocation2_spill] sm:$0xff] }
 0x234   : > { %10408 = vmatprep.subr.bf16.mxu1 %v12041_v2 }
 0x236   : > { %10330 = vmatpush3.bf16.msra.mxu0 %v12036_v0  ;;  %v13023_v0 = vld [vmem:[#allocation3_spill] sm:$0xff] }
 0x237   : > { %10410 = vmatpush3.bf16.msra.mxu1 %v12041_v2  ;;  %9425 = vmatprep.subr.mxu0 %v12050_v5  ;;  %v13024_v2 = vmax.f32 %v13022_v60, %v13023_v0  ;;  %v7756_v60 = vld [vmem:[%s13003_s5 + $0x90] sm:$0xff]  ;;  %v7757_v0 = vld [vmem:[%s13003_s5 + $0x98] sm:$0xff] }
 0x238   : > { %9545 = vmatprep.subr.mxu1 %v12055_v6 }
 0x23a   : > { %9426 = vmatpush3.msra.mxu0 %v12050_v5  ;;  %v4703_v5 = vadd.f32 %v12121_v10, %v13024_v2  ;;  %v6624_v10 = vld [vmem:[%s13003_s5 + $0x18] sm:$0xff] }
 0x23b   : > { %9546 = vmatpush3.msra.mxu1 %v12055_v6  ;;  %9428 = vmatmul.mubr.msk.f32.vlgmr.msra.gmra.mrb[28].mxu0 %vm4729_vm4, %v12287_v54  ;;  %v10476_v6 = vpack.c.bf16 %v7745_v42, %v7744_v41 }
 0x23c   : > { %10332 = vmatprep.subr.bf16.mxu0 %v12083_v24  ;;  %9548 = vmatmul.mubr.msk.f32.vlgmr.msra.gmra.mrb[28].mxu1 %vm4729_vm4, %v12287_v54 }
 0x23d   : > { %10412 = vmatprep.subr.bf16.mxu1 %v12085_v28  ;;  %9430 = vmatprep.mubr.msk.f32.mxu0 %vm4729_vm4, %v12311_v21 }
 0x23e   : > { %10334 = vmatpush3.bf16.msra.mxu0 %v12083_v24  ;;  %9550 = vmatprep.mubr.msk.f32.mxu1 %vm4729_vm4, %v12311_v21  ;;  %v10488_v24 = vpack.c.bf16 %v6622_v58, %v6621_v47 }
 0x23f   : > { %10414 = vmatpush3.bf16.msra.mxu1 %v12085_v28  ;;  %9431 = vmatmul.mubr.msk.f32.gmra.mrb[30].mxu0 %vm4729_vm4, %v12418_v19  ;;  %v7746_v28 = vld [vmem:[%s13003_s5 + $0x50] sm:$0xff] }
 0x240   : > { %10336 = vmatprep.subr.bf16.mxu0 %v12139_v48  ;;  %9551 = vmatmul.mubr.msk.f32.gmra.mrb[30].mxu1 %vm4729_vm4, %v12418_v19 }
 0x241   : > { %10416 = vmatprep.subr.bf16.mxu1 %v12148_v55  ;;  %9451 = vmatprep.mubr.msk.f32.mxu0 %vm4729_vm4, %v12137_v44 }
 0x242   : > { %10338 = vmatpush3.bf16.msra.mxu0 %v12139_v48  ;;  %9571 = vmatprep.mubr.msk.f32.mxu1 %vm4729_vm4, %v12137_v44  ;;  %v4709_v44 = vmax.f32 %v4703_v5, 0.0  ;;  %v10819_v48 = vmov 0.0|0.0  }
 0x243   : > { %10418 = vmatpush3.bf16.msra.mxu1 %v12148_v55  ;;  %10340 = vmatprep.subr.bf16.mxu0 %v12198_v15  ;;  %v10491_v55 = vpack.c.bf16 %v6624_v10, %v6623_v18  ;;  %v7758_v18 = vld [vmem:[%s13003_s5 + $0xa0] sm:$0xff]  ;;  %v7759_v10 = vld [vmem:[%s13003_s5 + $0xa8] sm:$0xff] }
 0x244   : > { %10420 = vmatprep.subr.bf16.mxu1 %v12200_v16 }
 0x246   : > { %10342 = vmatpush3.bf16.msra.mxu0 %v12198_v15  ;;  %v6625_v15 = vld [vmem:[%s13003_s5 + $0x20] sm:$0xff] }
 0x247   : > { %10422 = vmatpush3.bf16.msra.mxu1 %v12200_v16  ;;  %10344 = vmatprep.subr.bf16.mxu0 %v12219_v22  ;;  %v6626_v16 = vld [vmem:[%s13003_s5 + $0x28] sm:$0xff] }
 0x248   : > { %10424 = vmatprep.subr.bf16.mxu1 %v12221_v34 }
 0x24a   : > { %10346 = vmatpush3.bf16.msra.mxu0 %v12219_v22  ;;  %v10494_v22 = vpack.c.bf16 %v6626_v16, %v6625_v15  ;;  %v7769_v15 = vld [vmem:[%s13003_s5 + $0xf0] sm:$0xff]  ;;  %v7770_v16 = vld [vmem:[%s13003_s5 + $0xf8] sm:$0xff] }
 0x24b   : > { %10426 = vmatpush3.bf16.msra.mxu1 %v12221_v34  ;;  %9449 = vmatprep.subr.mxu0 %v12232_v35  ;;  %v7750_v34 = vld [vmem:[%s13003_s5 + $0x70] sm:$0xff] }
 0x24c   : > { %9569 = vmatprep.subr.mxu1 %v12237_v36 }
 0x24e   : > { %9450 = vmatpush3.msra.mxu0 %v12232_v35  ;;  %v7751_v35 = vld [vmem:[%s13003_s5 + $0x78] sm:$0xff] }
 0x24f   : > { %9570 = vmatpush3.msra.mxu1 %v12237_v36  ;;  %9452 = vmatmul.mubr.msk.f32.vlgmr.msra.gmra.mrb[28].mxu0 %vm4729_vm4, %v12141_v49  ;;  %v10485_v36 = vpack.c.bf16 %v7751_v35, %v7750_v34  ;;  %v10521_v35 = vpack.c.bf16 %v7770_v16, %v7769_v15 }
 0x250   : > { %10348 = vmatprep.subr.bf16.mxu0 %v12263_v11  ;;  %9572 = vmatmul.mubr.msk.f32.vlgmr.msra.gmra.mrb[28].mxu1 %vm4729_vm4, %v12141_v49 }
 0x251   : > { %10428 = vmatprep.subr.bf16.mxu1 %v12265_v13  ;;  %9454 = vmatprep.mubr.msk.f32.mxu0 %vm4729_vm4, %v12181_v23 }
 0x252   : > { %10350 = vmatpush3.bf16.msra.mxu0 %v12263_v11  ;;  %9574 = vmatprep.mubr.msk.f32.mxu1 %vm4729_vm4, %v12181_v23  ;;  %v6627_v11 = vld [vmem:[%s13003_s5 + $0x30] sm:$0xff] }
 0x253   : > { %10430 = vmatpush3.bf16.msra.mxu1 %v12265_v13  ;;  %9455 = vmatmul.mubr.msk.f32.gmra.mrb[30].mxu0 %vm4729_vm4, %v12187_v4  ;;  %v6628_v13 = vld [vmem:[%s13003_s5 + $0x38] sm:$0xff] }
 0x254   : > { %10352 = vmatprep.subr.bf16.mxu0 %v12292_v37  ;;  %9575 = vmatmul.mubr.msk.f32.gmra.mrb[30].mxu1 %vm4729_vm4, %v12187_v4  ;;  %v10497_v57 = vpack.c.bf16 %v6628_v13, %v6627_v11 }
 0x255   : > { %10432 = vmatprep.subr.bf16.mxu1 %v12300_v8  ;;  %9475 = vmatprep.mubr.msk.f32.mxu0 %vm4729_vm4, %v12141_v49 }
 0x256   : > { %10354 = vmatpush3.bf16.msra.mxu0 %v12292_v37  ;;  %9595 = vmatprep.mubr.msk.f32.mxu1 %vm4729_vm4, %v12141_v49  ;;  %v10479_v49 = vpack.c.bf16 %v7747_v17, %v7746_v28  ;;  %v10503_v28 = vpack.c.bf16 %v7757_v0, %v7756_v60 }
 0x257   : > { %10434 = vmatpush3.bf16.msra.mxu1 %v12300_v8  ;;  %10356 = vmatprep.subr.bf16.mxu0 %v12322_v14 }
 0x258   : > { %10436 = vmatprep.subr.bf16.mxu1 %v12324_v20 }
 0x25a   : > { %10358 = vmatpush3.bf16.msra.mxu0 %v12322_v14 }
 0x25b   : > { %10438 = vmatpush3.bf16.msra.mxu1 %v12324_v20  ;;  %10360 = vmatprep.subr.bf16.mxu0 %v12347_v40 }
 0x25c   : > { %10440 = vmatprep.subr.bf16.mxu1 %v12351_v43 }
 0x25e   : > { %10362 = vmatpush3.bf16.msra.mxu0 %v12347_v40 }
 0x25f   : > { %10442 = vmatpush3.bf16.msra.mxu1 %v12351_v43  ;;  %9473 = vmatprep.subr.mxu0 %v12360_v45 }
 0x260   : > { %9593 = vmatprep.subr.mxu1 %v12365_v46 }
 0x262   : > { %9474 = vmatpush3.msra.mxu0 %v12360_v45 }
 0x263   : > { %9594 = vmatpush3.msra.mxu1 %v12365_v46  ;;  %9476 = vmatmul.mubr.msk.f32.vlgmr.msra.gmra.mrb[28].mxu0 %vm4729_vm4, %v12181_v23 }
 0x264   : > { %10364 = vmatprep.subr.bf16.mxu0 %v12383_v7  ;;  %9596 = vmatmul.mubr.msk.f32.vlgmr.msra.gmra.mrb[28].mxu1 %vm4729_vm4, %v12181_v23 }
 0x265   : > { %10444 = vmatprep.subr.bf16.mxu1 %v12389_v38  ;;  %9478 = vmatprep.mubr.msk.f32.mxu0 %vm4729_vm4, %v12187_v4 }
 0x266   : > { %10366 = vmatpush3.bf16.msra.mxu0 %v12383_v7  ;;  %9598 = vmatprep.mubr.msk.f32.mxu1 %vm4729_vm4, %v12187_v4 }
 0x267   : > { %10446 = vmatpush3.bf16.msra.mxu1 %v12389_v38  ;;  %9479 = vmatmul.mubr.msk.f32.gmra.mrb[30].mxu0 %vm4729_vm4, %v12534_v3 }
 0x268   : > { %10368 = vmatprep.subr.bf16.mxu0 %v12410_v26  ;;  %9599 = vmatmul.mubr.msk.f32.gmra.mrb[30].mxu1 %vm4729_vm4, %v12534_v3 }
 0x269   : > { %10448 = vmatprep.subr.bf16.mxu1 %v12423_v12  ;;  %9499 = vmatprep.mubr.msk.f32.mxu0 %vm4729_vm4, %v12287_v54 }
 0x26a   : > { %10370 = vmatpush3.bf16.msra.mxu0 %v12410_v26  ;;  %9619 = vmatprep.mubr.msk.f32.mxu1 %vm4729_vm4, %v12287_v54  ;;  %v10821_v54 = vmov 0.0  }
 0x26b   : > { %10450 = vmatpush3.bf16.msra.mxu1 %v12423_v12  ;;  %10372 = vmatprep.subr.bf16.mxu0 %v12437_v29 }
 0x26c   : > { %10452 = vmatprep.subr.bf16.mxu1 %v12442_v53 }
 0x26e   : > { %10374 = vmatpush3.bf16.msra.mxu0 %v12437_v29 }
 0x26f   : > { %10454 = vmatpush3.bf16.msra.mxu1 %v12442_v53  ;;  %10376 = vmatprep.subr.bf16.mxu0 %v12464_v1 }
 0x270   : > { %10456 = vmatprep.subr.bf16.mxu1 %v12467_v25 }
 0x272   : > { %10378 = vmatpush3.bf16.msra.mxu0 %v12464_v1  ;;  %v7743_v1 = vld [vmem:[%s13002_s4] ss:$0 sm:$0xff] }
 0x273   : > { %10458 = vmatpush3.bf16.msra.mxu1 %v12467_v25  ;;  %9497 = vmatprep.subr.mxu0 %v12476_v30 }
 0x274   : > { %9617 = vmatprep.subr.mxu1 %v12481_v32 }
 0x276   : > { %9498 = vmatpush3.msra.mxu0 %v12476_v30 }
 0x277   : > { %9618 = vmatpush3.msra.mxu1 %v12481_v32  ;;  %9500 = vmatmul.mubr.msk.f32.vlgmr.msra.gmra.mrb[28].mxu0 %vm4729_vm4, %v12311_v21 }
 0x278   : > { %10380 = vmatprep.subr.bf16.mxu0 %v12499_v62  ;;  %9620 = vmatmul.mubr.msk.f32.vlgmr.msra.gmra.mrb[28].mxu1 %vm4729_vm4, %v12311_v21 }
 0x279   : > { %10460 = vmatprep.subr.bf16.mxu1 %v12505_v56  ;;  %9502 = vmatprep.mubr.msk.f32.mxu0 %vm4729_vm4, %v12418_v19 }
 0x27a   : > { %10382 = vmatpush3.bf16.msra.mxu0 %v12499_v62  ;;  %9622 = vmatprep.mubr.msk.f32.mxu1 %vm4729_vm4, %v12418_v19  ;;  %v7754_v62 = vld [vmem:[%s13003_s5 + $0x80] sm:$0xff] }
 0x27b   : > { %10462 = vmatpush3.bf16.msra.mxu1 %v12505_v56  ;;  %9503 = vmatmul.mubr.msk.f32.gmra.mrb[30].mxu0 %vm4729_vm4, %v12614_v50  ;;  %v7748_v56 = vld [vmem:[%s13003_s5 + $0x60] sm:$0xff] }
 0x27c   : > { %10384 = vmatprep.subr.bf16.mxu0 %v12526_v61  ;;  %9623 = vmatmul.mubr.msk.f32.gmra.mrb[30].mxu1 %vm4729_vm4, %v12614_v50 }
 0x27d   : > { %10464 = vmatprep.subr.bf16.mxu1 %v13021_v33  ;;  %9523 = vmatprep.mubr.msk.f32.mxu0 %vm4729_vm4, %v12181_v23 }
 0x27e   : > { %10386 = vmatpush3.bf16.msra.mxu0 %v12526_v61  ;;  %9643 = vmatprep.mubr.msk.f32.mxu1 %vm4729_vm4, %v12181_v23  ;;  %v7749_v23 = vld [vmem:[%s13003_s5 + $0x68] sm:$0xff] }
 0x27f   : > { %10466 = vmatpush3.bf16.msra.mxu1 %v13021_v33  ;;  %10388 = vmatprep.subr.bf16.mxu0 %v12553_v63  ;;  %v7755_v61 = vld [vmem:[%s13003_s5 + $0x88] sm:$0xff] }
 0x280   : > { %10468 = vmatprep.subr.bf16.mxu1 %v12558_v39  ;;  %v10500_v41 = vpack.c.bf16 %v7755_v61, %v7754_v62 }
 0x282   : > { %10390 = vmatpush3.bf16.msra.mxu0 %v12553_v63  ;;  %v7763_v63 = vld [vmem:[%s13003_s5 + $0xc0] sm:$0xff] }
 0x283   : > { %10470 = vmatpush3.bf16.msra.mxu1 %v12558_v39  ;;  %10392 = vmatprep.subr.bf16.mxu0 %v12580_v27  ;;  %v7764_v39 = vld [vmem:[%s13003_s5 + $0xc8] sm:$0xff] }
 0x284   : > { %10472 = vmatprep.subr.bf16.mxu1 %v12583_v52  ;;  %v10512_v58 = vpack.c.bf16 %v7764_v39, %v7763_v63 }
 0x286   : > { %10394 = vmatpush3.bf16.msra.mxu0 %v12580_v27 }
 0x287   : > { %10474 = vmatpush3.bf16.msra.mxu1 %v12583_v52  ;;  %9521 = vmatprep.subr.mxu0 %v12592_v9 }
 0x288   : > { %9641 = vmatprep.subr.mxu1 %v12597_v51 }
 0x28a   : > { %9522 = vmatpush3.msra.mxu0 %v12592_v9 }
 0x28b   : > { %9642 = vmatpush3.msra.mxu1 %v12597_v51  ;;  %9524 = vmatmul.mubr.msk.f32.vlgmr.msra.gmra.mrb[28].mxu0 %vm4729_vm4, %v12187_v4 }
 0x28c   : > { %9644 = vmatmul.mubr.msk.f32.vlgmr.msra.gmra.mrb[28].mxu1 %vm4729_vm4, %v12187_v4  ;;  %9526 = vmatprep.mubr.msk.f32.mxu0 %vm4729_vm4, %v12534_v3  ;;  %v10482_v4 = vpack.c.bf16 %v7749_v23, %v7748_v56  ;;  %v7760_v23 = vld [vmem:[%s13003_s5 + $0xb0] sm:$0xff] }
 0x28d   : > { %9646 = vmatprep.mubr.msk.f32.mxu1 %vm4729_vm4, %v12534_v3  ;;  %10475 = vmatprep.subr.bf16.mxu0 %v10819_v48 }
 0x28e   : > { %10477 = vmatpush3.bf16.msra.mxu0 %v10476_v6  ;;  %10487 = vmatprep.subr.bf16.mxu1 %v10819_v48  ;;  %v7765_v6 = vld [vmem:[%s13003_s5 + $0xd0] sm:$0xff] }
 0x28f   : > { %9527 = vmatmul.mubr.msk.f32.gmra.mrb[30].mxu0 %vm4729_vm4, %v4709_v44  ;;  %10489 = vmatpush3.bf16.msra.mxu1 %v10488_v24  ;;  %v7766_v24 = vld [vmem:[%s13003_s5 + $0xd8] sm:$0xff] }
 0x290   : > { %9647 = vmatmul.mubr.msk.f32.gmra.mrb[30].mxu1 %vm4729_vm4, %v4709_v44  ;;  %10478 = vmatprep.subr.bf16.mxu0 %v10819_v48  ;;  %v10515_v17 = vpack.c.bf16 %v7766_v24, %v7765_v6  ;;  %v7767_v44 = vld [vmem:[%s13003_s5 + $0xe0] sm:$0xff] }
 0x291   : > { %10490 = vmatprep.subr.bf16.mxu1 %v10819_v48  ;;  %9665 = vmatprep.mubr.msk.f32.mxu0 %vm10820_vm5, %v10821_v54 }
 0x292   : > { %10480 = vmatpush3.bf16.msra.mxu0 %v10479_v49  ;;  %9684 = vmatprep.mubr.msk.f32.mxu1 %vm10820_vm5, %v10821_v54  ;;  %v7768_v49 = vld [vmem:[%s13003_s5 + $0xe8] sm:$0xff] }
 0x293   : > { %10492 = vmatpush3.bf16.msra.mxu1 %v10491_v55  ;;  %10481 = vmatprep.subr.bf16.mxu0 %v10819_v48  ;;  %v10506_v55 = vpack.c.bf16 %v7759_v10, %v7758_v18  ;;  %v10518_v56 = vpack.c.bf16 %v7768_v49, %v7767_v44 }
 0x294   : > { %10493 = vmatprep.subr.bf16.mxu1 %v10819_v48 }
 0x296   : > { %10483 = vmatpush3.bf16.msra.mxu0 %v10482_v4  ;;  %v7761_v4 = vld [vmem:[%s13003_s5 + $0xb8] sm:$0xff] }
 0x297   : > { %10495 = vmatpush3.bf16.msra.mxu1 %v10494_v22  ;;  %10484 = vmatprep.subr.bf16.mxu0 %v10819_v48  ;;  %v10509_v22 = vpack.c.bf16 %v7761_v4, %v7760_v23 }
 0x298   : > { %10496 = vmatprep.subr.bf16.mxu1 %v10819_v48 }
 0x29a   : > { %10486 = vmatpush3.bf16.msra.mxu0 %v10485_v36 }
 0x29b   : > { %10498 = vmatpush3.bf16.msra.mxu1 %v10497_v57  ;;  %10499 = vmatprep.subr.bf16.mxu0 %v10819_v48  ;;  %v6960_v57 = vld [vmem:[%s13005_s7] sm:$0xff] }
 0x29c   : > { %10511 = vmatprep.subr.bf16.mxu1 %v10819_v48 }
 0x2fa   : > { %v9285_v37 = vpop.f32.mrb[24].mxu0 }
 0x2fb   : > { %v9405_v8 = vpop.f32.mrb[24].mxu1  ;;  %v5207_v21 = vpop.f32.mrb[25].mxu0 }
 0x2fc   : > { %v5718_v14 = vmax.f32 %v9285_v37, %v9405_v8  ;;  %v5694_v20 = vpop.f32.mrb[25].mxu1  ;;  %v6961_v37 = vld [vmem:[%s13005_s7 + $0x8] sm:$0xff]  ;;  %v6962_v8 = vld [vmem:[%s13005_s7 + $0x10] sm:$0xff] }
 0x2fd   : > { %v5717_v40 = vmax.f32 %v5207_v21, %v5694_v20  ;;  %v10524_v21 = vpack.c.bf16 %v6961_v37, %v6960_v57 }
 0x2fe   : > { %v9288_v43 = vpop.f32.mrb[26].mxu0 }
 0x2ff   : > { %v9408_v45 = vpop.f32.mrb[26].mxu1  ;;  %v5217_v46 = vpop.f32.mrb[27].mxu0 }
 0x300   : > { %v5720_v7 = vmax.f32 %v9288_v43, %v9408_v45  ;;  %v5704_v38 = vpop.f32.mrb[27].mxu1  ;;  %v6966_v45 = vld [vmem:[%s13005_s7 + $0x30] sm:$0xff] }
 0x301   : > { %v5719_v26 = vmax.f32 %v5217_v46, %v5704_v38  ;;  %v6967_v46 = vld [vmem:[%s13005_s7 + $0x38] sm:$0xff]  ;;  %v7049_v38 = vld [vmem:[%s13007_s9] sm:$0xff] }
 0x35e   : > { %v9525_v19 = vpop.f32.mrb[28].mxu0 }
 0x35f   : > { %v6162_v12 = vmax.f32 %v5718_v14, %v9525_v19  ;;  %v9645_v29 = vpop.f32.mrb[28].mxu1  ;;  %v6138_v53 = vpop.f32.mrb[29].mxu0  ;;  %v6963_v14 = vld [vmem:[%s13005_s7 + $0x18] sm:$0xff] }
 0x360   : > { %v6161_v25 = vmax.f32 %v5717_v40, %v6138_v53  ;;  %v6579_v30 = vpop.f32.mrb[29].mxu1  ;;  %v10527_v20 = vpack.c.bf16 %v6963_v14, %v6962_v8  ;;  %v6965_v40 = vld [vmem:[%s13005_s7 + $0x28] sm:$0xff] }
 0x361   : > { %v6603_v32 = vmax.f32 %v6162_v12, %v9645_v29 }
 0x362   : > { %v6602_v3 = vmax.f32 %v6161_v25, %v6579_v30  ;;  %v9528_v9 = vpop.f32.mrb[30].mxu0 }
 0x363   : > { %v6614_v27 = vadd.f32 %v7743_v1, %v6603_v32  ;;  %v6164_v52 = vmax.f32 %v5720_v7, %v9528_v9  ;;  %v9648_v51 = vpop.f32.mrb[30].mxu1  ;;  %v6148_v59 = vpop.f32.mrb[31].mxu0  ;;  %v10533_v7 = vpack.c.bf16 %v6967_v46, %v6966_v45 }
 0x364   : > { %v6613_v31 = vadd.f32 %v7743_v1, %v6602_v3  ;;  %v6163_v50 = vmax.f32 %v5719_v26, %v6148_v59  ;;  %v6589_v33 = vpop.f32.mrb[31].mxu1  ;;  %v7050_v26 = vld [vmem:[%s13007_s9 + $0x8] sm:$0xff]  ;;  %v7772_v3 = vld [vmem:[%s13004_s6] ss:$0 sm:$0xff] }
 0x365   : > { %v6618_v42 = vmax.f32 %v6614_v27, 0.0  ;;  %v6605_v47 = vmax.f32 %v6164_v52, %v9648_v51  ;;  %v10536_v19 = vpack.c.bf16 %v7050_v26, %v7049_v38  ;;  %v7052_v52 = vld [vmem:[%s13007_s9 + $0x18] sm:$0xff]  ;;  %v7773_v59 = vld [vmem:[%s13006_s8] ss:$0 sm:$0xff] }
 0x366   : > { %v6617_v2 = vmax.f32 %v6613_v31, 0.0  ;;  %v6604_v5 = vmax.f32 %v6163_v50, %v6589_v33 }
 0x367   : > { %9666 = vmatmul.mubr.msk.f32.vlgmr.msra.gmra.mrb[32].mxu0 %vm6638_vm6, %v6618_v42  ;;  %v6616_v36 = vadd.f32 %v7743_v1, %v6605_v47  ;;  %v7775_v42 = vld [vmem:[%s13008_s10] ss:$0 sm:$0xff] }
 0x368   : > { %10501 = vmatpush3.bf16.msra.mxu0 %v10500_v41  ;;  %9685 = vmatmul.mubr.msk.f32.vlgmr.msra.gmra.mrb[32].mxu1 %vm6638_vm6, %v6617_v2  ;;  %v6615_v34 = vadd.f32 %v7743_v1, %v6604_v5 }
 0x369   : > { %10513 = vmatpush3.bf16.msra.mxu1 %v10512_v58  ;;  %10502 = vmatprep.subr.bf16.mxu0 %v10819_v48  ;;  %v6620_v13 = vmax.f32 %v6616_v36, 0.0 }
 0x36a   : > { %10514 = vmatprep.subr.bf16.mxu1 %v10819_v48  ;;  %9703 = vmatprep.mubr.msk.f32.mxu0 %vm10820_vm5, %v10821_v54  ;;  %v6619_v11 = vmax.f32 %v6615_v34, 0.0 }
 0x36b   : > { %9722 = vmatprep.mubr.msk.f32.mxu1 %vm10820_vm5, %v10821_v54 }
 0x36c   : > { %10504 = vmatpush3.bf16.msra.mxu0 %v10503_v28 }
 0x36d   : > { %10516 = vmatpush3.bf16.msra.mxu1 %v10515_v17  ;;  %10505 = vmatprep.subr.bf16.mxu0 %v10819_v48 }
 0x36e   : > { %10517 = vmatprep.subr.bf16.mxu1 %v10819_v48 }
 0x370   : > { %10507 = vmatpush3.bf16.msra.mxu0 %v10506_v55 }
 0x371   : > { %10519 = vmatpush3.bf16.msra.mxu1 %v10518_v56  ;;  %10508 = vmatprep.subr.bf16.mxu0 %v10819_v48 }
 0x372   : > { %10520 = vmatprep.subr.bf16.mxu1 %v10819_v48 }
 0x374   : > { %10510 = vmatpush3.bf16.msra.mxu0 %v10509_v22 }
 0x375   : > { %10522 = vmatpush3.bf16.msra.mxu1 %v10521_v35  ;;  %10523 = vmatprep.subr.bf16.mxu0 %v10819_v48 }
 0x376   : > { %10535 = vmatprep.subr.bf16.mxu1 %v10819_v48 }
 0x377   : > { %9704 = vmatmul.mubr.msk.f32.vlgmr.msra.gmra.mrb[34].mxu0 %vm6638_vm6, %v6619_v11 }
 0x378   : > { %9723 = vmatmul.mubr.msk.f32.vlgmr.msra.gmra.mrb[34].mxu1 %vm6638_vm6, %v6620_v13  ;;  %9741 = vmatprep.mubr.msk.f32.mxu0 %vm10820_vm5, %v10821_v54 }
 0x379   : > { %9752 = vmatprep.mubr.msk.f32.mxu1 %vm10820_vm5, %v10821_v54  ;;  %10525 = vmatpush3.bf16.msra.mxu0 %v10524_v21  ;;  %v6964_v54 = vld [vmem:[%s13005_s7 + $0x20] sm:$0xff] }
 0x37a   : > { %10526 = vmatprep.subr.bf16.mxu0 %v10819_v48  ;;  %v10530_v43 = vpack.c.bf16 %v6965_v40, %v6964_v54  ;;  %10537 = vmatpush3.bf16.msra.mxu1 %v10536_v19 }
 0x37b   : > { %10538 = vmatprep.subr.bf16.mxu1 %v10819_v48 }
 0x37d   : > { %10528 = vmatpush3.bf16.msra.mxu0 %v10527_v20 }
 0x37e   : > { %10529 = vmatprep.subr.bf16.mxu0 %v10819_v48 }
 0x381   : > { %10531 = vmatpush3.bf16.msra.mxu0 %v10530_v43 }
 0x382   : > { %10532 = vmatprep.subr.bf16.mxu0 %v10819_v48  ;;  %v7051_v48 = vld [vmem:[%s13007_s9 + $0x10] sm:$0xff] }
 0x383   : > { %v10539_v51 = vpack.c.bf16 %v7052_v52, %v7051_v48 }
 0x385   : > { %10534 = vmatpush3.bf16.msra.mxu0 %v10533_v7  ;;  %10540 = vmatpush3.bf16.msra.mxu1 %v10539_v51 }
 0x43a   : > { %v6708_v12 = vpop.f32.mrb[32].mxu0 }
 0x43b   : > { %v9667_v29 = vpop.f32.mrb[33].mxu0  ;;  %v6781_v53 = vpop.f32.mrb[32].mxu1 }
 0x43c   : > { %v6782_v1 = vadd.f32 %v6781_v53, %v6708_v12  ;;  %v9686_v25 = vpop.f32.mrb[33].mxu1 }
 0x44a   : > { %v6863_v30 = vpop.f32.mrb[34].mxu0 }
 0x44b   : > { %v6867_v32 = vadd.f32 %v6863_v30, %v6782_v1  ;;  %v9705_v62 = vpop.f32.mrb[35].mxu0  ;;  %v6946_v61 = vpop.f32.mrb[34].mxu1 }
 0x44c   : > { %v9724_v9 = vpop.f32.mrb[35].mxu1 }
 0x44d   : > { %v6950_v63 = vadd.f32 %v6946_v61, %v6867_v32 }
 0x44f   : > { %v6958_v39 = vadd.f32 %v7772_v3, %v6950_v63 }
 0x451   : > { %v6959_v27 = vmax.f32 %v6958_v39, 0.0 }
 0x453   : > { %9742 = vmatmul.mubr.msk.f32.vlgmr.msra.gmra.mrb[36].mxu0 %vm6638_vm6, %v6959_v27 }
 0x526   : > { %v7044_v31 = vpop.f32.mrb[36].mxu0 }
 0x527   : > { %v7045_v50 = vadd.f32 %v7773_v59, %v7044_v31  ;;  %v9743_v33 = vpop.f32.mrb[37].mxu0 }
 0x529   : > { %v7048_v41 = vmax.f32 %v7045_v50, 0.0 }
 0x52b   : > { %7134 = vst.msk [vmem:[%s418_s19] sm:$0xff] %vm7060_vm7, %v7048_v41  ;;  %9753 = vmatmul.mubr.msk.f32.vlgmr.msra.gmra.mrb[36].mxu1 %vm7060_vm7, %v7048_v41 }
 0x5fe   : > { %v7130_v47 = vpop.f32.mrb[36].mxu1 }
 0x5ff   : > { %v7131_v58 = vadd.f32 %v7775_v42, %v7130_v47  ;;  %v9754_v60 = vpop.f32.mrb[37].mxu1 }
 0x601   : > { %7136 = vst.msk [vmem:[%s422_s26] sm:$0xff] %vm7135_vm8, %v7131_v58 }
 0x602 PF: > { %s23_s21 = sadd.s32 1, %s10816_s21  }
 0x603   : > { %p20_p4 = scmp.ge.s32.totalorder %s23_s21, 4  }
 0x605   :  { %22 = sbr.rel (!%p20_p4) target bundleno = 1 (0x1), region = 130 }

</bundles_post_ra>
